<compile_context>
chip_gen: v6e
topology: v6e:2x2x1
jax: 0.10.0
libtpu: 0.0.40
codegen_flags: <defaults>
</compile_context>

<pallas_src>
import numpy as np
import jax
import jax.numpy as jnp
from jax.experimental import pallas as pl
from jax.experimental.pallas import tpu as pltpu

# ----- small, shape-consistent configuration -----
B, S_SRC, T_TRG = 2, 8, 8          # batch, source length, target length
E, H = 32, 32                      # emb_dim, hid_dim
V_IN, V_OUT = 16, 16               # input / target vocab sizes
N_LAYERS = 2
G = 4 * H                          # LSTM gate width (one full 128-lane group)
assert G == 128 and T_TRG * V_OUT == G


def _round8(n):
    return ((n + 7) // 8) * 8


# ---- weight-pack row layout: everything stacked into one (W_ROWS, 128) array,
#      every chunk padded to a multiple of 8 rows so static slices are 8-aligned.
_W_LAYOUT = (("ew_hh0", H), ("ew_ih1", H), ("ew_hh1", H), ("eb1", 1),
             ("demb_ih0", V_OUT), ("dw_hh0", H), ("db0", 1),
             ("dw_ih1", H), ("dw_hh1", H), ("db1", 1),
             ("fc_w", H), ("fc_b", 1))
W_OFF = {}
_o = 0
for _name, _rows in _W_LAYOUT:
    W_OFF[_name] = _o
    _o += _round8(_rows)
W_ROWS = _o                         # 272

# ---- data-pack row layout (per-call activations) ----
D_MASK = 0                          # (S_SRC*B, 128) packed-seq valid mask (0/1)
D_XPROJ = S_SRC * B                 # (S_SRC*B, 128) encoder layer-0  x@W_ih0 + b0
D_TRG0 = 2 * S_SRC * B              # (B, 128) one-hot of trg[:, 0] (lanes :V_OUT)
D_ROWS = D_TRG0 + _round8(B)        # 40


def _gates_to_hc(gates, c):
    """PyTorch LSTM gate semantics (i, f, g, o) from pre-activation gates (B, 4H).

    sigmoid is applied once to the full (B, 4H) vreg (1 EUP push); tanh twice
    -> 3 EUP pushes per cell.  The lane-offset gate slices (32/64/96) cost a
    few XLU rotates per cell; acceptable at 30 cells total.
    """
    sg = jax.nn.sigmoid(gates)
    i = sg[:, 0 * H:1 * H]
    f = sg[:, 1 * H:2 * H]
    o = sg[:, 3 * H:4 * H]
    g = jnp.tanh(gates[:, 2 * H:3 * H])
    c_new = f * c + i * g
    h_new = o * jnp.tanh(c_new)
    return h_new, c_new


def seq2seq_kernel(dref, wref, out_ref):
    # state lives in vregs (loop carries), not VMEM scratch
    h0 = jnp.zeros((B, H), jnp.float32)
    c0 = jnp.zeros((B, H), jnp.float32)
    h1 = jnp.zeros((B, H), jnp.float32)
    c1 = jnp.zeros((B, H), jnp.float32)

    # ---------------- encoder: 2-layer LSTM over the source ----------------
    # encoder-only weights loaded here so they are dead after this loop
    ew_hh0 = wref[W_OFF["ew_hh0"]:W_OFF["ew_hh0"] + H, :]
    ew_ih1 = wref[W_OFF["ew_ih1"]:W_OFF["ew_ih1"] + H, :]
    ew_hh1 = wref[W_OFF["ew_hh1"]:W_OFF["ew_hh1"] + H, :]
    eb1 = wref[W_OFF["eb1"]:W_OFF["eb1"] + 1, :]

    for t in range(S_SRC):                                 # static unroll
        # layer-0 input projection (x @ W_ih0 + b0) precomputed in the wrapper
        r = D_XPROJ + t * B
        gates0 = dref[r:r + B, :] + jnp.dot(
            h0, ew_hh0, preferred_element_type=jnp.float32)
        nh0, nc0 = _gates_to_hc(gates0, c0)
        # single expression: on v7x the 2nd vmatmul accumulates in the MRB
        gates1 = (jnp.dot(nh0, ew_ih1, preferred_element_type=jnp.float32)
                  + jnp.dot(h1, ew_hh1, preferred_element_type=jnp.float32)
                  + eb1)
        nh1, nc1 = _gates_to_hc(gates1, c1)
        # packed-seq masking: freeze (h, c) for rows with t >= length
        m = D_MASK + t * B
        valid = dref[m:m + B, :][:, :H] > 0.5
        h0 = jnp.where(valid, nh0, h0)
        c0 = jnp.where(valid, nc0, c0)
        h1 = jnp.where(valid, nh1, h1)
        c1 = jnp.where(valid, nc1, c1)

    # ---------------- decoder: greedy (teacher_forcing_ratio = 0.0) --------
    demb_ih0 = wref[W_OFF["demb_ih0"]:W_OFF["demb_ih0"] + V_OUT, :]  # dec_emb@W_ih0
    dw_hh0 = wref[W_OFF["dw_hh0"]:W_OFF["dw_hh0"] + H, :]
    db0 = wref[W_OFF["db0"]:W_OFF["db0"] + 1, :]
    dw_ih1 = wref[W_OFF["dw_ih1"]:W_OFF["dw_ih1"] + H, :]
    dw_hh1 = wref[W_OFF["dw_hh1"]:W_OFF["dw_hh1"] + H, :]
    db1 = wref[W_OFF["db1"]:W_OFF["db1"] + 1, :]
    fc_w = wref[W_OFF["fc_w"]:W_OFF["fc_w"] + H, :]    # (H,128), cols >= V_OUT are 0
    fc_b = wref[W_OFF["fc_b"]:W_OFF["fc_b"] + 1, :]    # (1,128), lanes >= V_OUT are 0

    onehot = dref[D_TRG0:D_TRG0 + B, :][:, :V_OUT]     # one-hot of trg[:, 0]
    slab = jnp.zeros((B, T_TRG * V_OUT), jnp.float32)  # lane-dense output accumulator

    for t in range(1, T_TRG):                           # static unroll
        # embedding + W_ih fused: onehot @ (dec_emb @ W_ih0)
        gates0 = (jnp.dot(onehot, demb_ih0, preferred_element_type=jnp.float32)
                  + jnp.dot(h0, dw_hh0, preferred_element_type=jnp.float32)
                  + db0)
        nh0, nc0 = _gates_to_hc(gates0, c0)
        gates1 = (jnp.dot(nh0, dw_ih1, preferred_element_type=jnp.float32)
                  + jnp.dot(h1, dw_hh1, preferred_element_type=jnp.float32)
                  + db1)
        nh1, nc1 = _gates_to_hc(gates1, c1)
        h0, c0, h1, c1 = nh0, nc0, nh1, nc1

        # fc_w/fc_b pad lanes are 0, so pred lanes >= V_OUT are exactly 0 and
        # the rolled contribution lands only in this step's 16-lane group.
        pred = jnp.dot(nh1, fc_w, preferred_element_type=jnp.float32) + fc_b  # (B,128)
        slab = slab + pltpu.roll(pred, t * V_OUT, axis=1)   # XLU, off critical chain
        logits = pred[:, :V_OUT]
        mx = jnp.max(logits, axis=-1, keepdims=True)         # single XLU reduce
        # next-step input: one-hot of the max (ties: measure-zero diff vs argmax)
        onehot = (logits == mx).astype(jnp.float32)

    out_ref[...] = slab                                   # single unmasked 128-lane store


# ---------------- wrapper: packing + pallas_call ----------------------------
def _pad_block(a, cols=G):
    r, c = a.shape
    return jnp.pad(a, ((0, _round8(r) - r), (0, cols - c)))


def pack_weights(params):
    P = jax.lax.Precision.HIGHEST
    demb_ih0 = jnp.dot(params["dec_emb"], params["dw_ih0"], precision=P)  # (V_OUT, 4H)
    chunks = {"ew_hh0": params["ew_hh0"], "ew_ih1": params["ew_ih1"],
              "ew_hh1": params["ew_hh1"], "eb1": params["eb1"],
              "demb_ih0": demb_ih0,
              "dw_hh0": params["dw_hh0"], "db0": params["db0"],
              "dw_ih1": params["dw_ih1"], "dw_hh1": params["dw_hh1"],
              "db1": params["db1"],
              "fc_w": params["fc_w"], "fc_b": params["fc_b"]}
    return jnp.concatenate([_pad_block(chunks[n]) for n, _ in _W_LAYOUT], axis=0)


def pack_data(params, src, src_lengths, trg):
    P = jax.lax.Precision.HIGHEST
    src_emb = params["enc_emb"][src].astype(jnp.float32)               # (B, S, E)
    xproj = (jnp.einsum("bse,ef->bsf", src_emb, params["ew_ih0"], precision=P)
             + params["eb0"])                                          # (B, S, 4H)
    xproj_flat = jnp.transpose(xproj, (1, 0, 2)).reshape(S_SRC * B, G)  # row = t*B + b
    t_idx = jnp.arange(S_SRC, dtype=jnp.int32)[:, None]
    valid = (t_idx < src_lengths[None, :].astype(jnp.int32)).astype(jnp.float32)  # (S,B)
    mask_rows = jnp.broadcast_to(valid.reshape(S_SRC * B, 1), (S_SRC * B, G))
    trg0 = jax.nn.one_hot(trg[:, 0], V_OUT, dtype=jnp.float32)         # (B, V_OUT)
    return jnp.concatenate([mask_rows, xproj_flat, _pad_block(trg0)], axis=0)


def seq2seq_forward(params, src, src_lengths, trg):
    dpack = pack_data(params, src, src_lengths, trg)     # (D_ROWS, 128) = (40, 128)
    wpack = pack_weights(params)                         # (W_ROWS, 128) = (272, 128)
    out = pl.pallas_call(
        seq2seq_kernel,
        out_shape=jax.ShapeDtypeStruct((B, T_TRG * V_OUT), jnp.float32),
        in_specs=[pl.BlockSpec(memory_space=pltpu.MemorySpace.VMEM)] * 2,
        out_specs=pl.BlockSpec(memory_space=pltpu.MemorySpace.VMEM),
    )(dpack, wpack)
    return out.reshape(B, T_TRG, V_OUT)                  # (B, T_trg, V_OUT), torch layout


# ---------------- pure-JAX reference (mirrors the PyTorch forward) ----------
def _cell_ref(x, h, c, w_ih, w_hh, b):
    P = jax.lax.Precision.HIGHEST
    gates = jnp.dot(x, w_ih, precision=P) + jnp.dot(h, w_hh, precision=P) + b
    i = jax.nn.sigmoid(gates[:, 0 * H:1 * H])
    f = jax.nn.sigmoid(gates[:, 1 * H:2 * H])
    g = jnp.tanh(gates[:, 2 * H:3 * H])
    o = jax.nn.sigmoid(gates[:, 3 * H:4 * H])
    c_new = f * c + i * g
    return o * jnp.tanh(c_new), c_new


def reference_forward(params, src, src_lengths, trg):
    P = jax.lax.Precision.HIGHEST
    emb = params["enc_emb"][src]                                   # (B, S, E)
    h = [jnp.zeros((B, H), jnp.float32) for _ in range(N_LAYERS)]
    c = [jnp.zeros((B, H), jnp.float32) for _ in range(N_LAYERS)]
    for t in range(S_SRC):
        x = emb[:, t]
        nh0, nc0 = _cell_ref(x, h[0], c[0], params["ew_ih0"], params["ew_hh0"], params["eb0"])
        nh1, nc1 = _cell_ref(nh0, h[1], c[1], params["ew_ih1"], params["ew_hh1"], params["eb1"])
        m = (src_lengths > t)[:, None]
        h[0] = jnp.where(m, nh0, h[0]); c[0] = jnp.where(m, nc0, c[0])
        h[1] = jnp.where(m, nh1, h[1]); c[1] = jnp.where(m, nc1, c[1])
    outputs = jnp.zeros((B, T_TRG, V_OUT), jnp.float32)
    inp = trg[:, 0]
    for t in range(1, T_TRG):
        x = params["dec_emb"][inp]
        nh0, nc0 = _cell_ref(x, h[0], c[0], params["dw_ih0"], params["dw_hh0"], params["db0"])
        nh1, nc1 = _cell_ref(nh0, h[1], c[1], params["dw_ih1"], params["dw_hh1"], params["db1"])
        h[0], c[0], h[1], c[1] = nh0, nc0, nh1, nc1
        pred = jnp.dot(nh1, params["fc_w"], precision=P) + params["fc_b"]
        outputs = outputs.at[:, t].set(pred)
        inp = jnp.argmax(pred, axis=1)
    return outputs


def init_params(key):
    ks = jax.random.split(key, 16)
    s = 1.0 / np.sqrt(H)

    def u(k, shape, scale):
        return jax.random.uniform(k, shape, jnp.float32, -scale, scale)

    return {
        "enc_emb": u(ks[0], (V_IN, E), 0.5),
        "dec_emb": u(ks[1], (V_OUT, E), 0.5),
        # encoder LSTM (weights stored transposed for x @ W)
        "ew_ih0": u(ks[2], (E, 4 * H), s), "ew_hh0": u(ks[3], (H, 4 * H), s), "eb0": u(ks[4], (1, 4 * H), s),
        "ew_ih1": u(ks[5], (H, 4 * H), s), "ew_hh1": u(ks[6], (H, 4 * H), s), "eb1": u(ks[7], (1, 4 * H), s),
        # decoder LSTM
        "dw_ih0": u(ks[8], (E, 4 * H), s), "dw_hh0": u(ks[9], (H, 4 * H), s), "db0": u(ks[10], (1, 4 * H), s),
        "dw_ih1": u(ks[11], (H, 4 * H), s), "dw_hh1": u(ks[12], (H, 4 * H), s), "db1": u(ks[13], (1, 4 * H), s),
        # final projection
        "fc_w": u(ks[14], (H, V_OUT), s), "fc_b": u(ks[15], (1, V_OUT), s),
    }


if __name__ == "__main__":
    key = jax.random.PRNGKey(0)
    kp, ks, kt = jax.random.split(key, 3)
    params = init_params(kp)

    src = jax.random.randint(ks, (B, S_SRC), 0, V_IN, dtype=jnp.int32)
    trg = jax.random.randint(kt, (B, T_TRG), 0, V_OUT, dtype=jnp.int32)
    src_lengths = jnp.array([S_SRC, S_SRC - 3], dtype=jnp.int32)   # variable lengths

    out = jax.jit(seq2seq_forward)(params, src, src_lengths, trg)
    out = jax.block_until_ready(out)

    ref = reference_forward(params, src, src_lengths, trg)
    np.testing.assert_allclose(np.asarray(out), np.asarray(ref), rtol=1e-3, atol=1e-3)

    print("KERNEL_OK")
</pallas_src>

<mosaic_0001>
module attributes {stable_mosaic.version = 11 : i64} {
  func.func @seq2seq_kernel(%arg0: memref<40x128xf32, #tpu.memory_space<vmem>>, %arg1: memref<272x128xf32, #tpu.memory_space<vmem>>, %arg2: memref<2x128xf32, #tpu.memory_space<vmem>>) attributes {dimension_semantics = [], scalar_prefetch = 0 : i64, scratch_operands = 0 : i64, tpu.core_type = #tpu.core_type<tc>} {
    %cst = arith.constant 0.000000e+00 : f32
    %0 = vector.broadcast %cst : f32 to vector<2x32xf32>
    %cst_0 = arith.constant 0.000000e+00 : f32
    %1 = vector.broadcast %cst_0 : f32 to vector<2x32xf32>
    %cst_1 = arith.constant 0.000000e+00 : f32
    %2 = vector.broadcast %cst_1 : f32 to vector<2x32xf32>
    %cst_2 = arith.constant 0.000000e+00 : f32
    %3 = vector.broadcast %cst_2 : f32 to vector<2x32xf32>
    %c0 = arith.constant 0 : index
    %c0_3 = arith.constant 0 : index
    %4 = vector.load %arg1[%c0, %c0_3] : memref<272x128xf32, #tpu.memory_space<vmem>>, vector<32x128xf32>
    %c32 = arith.constant 32 : index
    %c0_4 = arith.constant 0 : index
    %5 = vector.load %arg1[%c32, %c0_4] : memref<272x128xf32, #tpu.memory_space<vmem>>, vector<32x128xf32>
    %c64 = arith.constant 64 : index
    %c0_5 = arith.constant 0 : index
    %6 = vector.load %arg1[%c64, %c0_5] : memref<272x128xf32, #tpu.memory_space<vmem>>, vector<32x128xf32>
    %c96 = arith.constant 96 : index
    %c0_6 = arith.constant 0 : index
    %7 = vector.load %arg1[%c96, %c0_6] : memref<272x128xf32, #tpu.memory_space<vmem>>, vector<1x128xf32>
    %c16 = arith.constant 16 : index
    %c0_7 = arith.constant 0 : index
    %8 = vector.load %arg0[%c16, %c0_7] : memref<40x128xf32, #tpu.memory_space<vmem>>, vector<2x128xf32>
    %cst_8 = arith.constant dense<0.000000e+00> : vector<2x128xf32>
    %9 = tpu.matmul %0, %4, %cst_8 {dimension_numbers = #tpu.dot_dimension_numbers<[1], [0], [0], [1], [0, 0, 1, 1], [], []>} : vector<2x32xf32>, vector<32x128xf32>, vector<2x128xf32> -> vector<2x128xf32>
    %10 = arith.addf %8, %9 : vector<2x128xf32>
    %11 = arith.negf %10 : vector<2x128xf32>
    %12 = math.exp %11 : vector<2x128xf32>
    %cst_9 = arith.constant 1.000000e+00 : f32
    %13 = vector.broadcast %cst_9 : f32 to vector<2x128xf32>
    %14 = arith.addf %13, %12 : vector<2x128xf32>
    %15 = arith.divf %13, %14 : vector<2x128xf32>
    %16 = vector.extract_strided_slice %15 {offsets = [0, 0], sizes = [2, 32], strides = [1, 1]} : vector<2x128xf32> to vector<2x32xf32>
    %17 = vector.extract_strided_slice %15 {offsets = [0, 32], sizes = [2, 32], strides = [1, 1]} : vector<2x128xf32> to vector<2x32xf32>
    %18 = vector.extract_strided_slice %15 {offsets = [0, 96], sizes = [2, 32], strides = [1, 1]} : vector<2x128xf32> to vector<2x32xf32>
    %19 = vector.extract_strided_slice %10 {offsets = [0, 64], sizes = [2, 32], strides = [1, 1]} : vector<2x128xf32> to vector<2x32xf32>
    %20 = math.tanh %19 : vector<2x32xf32>
    %21 = arith.mulf %17, %1 : vector<2x32xf32>
    %22 = arith.mulf %16, %20 : vector<2x32xf32>
    %23 = arith.addf %21, %22 : vector<2x32xf32>
    %24 = math.tanh %23 : vector<2x32xf32>
    %25 = arith.mulf %18, %24 : vector<2x32xf32>
    %cst_10 = arith.constant dense<0.000000e+00> : vector<2x128xf32>
    %26 = tpu.matmul %25, %5, %cst_10 {dimension_numbers = #tpu.dot_dimension_numbers<[1], [0], [0], [1], [0, 0, 1, 1], [], []>} : vector<2x32xf32>, vector<32x128xf32>, vector<2x128xf32> -> vector<2x128xf32>
    %cst_11 = arith.constant dense<0.000000e+00> : vector<2x128xf32>
    %27 = tpu.matmul %2, %6, %cst_11 {dimension_numbers = #tpu.dot_dimension_numbers<[1], [0], [0], [1], [0, 0, 1, 1], [], []>} : vector<2x32xf32>, vector<32x128xf32>, vector<2x128xf32> -> vector<2x128xf32>
    %28 = arith.addf %26, %27 : vector<2x128xf32>
    %29 = vector.broadcast %7 : vector<1x128xf32> to vector<2x128xf32>
    %30 = arith.addf %28, %29 : vector<2x128xf32>
    %31 = arith.negf %30 : vector<2x128xf32>
    %32 = math.exp %31 : vector<2x128xf32>
    %cst_12 = arith.constant 1.000000e+00 : f32
    %33 = vector.broadcast %cst_12 : f32 to vector<2x128xf32>
    %34 = arith.addf %33, %32 : vector<2x128xf32>
    %35 = arith.divf %33, %34 : vector<2x128xf32>
    %36 = vector.extract_strided_slice %35 {offsets = [0, 0], sizes = [2, 32], strides = [1, 1]} : vector<2x128xf32> to vector<2x32xf32>
    %37 = vector.extract_strided_slice %35 {offsets = [0, 32], sizes = [2, 32], strides = [1, 1]} : vector<2x128xf32> to vector<2x32xf32>
    %38 = vector.extract_strided_slice %35 {offsets = [0, 96], sizes = [2, 32], strides = [1, 1]} : vector<2x128xf32> to vector<2x32xf32>
    %39 = vector.extract_strided_slice %30 {offsets = [0, 64], sizes = [2, 32], strides = [1, 1]} : vector<2x128xf32> to vector<2x32xf32>
    %40 = math.tanh %39 : vector<2x32xf32>
    %41 = arith.mulf %37, %3 : vector<2x32xf32>
    %42 = arith.mulf %36, %40 : vector<2x32xf32>
    %43 = arith.addf %41, %42 : vector<2x32xf32>
    %44 = math.tanh %43 : vector<2x32xf32>
    %45 = arith.mulf %38, %44 : vector<2x32xf32>
    %c0_13 = arith.constant 0 : index
    %c0_14 = arith.constant 0 : index
    %46 = vector.load %arg0[%c0_13, %c0_14] : memref<40x128xf32, #tpu.memory_space<vmem>>, vector<2x128xf32>
    %47 = vector.extract_strided_slice %46 {offsets = [0, 0], sizes = [2, 32], strides = [1, 1]} : vector<2x128xf32> to vector<2x32xf32>
    %cst_15 = arith.constant 5.000000e-01 : f32
    %48 = vector.broadcast %cst_15 : f32 to vector<2x32xf32>
    %49 = arith.cmpf ogt, %47, %48 : vector<2x32xf32>
    %50 = arith.select %49, %25, %0 : vector<2x32xi1>, vector<2x32xf32>
    %51 = arith.select %49, %23, %1 : vector<2x32xi1>, vector<2x32xf32>
    %52 = arith.select %49, %45, %2 : vector<2x32xi1>, vector<2x32xf32>
    %53 = arith.select %49, %43, %3 : vector<2x32xi1>, vector<2x32xf32>
    %c18 = arith.constant 18 : index
    %c0_16 = arith.constant 0 : index
    %54 = vector.load %arg0[%c18, %c0_16] : memref<40x128xf32, #tpu.memory_space<vmem>>, vector<2x128xf32>
    %cst_17 = arith.constant dense<0.000000e+00> : vector<2x128xf32>
    %55 = tpu.matmul %50, %4, %cst_17 {dimension_numbers = #tpu.dot_dimension_numbers<[1], [0], [0], [1], [0, 0, 1, 1], [], []>} : vector<2x32xf32>, vector<32x128xf32>, vector<2x128xf32> -> vector<2x128xf32>
    %56 = arith.addf %54, %55 : vector<2x128xf32>
    %57 = arith.negf %56 : vector<2x128xf32>
    %58 = math.exp %57 : vector<2x128xf32>
    %cst_18 = arith.constant 1.000000e+00 : f32
    %59 = vector.broadcast %cst_18 : f32 to vector<2x128xf32>
    %60 = arith.addf %59, %58 : vector<2x128xf32>
    %61 = arith.divf %59, %60 : vector<2x128xf32>
    %62 = vector.extract_strided_slice %61 {offsets = [0, 0], sizes = [2, 32], strides = [1, 1]} : vector<2x128xf32> to vector<2x32xf32>
    %63 = vector.extract_strided_slice %61 {offsets = [0, 32], sizes = [2, 32], strides = [1, 1]} : vector<2x128xf32> to vector<2x32xf32>
    %64 = vector.extract_strided_slice %61 {offsets = [0, 96], sizes = [2, 32], strides = [1, 1]} : vector<2x128xf32> to vector<2x32xf32>
    %65 = vector.extract_strided_slice %56 {offsets = [0, 64], sizes = [2, 32], strides = [1, 1]} : vector<2x128xf32> to vector<2x32xf32>
    %66 = math.tanh %65 : vector<2x32xf32>
    %67 = arith.mulf %63, %51 : vector<2x32xf32>
    %68 = arith.mulf %62, %66 : vector<2x32xf32>
    %69 = arith.addf %67, %68 : vector<2x32xf32>
    %70 = math.tanh %69 : vector<2x32xf32>
    %71 = arith.mulf %64, %70 : vector<2x32xf32>
    %cst_19 = arith.constant dense<0.000000e+00> : vector<2x128xf32>
    %72 = tpu.matmul %71, %5, %cst_19 {dimension_numbers = #tpu.dot_dimension_numbers<[1], [0], [0], [1], [0, 0, 1, 1], [], []>} : vector<2x32xf32>, vector<32x128xf32>, vector<2x128xf32> -> vector<2x128xf32>
    %cst_20 = arith.constant dense<0.000000e+00> : vector<2x128xf32>
    %73 = tpu.matmul %52, %6, %cst_20 {dimension_numbers = #tpu.dot_dimension_numbers<[1], [0], [0], [1], [0, 0, 1, 1], [], []>} : vector<2x32xf32>, vector<32x128xf32>, vector<2x128xf32> -> vector<2x128xf32>
    %74 = arith.addf %72, %73 : vector<2x128xf32>
    %75 = vector.broadcast %7 : vector<1x128xf32> to vector<2x128xf32>
    %76 = arith.addf %74, %75 : vector<2x128xf32>
    %77 = arith.negf %76 : vector<2x128xf32>
    %78 = math.exp %77 : vector<2x128xf32>
    %cst_21 = arith.constant 1.000000e+00 : f32
    %79 = vector.broadcast %cst_21 : f32 to vector<2x128xf32>
    %80 = arith.addf %79, %78 : vector<2x128xf32>
    %81 = arith.divf %79, %80 : vector<2x128xf32>
    %82 = vector.extract_strided_slice %81 {offsets = [0, 0], sizes = [2, 32], strides = [1, 1]} : vector<2x128xf32> to vector<2x32xf32>
    %83 = vector.extract_strided_slice %81 {offsets = [0, 32], sizes = [2, 32], strides = [1, 1]} : vector<2x128xf32> to vector<2x32xf32>
    %84 = vector.extract_strided_slice %81 {offsets = [0, 96], sizes = [2, 32], strides = [1, 1]} : vector<2x128xf32> to vector<2x32xf32>
    %85 = vector.extract_strided_slice %76 {offsets = [0, 64], sizes = [2, 32], strides = [1, 1]} : vector<2x128xf32> to vector<2x32xf32>
    %86 = math.tanh %85 : vector<2x32xf32>
    %87 = arith.mulf %83, %53 : vector<2x32xf32>
    %88 = arith.mulf %82, %86 : vector<2x32xf32>
    %89 = arith.addf %87, %88 : vector<2x32xf32>
    %90 = math.tanh %89 : vector<2x32xf32>
    %91 = arith.mulf %84, %90 : vector<2x32xf32>
    %c2 = arith.constant 2 : index
    %c0_22 = arith.constant 0 : index
    %92 = vector.load %arg0[%c2, %c0_22] : memref<40x128xf32, #tpu.memory_space<vmem>>, vector<2x128xf32>
    %93 = vector.extract_strided_slice %92 {offsets = [0, 0], sizes = [2, 32], strides = [1, 1]} : vector<2x128xf32> to vector<2x32xf32>
    %cst_23 = arith.constant 5.000000e-01 : f32
    %94 = vector.broadcast %cst_23 : f32 to vector<2x32xf32>
    %95 = arith.cmpf ogt, %93, %94 : vector<2x32xf32>
    %96 = arith.select %95, %71, %50 : vector<2x32xi1>, vector<2x32xf32>
    %97 = arith.select %95, %69, %51 : vector<2x32xi1>, vector<2x32xf32>
    %98 = arith.select %95, %91, %52 : vector<2x32xi1>, vector<2x32xf32>
    %99 = arith.select %95, %89, %53 : vector<2x32xi1>, vector<2x32xf32>
    %c20 = arith.constant 20 : index
    %c0_24 = arith.constant 0 : index
    %100 = vector.load %arg0[%c20, %c0_24] : memref<40x128xf32, #tpu.memory_space<vmem>>, vector<2x128xf32>
    %cst_25 = arith.constant dense<0.000000e+00> : vector<2x128xf32>
    %101 = tpu.matmul %96, %4, %cst_25 {dimension_numbers = #tpu.dot_dimension_numbers<[1], [0], [0], [1], [0, 0, 1, 1], [], []>} : vector<2x32xf32>, vector<32x128xf32>, vector<2x128xf32> -> vector<2x128xf32>
    %102 = arith.addf %100, %101 : vector<2x128xf32>
    %103 = arith.negf %102 : vector<2x128xf32>
    %104 = math.exp %103 : vector<2x128xf32>
    %cst_26 = arith.constant 1.000000e+00 : f32
    %105 = vector.broadcast %cst_26 : f32 to vector<2x128xf32>
    %106 = arith.addf %105, %104 : vector<2x128xf32>
    %107 = arith.divf %105, %106 : vector<2x128xf32>
    %108 = vector.extract_strided_slice %107 {offsets = [0, 0], sizes = [2, 32], strides = [1, 1]} : vector<2x128xf32> to vector<2x32xf32>
    %109 = vector.extract_strided_slice %107 {offsets = [0, 32], sizes = [2, 32], strides = [1, 1]} : vector<2x128xf32> to vector<2x32xf32>
    %110 = vector.extract_strided_slice %107 {offsets = [0, 96], sizes = [2, 32], strides = [1, 1]} : vector<2x128xf32> to vector<2x32xf32>
    %111 = vector.extract_strided_slice %102 {offsets = [0, 64], sizes = [2, 32], strides = [1, 1]} : vector<2x128xf32> to vector<2x32xf32>
    %112 = math.tanh %111 : vector<2x32xf32>
    %113 = arith.mulf %109, %97 : vector<2x32xf32>
    %114 = arith.mulf %108, %112 : vector<2x32xf32>
    %115 = arith.addf %113, %114 : vector<2x32xf32>
    %116 = math.tanh %115 : vector<2x32xf32>
    %117 = arith.mulf %110, %116 : vector<2x32xf32>
    %cst_27 = arith.constant dense<0.000000e+00> : vector<2x128xf32>
    %118 = tpu.matmul %117, %5, %cst_27 {dimension_numbers = #tpu.dot_dimension_numbers<[1], [0], [0], [1], [0, 0, 1, 1], [], []>} : vector<2x32xf32>, vector<32x128xf32>, vector<2x128xf32> -> vector<2x128xf32>
    %cst_28 = arith.constant dense<0.000000e+00> : vector<2x128xf32>
    %119 = tpu.matmul %98, %6, %cst_28 {dimension_numbers = #tpu.dot_dimension_numbers<[1], [0], [0], [1], [0, 0, 1, 1], [], []>} : vector<2x32xf32>, vector<32x128xf32>, vector<2x128xf32> -> vector<2x128xf32>
    %120 = arith.addf %118, %119 : vector<2x128xf32>
    %121 = vector.broadcast %7 : vector<1x128xf32> to vector<2x128xf32>
    %122 = arith.addf %120, %121 : vector<2x128xf32>
    %123 = arith.negf %122 : vector<2x128xf32>
    %124 = math.exp %123 : vector<2x128xf32>
    %cst_29 = arith.constant 1.000000e+00 : f32
    %125 = vector.broadcast %cst_29 : f32 to vector<2x128xf32>
    %126 = arith.addf %125, %124 : vector<2x128xf32>
    %127 = arith.divf %125, %126 : vector<2x128xf32>
    %128 = vector.extract_strided_slice %127 {offsets = [0, 0], sizes = [2, 32], strides = [1, 1]} : vector<2x128xf32> to vector<2x32xf32>
    %129 = vector.extract_strided_slice %127 {offsets = [0, 32], sizes = [2, 32], strides = [1, 1]} : vector<2x128xf32> to vector<2x32xf32>
    %130 = vector.extract_strided_slice %127 {offsets = [0, 96], sizes = [2, 32], strides = [1, 1]} : vector<2x128xf32> to vector<2x32xf32>
    %131 = vector.extract_strided_slice %122 {offsets = [0, 64], sizes = [2, 32], strides = [1, 1]} : vector<2x128xf32> to vector<2x32xf32>
    %132 = math.tanh %131 : vector<2x32xf32>
    %133 = arith.mulf %129, %99 : vector<2x32xf32>
    %134 = arith.mulf %128, %132 : vector<2x32xf32>
    %135 = arith.addf %133, %134 : vector<2x32xf32>
    %136 = math.tanh %135 : vector<2x32xf32>
    %137 = arith.mulf %130, %136 : vector<2x32xf32>
    %c4 = arith.constant 4 : index
    %c0_30 = arith.constant 0 : index
    %138 = vector.load %arg0[%c4, %c0_30] : memref<40x128xf32, #tpu.memory_space<vmem>>, vector<2x128xf32>
    %139 = vector.extract_strided_slice %138 {offsets = [0, 0], sizes = [2, 32], strides = [1, 1]} : vector<2x128xf32> to vector<2x32xf32>
    %cst_31 = arith.constant 5.000000e-01 : f32
    %140 = vector.broadcast %cst_31 : f32 to vector<2x32xf32>
    %141 = arith.cmpf ogt, %139, %140 : vector<2x32xf32>
    %142 = arith.select %141, %117, %96 : vector<2x32xi1>, vector<2x32xf32>
    %143 = arith.select %141, %115, %97 : vector<2x32xi1>, vector<2x32xf32>
    %144 = arith.select %141, %137, %98 : vector<2x32xi1>, vector<2x32xf32>
    %145 = arith.select %141, %135, %99 : vector<2x32xi1>, vector<2x32xf32>
    %c22 = arith.constant 22 : index
    %c0_32 = arith.constant 0 : index
    %146 = vector.load %arg0[%c22, %c0_32] : memref<40x128xf32, #tpu.memory_space<vmem>>, vector<2x128xf32>
    %cst_33 = arith.constant dense<0.000000e+00> : vector<2x128xf32>
    %147 = tpu.matmul %142, %4, %cst_33 {dimension_numbers = #tpu.dot_dimension_numbers<[1], [0], [0], [1], [0, 0, 1, 1], [], []>} : vector<2x32xf32>, vector<32x128xf32>, vector<2x128xf32> -> vector<2x128xf32>
    %148 = arith.addf %146, %147 : vector<2x128xf32>
    %149 = arith.negf %148 : vector<2x128xf32>
    %150 = math.exp %149 : vector<2x128xf32>
    %cst_34 = arith.constant 1.000000e+00 : f32
    %151 = vector.broadcast %cst_34 : f32 to vector<2x128xf32>
    %152 = arith.addf %151, %150 : vector<2x128xf32>
    %153 = arith.divf %151, %152 : vector<2x128xf32>
    %154 = vector.extract_strided_slice %153 {offsets = [0, 0], sizes = [2, 32], strides = [1, 1]} : vector<2x128xf32> to vector<2x32xf32>
    %155 = vector.extract_strided_slice %153 {offsets = [0, 32], sizes = [2, 32], strides = [1, 1]} : vector<2x128xf32> to vector<2x32xf32>
    %156 = vector.extract_strided_slice %153 {offsets = [0, 96], sizes = [2, 32], strides = [1, 1]} : vector<2x128xf32> to vector<2x32xf32>
    %157 = vector.extract_strided_slice %148 {offsets = [0, 64], sizes = [2, 32], strides = [1, 1]} : vector<2x128xf32> to vector<2x32xf32>
    %158 = math.tanh %157 : vector<2x32xf32>
    %159 = arith.mulf %155, %143 : vector<2x32xf32>
    %160 = arith.mulf %154, %158 : vector<2x32xf32>
    %161 = arith.addf %159, %160 : vector<2x32xf32>
    %162 = math.tanh %161 : vector<2x32xf32>
    %163 = arith.mulf %156, %162 : vector<2x32xf32>
    %cst_35 = arith.constant dense<0.000000e+00> : vector<2x128xf32>
    %164 = tpu.matmul %163, %5, %cst_35 {dimension_numbers = #tpu.dot_dimension_numbers<[1], [0], [0], [1], [0, 0, 1, 1], [], []>} : vector<2x32xf32>, vector<32x128xf32>, vector<2x128xf32> -> vector<2x128xf32>
    %cst_36 = arith.constant dense<0.000000e+00> : vector<2x128xf32>
    %165 = tpu.matmul %144, %6, %cst_36 {dimension_numbers = #tpu.dot_dimension_numbers<[1], [0], [0], [1], [0, 0, 1, 1], [], []>} : vector<2x32xf32>, vector<32x128xf32>, vector<2x128xf32> -> vector<2x128xf32>
    %166 = arith.addf %164, %165 : vector<2x128xf32>
    %167 = vector.broadcast %7 : vector<1x128xf32> to vector<2x128xf32>
    %168 = arith.addf %166, %167 : vector<2x128xf32>
    %169 = arith.negf %168 : vector<2x128xf32>
    %170 = math.exp %169 : vector<2x128xf32>
    %cst_37 = arith.constant 1.000000e+00 : f32
    %171 = vector.broadcast %cst_37 : f32 to vector<2x128xf32>
    %172 = arith.addf %171, %170 : vector<2x128xf32>
    %173 = arith.divf %171, %172 : vector<2x128xf32>
    %174 = vector.extract_strided_slice %173 {offsets = [0, 0], sizes = [2, 32], strides = [1, 1]} : vector<2x128xf32> to vector<2x32xf32>
    %175 = vector.extract_strided_slice %173 {offsets = [0, 32], sizes = [2, 32], strides = [1, 1]} : vector<2x128xf32> to vector<2x32xf32>
    %176 = vector.extract_strided_slice %173 {offsets = [0, 96], sizes = [2, 32], strides = [1, 1]} : vector<2x128xf32> to vector<2x32xf32>
    %177 = vector.extract_strided_slice %168 {offsets = [0, 64], sizes = [2, 32], strides = [1, 1]} : vector<2x128xf32> to vector<2x32xf32>
    %178 = math.tanh %177 : vector<2x32xf32>
    %179 = arith.mulf %175, %145 : vector<2x32xf32>
    %180 = arith.mulf %174, %178 : vector<2x32xf32>
    %181 = arith.addf %179, %180 : vector<2x32xf32>
    %182 = math.tanh %181 : vector<2x32xf32>
    %183 = arith.mulf %176, %182 : vector<2x32xf32>
    %c6 = arith.constant 6 : index
    %c0_38 = arith.constant 0 : index
    %184 = vector.load %arg0[%c6, %c0_38] : memref<40x128xf32, #tpu.memory_space<vmem>>, vector<2x128xf32>
    %185 = vector.extract_strided_slice %184 {offsets = [0, 0], sizes = [2, 32], strides = [1, 1]} : vector<2x128xf32> to vector<2x32xf32>
    %cst_39 = arith.constant 5.000000e-01 : f32
    %186 = vector.broadcast %cst_39 : f32 to vector<2x32xf32>
    %187 = arith.cmpf ogt, %185, %186 : vector<2x32xf32>
    %188 = arith.select %187, %163, %142 : vector<2x32xi1>, vector<2x32xf32>
    %189 = arith.select %187, %161, %143 : vector<2x32xi1>, vector<2x32xf32>
    %190 = arith.select %187, %183, %144 : vector<2x32xi1>, vector<2x32xf32>
    %191 = arith.select %187, %181, %145 : vector<2x32xi1>, vector<2x32xf32>
    %c24 = arith.constant 24 : index
    %c0_40 = arith.constant 0 : index
    %192 = vector.load %arg0[%c24, %c0_40] : memref<40x128xf32, #tpu.memory_space<vmem>>, vector<2x128xf32>
    %cst_41 = arith.constant dense<0.000000e+00> : vector<2x128xf32>
    %193 = tpu.matmul %188, %4, %cst_41 {dimension_numbers = #tpu.dot_dimension_numbers<[1], [0], [0], [1], [0, 0, 1, 1], [], []>} : vector<2x32xf32>, vector<32x128xf32>, vector<2x128xf32> -> vector<2x128xf32>
    %194 = arith.addf %192, %193 : vector<2x128xf32>
    %195 = arith.negf %194 : vector<2x128xf32>
    %196 = math.exp %195 : vector<2x128xf32>
    %cst_42 = arith.constant 1.000000e+00 : f32
    %197 = vector.broadcast %cst_42 : f32 to vector<2x128xf32>
    %198 = arith.addf %197, %196 : vector<2x128xf32>
    %199 = arith.divf %197, %198 : vector<2x128xf32>
    %200 = vector.extract_strided_slice %199 {offsets = [0, 0], sizes = [2, 32], strides = [1, 1]} : vector<2x128xf32> to vector<2x32xf32>
    %201 = vector.extract_strided_slice %199 {offsets = [0, 32], sizes = [2, 32], strides = [1, 1]} : vector<2x128xf32> to vector<2x32xf32>
    %202 = vector.extract_strided_slice %199 {offsets = [0, 96], sizes = [2, 32], strides = [1, 1]} : vector<2x128xf32> to vector<2x32xf32>
    %203 = vector.extract_strided_slice %194 {offsets = [0, 64], sizes = [2, 32], strides = [1, 1]} : vector<2x128xf32> to vector<2x32xf32>
    %204 = math.tanh %203 : vector<2x32xf32>
    %205 = arith.mulf %201, %189 : vector<2x32xf32>
    %206 = arith.mulf %200, %204 : vector<2x32xf32>
    %207 = arith.addf %205, %206 : vector<2x32xf32>
    %208 = math.tanh %207 : vector<2x32xf32>
    %209 = arith.mulf %202, %208 : vector<2x32xf32>
    %cst_43 = arith.constant dense<0.000000e+00> : vector<2x128xf32>
    %210 = tpu.matmul %209, %5, %cst_43 {dimension_numbers = #tpu.dot_dimension_numbers<[1], [0], [0], [1], [0, 0, 1, 1], [], []>} : vector<2x32xf32>, vector<32x128xf32>, vector<2x128xf32> -> vector<2x128xf32>
    %cst_44 = arith.constant dense<0.000000e+00> : vector<2x128xf32>
    %211 = tpu.matmul %190, %6, %cst_44 {dimension_numbers = #tpu.dot_dimension_numbers<[1], [0], [0], [1], [0, 0, 1, 1], [], []>} : vector<2x32xf32>, vector<32x128xf32>, vector<2x128xf32> -> vector<2x128xf32>
    %212 = arith.addf %210, %211 : vector<2x128xf32>
    %213 = vector.broadcast %7 : vector<1x128xf32> to vector<2x128xf32>
    %214 = arith.addf %212, %213 : vector<2x128xf32>
    %215 = arith.negf %214 : vector<2x128xf32>
    %216 = math.exp %215 : vector<2x128xf32>
    %cst_45 = arith.constant 1.000000e+00 : f32
    %217 = vector.broadcast %cst_45 : f32 to vector<2x128xf32>
    %218 = arith.addf %217, %216 : vector<2x128xf32>
    %219 = arith.divf %217, %218 : vector<2x128xf32>
    %220 = vector.extract_strided_slice %219 {offsets = [0, 0], sizes = [2, 32], strides = [1, 1]} : vector<2x128xf32> to vector<2x32xf32>
    %221 = vector.extract_strided_slice %219 {offsets = [0, 32], sizes = [2, 32], strides = [1, 1]} : vector<2x128xf32> to vector<2x32xf32>
    %222 = vector.extract_strided_slice %219 {offsets = [0, 96], sizes = [2, 32], strides = [1, 1]} : vector<2x128xf32> to vector<2x32xf32>
    %223 = vector.extract_strided_slice %214 {offsets = [0, 64], sizes = [2, 32], strides = [1, 1]} : vector<2x128xf32> to vector<2x32xf32>
    %224 = math.tanh %223 : vector<2x32xf32>
    %225 = arith.mulf %221, %191 : vector<2x32xf32>
    %226 = arith.mulf %220, %224 : vector<2x32xf32>
    %227 = arith.addf %225, %226 : vector<2x32xf32>
    %228 = math.tanh %227 : vector<2x32xf32>
    %229 = arith.mulf %222, %228 : vector<2x32xf32>
    %c8 = arith.constant 8 : index
    %c0_46 = arith.constant 0 : index
    %230 = vector.load %arg0[%c8, %c0_46] : memref<40x128xf32, #tpu.memory_space<vmem>>, vector<2x128xf32>
    %231 = vector.extract_strided_slice %230 {offsets = [0, 0], sizes = [2, 32], strides = [1, 1]} : vector<2x128xf32> to vector<2x32xf32>
    %cst_47 = arith.constant 5.000000e-01 : f32
    %232 = vector.broadcast %cst_47 : f32 to vector<2x32xf32>
    %233 = arith.cmpf ogt, %231, %232 : vector<2x32xf32>
    %234 = arith.select %233, %209, %188 : vector<2x32xi1>, vector<2x32xf32>
    %235 = arith.select %233, %207, %189 : vector<2x32xi1>, vector<2x32xf32>
    %236 = arith.select %233, %229, %190 : vector<2x32xi1>, vector<2x32xf32>
    %237 = arith.select %233, %227, %191 : vector<2x32xi1>, vector<2x32xf32>
    %c26 = arith.constant 26 : index
    %c0_48 = arith.constant 0 : index
    %238 = vector.load %arg0[%c26, %c0_48] : memref<40x128xf32, #tpu.memory_space<vmem>>, vector<2x128xf32>
    %cst_49 = arith.constant dense<0.000000e+00> : vector<2x128xf32>
    %239 = tpu.matmul %234, %4, %cst_49 {dimension_numbers = #tpu.dot_dimension_numbers<[1], [0], [0], [1], [0, 0, 1, 1], [], []>} : vector<2x32xf32>, vector<32x128xf32>, vector<2x128xf32> -> vector<2x128xf32>
    %240 = arith.addf %238, %239 : vector<2x128xf32>
    %241 = arith.negf %240 : vector<2x128xf32>
    %242 = math.exp %241 : vector<2x128xf32>
    %cst_50 = arith.constant 1.000000e+00 : f32
    %243 = vector.broadcast %cst_50 : f32 to vector<2x128xf32>
    %244 = arith.addf %243, %242 : vector<2x128xf32>
    %245 = arith.divf %243, %244 : vector<2x128xf32>
    %246 = vector.extract_strided_slice %245 {offsets = [0, 0], sizes = [2, 32], strides = [1, 1]} : vector<2x128xf32> to vector<2x32xf32>
    %247 = vector.extract_strided_slice %245 {offsets = [0, 32], sizes = [2, 32], strides = [1, 1]} : vector<2x128xf32> to vector<2x32xf32>
    %248 = vector.extract_strided_slice %245 {offsets = [0, 96], sizes = [2, 32], strides = [1, 1]} : vector<2x128xf32> to vector<2x32xf32>
    %249 = vector.extract_strided_slice %240 {offsets = [0, 64], sizes = [2, 32], strides = [1, 1]} : vector<2x128xf32> to vector<2x32xf32>
    %250 = math.tanh %249 : vector<2x32xf32>
    %251 = arith.mulf %247, %235 : vector<2x32xf32>
    %252 = arith.mulf %246, %250 : vector<2x32xf32>
    %253 = arith.addf %251, %252 : vector<2x32xf32>
    %254 = math.tanh %253 : vector<2x32xf32>
    %255 = arith.mulf %248, %254 : vector<2x32xf32>
    %cst_51 = arith.constant dense<0.000000e+00> : vector<2x128xf32>
    %256 = tpu.matmul %255, %5, %cst_51 {dimension_numbers = #tpu.dot_dimension_numbers<[1], [0], [0], [1], [0, 0, 1, 1], [], []>} : vector<2x32xf32>, vector<32x128xf32>, vector<2x128xf32> -> vector<2x128xf32>
    %cst_52 = arith.constant dense<0.000000e+00> : vector<2x128xf32>
    %257 = tpu.matmul %236, %6, %cst_52 {dimension_numbers = #tpu.dot_dimension_numbers<[1], [0], [0], [1], [0, 0, 1, 1], [], []>} : vector<2x32xf32>, vector<32x128xf32>, vector<2x128xf32> -> vector<2x128xf32>
    %258 = arith.addf %256, %257 : vector<2x128xf32>
    %259 = vector.broadcast %7 : vector<1x128xf32> to vector<2x128xf32>
    %260 = arith.addf %258, %259 : vector<2x128xf32>
    %261 = arith.negf %260 : vector<2x128xf32>
    %262 = math.exp %261 : vector<2x128xf32>
    %cst_53 = arith.constant 1.000000e+00 : f32
    %263 = vector.broadcast %cst_53 : f32 to vector<2x128xf32>
    %264 = arith.addf %263, %262 : vector<2x128xf32>
    %265 = arith.divf %263, %264 : vector<2x128xf32>
    %266 = vector.extract_strided_slice %265 {offsets = [0, 0], sizes = [2, 32], strides = [1, 1]} : vector<2x128xf32> to vector<2x32xf32>
    %267 = vector.extract_strided_slice %265 {offsets = [0, 32], sizes = [2, 32], strides = [1, 1]} : vector<2x128xf32> to vector<2x32xf32>
    %268 = vector.extract_strided_slice %265 {offsets = [0, 96], sizes = [2, 32], strides = [1, 1]} : vector<2x128xf32> to vector<2x32xf32>
    %269 = vector.extract_strided_slice %260 {offsets = [0, 64], sizes = [2, 32], strides = [1, 1]} : vector<2x128xf32> to vector<2x32xf32>
    %270 = math.tanh %269 : vector<2x32xf32>
    %271 = arith.mulf %267, %237 : vector<2x32xf32>
    %272 = arith.mulf %266, %270 : vector<2x32xf32>
    %273 = arith.addf %271, %272 : vector<2x32xf32>
    %274 = math.tanh %273 : vector<2x32xf32>
    %275 = arith.mulf %268, %274 : vector<2x32xf32>
    %c10 = arith.constant 10 : index
    %c0_54 = arith.constant 0 : index
    %276 = vector.load %arg0[%c10, %c0_54] : memref<40x128xf32, #tpu.memory_space<vmem>>, vector<2x128xf32>
    %277 = vector.extract_strided_slice %276 {offsets = [0, 0], sizes = [2, 32], strides = [1, 1]} : vector<2x128xf32> to vector<2x32xf32>
    %cst_55 = arith.constant 5.000000e-01 : f32
    %278 = vector.broadcast %cst_55 : f32 to vector<2x32xf32>
    %279 = arith.cmpf ogt, %277, %278 : vector<2x32xf32>
    %280 = arith.select %279, %255, %234 : vector<2x32xi1>, vector<2x32xf32>
    %281 = arith.select %279, %253, %235 : vector<2x32xi1>, vector<2x32xf32>
    %282 = arith.select %279, %275, %236 : vector<2x32xi1>, vector<2x32xf32>
    %283 = arith.select %279, %273, %237 : vector<2x32xi1>, vector<2x32xf32>
    %c28 = arith.constant 28 : index
    %c0_56 = arith.constant 0 : index
    %284 = vector.load %arg0[%c28, %c0_56] : memref<40x128xf32, #tpu.memory_space<vmem>>, vector<2x128xf32>
    %cst_57 = arith.constant dense<0.000000e+00> : vector<2x128xf32>
    %285 = tpu.matmul %280, %4, %cst_57 {dimension_numbers = #tpu.dot_dimension_numbers<[1], [0], [0], [1], [0, 0, 1, 1], [], []>} : vector<2x32xf32>, vector<32x128xf32>, vector<2x128xf32> -> vector<2x128xf32>
    %286 = arith.addf %284, %285 : vector<2x128xf32>
    %287 = arith.negf %286 : vector<2x128xf32>
    %288 = math.exp %287 : vector<2x128xf32>
    %cst_58 = arith.constant 1.000000e+00 : f32
    %289 = vector.broadcast %cst_58 : f32 to vector<2x128xf32>
    %290 = arith.addf %289, %288 : vector<2x128xf32>
    %291 = arith.divf %289, %290 : vector<2x128xf32>
    %292 = vector.extract_strided_slice %291 {offsets = [0, 0], sizes = [2, 32], strides = [1, 1]} : vector<2x128xf32> to vector<2x32xf32>
    %293 = vector.extract_strided_slice %291 {offsets = [0, 32], sizes = [2, 32], strides = [1, 1]} : vector<2x128xf32> to vector<2x32xf32>
    %294 = vector.extract_strided_slice %291 {offsets = [0, 96], sizes = [2, 32], strides = [1, 1]} : vector<2x128xf32> to vector<2x32xf32>
    %295 = vector.extract_strided_slice %286 {offsets = [0, 64], sizes = [2, 32], strides = [1, 1]} : vector<2x128xf32> to vector<2x32xf32>
    %296 = math.tanh %295 : vector<2x32xf32>
    %297 = arith.mulf %293, %281 : vector<2x32xf32>
    %298 = arith.mulf %292, %296 : vector<2x32xf32>
    %299 = arith.addf %297, %298 : vector<2x32xf32>
    %300 = math.tanh %299 : vector<2x32xf32>
    %301 = arith.mulf %294, %300 : vector<2x32xf32>
    %cst_59 = arith.constant dense<0.000000e+00> : vector<2x128xf32>
    %302 = tpu.matmul %301, %5, %cst_59 {dimension_numbers = #tpu.dot_dimension_numbers<[1], [0], [0], [1], [0, 0, 1, 1], [], []>} : vector<2x32xf32>, vector<32x128xf32>, vector<2x128xf32> -> vector<2x128xf32>
    %cst_60 = arith.constant dense<0.000000e+00> : vector<2x128xf32>
    %303 = tpu.matmul %282, %6, %cst_60 {dimension_numbers = #tpu.dot_dimension_numbers<[1], [0], [0], [1], [0, 0, 1, 1], [], []>} : vector<2x32xf32>, vector<32x128xf32>, vector<2x128xf32> -> vector<2x128xf32>
    %304 = arith.addf %302, %303 : vector<2x128xf32>
    %305 = vector.broadcast %7 : vector<1x128xf32> to vector<2x128xf32>
    %306 = arith.addf %304, %305 : vector<2x128xf32>
    %307 = arith.negf %306 : vector<2x128xf32>
    %308 = math.exp %307 : vector<2x128xf32>
    %cst_61 = arith.constant 1.000000e+00 : f32
    %309 = vector.broadcast %cst_61 : f32 to vector<2x128xf32>
    %310 = arith.addf %309, %308 : vector<2x128xf32>
    %311 = arith.divf %309, %310 : vector<2x128xf32>
    %312 = vector.extract_strided_slice %311 {offsets = [0, 0], sizes = [2, 32], strides = [1, 1]} : vector<2x128xf32> to vector<2x32xf32>
    %313 = vector.extract_strided_slice %311 {offsets = [0, 32], sizes = [2, 32], strides = [1, 1]} : vector<2x128xf32> to vector<2x32xf32>
    %314 = vector.extract_strided_slice %311 {offsets = [0, 96], sizes = [2, 32], strides = [1, 1]} : vector<2x128xf32> to vector<2x32xf32>
    %315 = vector.extract_strided_slice %306 {offsets = [0, 64], sizes = [2, 32], strides = [1, 1]} : vector<2x128xf32> to vector<2x32xf32>
    %316 = math.tanh %315 : vector<2x32xf32>
    %317 = arith.mulf %313, %283 : vector<2x32xf32>
    %318 = arith.mulf %312, %316 : vector<2x32xf32>
    %319 = arith.addf %317, %318 : vector<2x32xf32>
    %320 = math.tanh %319 : vector<2x32xf32>
    %321 = arith.mulf %314, %320 : vector<2x32xf32>
    %c12 = arith.constant 12 : index
    %c0_62 = arith.constant 0 : index
    %322 = vector.load %arg0[%c12, %c0_62] : memref<40x128xf32, #tpu.memory_space<vmem>>, vector<2x128xf32>
    %323 = vector.extract_strided_slice %322 {offsets = [0, 0], sizes = [2, 32], strides = [1, 1]} : vector<2x128xf32> to vector<2x32xf32>
    %cst_63 = arith.constant 5.000000e-01 : f32
    %324 = vector.broadcast %cst_63 : f32 to vector<2x32xf32>
    %325 = arith.cmpf ogt, %323, %324 : vector<2x32xf32>
    %326 = arith.select %325, %301, %280 : vector<2x32xi1>, vector<2x32xf32>
    %327 = arith.select %325, %299, %281 : vector<2x32xi1>, vector<2x32xf32>
    %328 = arith.select %325, %321, %282 : vector<2x32xi1>, vector<2x32xf32>
    %329 = arith.select %325, %319, %283 : vector<2x32xi1>, vector<2x32xf32>
    %c30 = arith.constant 30 : index
    %c0_64 = arith.constant 0 : index
    %330 = vector.load %arg0[%c30, %c0_64] : memref<40x128xf32, #tpu.memory_space<vmem>>, vector<2x128xf32>
    %cst_65 = arith.constant dense<0.000000e+00> : vector<2x128xf32>
    %331 = tpu.matmul %326, %4, %cst_65 {dimension_numbers = #tpu.dot_dimension_numbers<[1], [0], [0], [1], [0, 0, 1, 1], [], []>} : vector<2x32xf32>, vector<32x128xf32>, vector<2x128xf32> -> vector<2x128xf32>
    %332 = arith.addf %330, %331 : vector<2x128xf32>
    %333 = arith.negf %332 : vector<2x128xf32>
    %334 = math.exp %333 : vector<2x128xf32>
    %cst_66 = arith.constant 1.000000e+00 : f32
    %335 = vector.broadcast %cst_66 : f32 to vector<2x128xf32>
    %336 = arith.addf %335, %334 : vector<2x128xf32>
    %337 = arith.divf %335, %336 : vector<2x128xf32>
    %338 = vector.extract_strided_slice %337 {offsets = [0, 0], sizes = [2, 32], strides = [1, 1]} : vector<2x128xf32> to vector<2x32xf32>
    %339 = vector.extract_strided_slice %337 {offsets = [0, 32], sizes = [2, 32], strides = [1, 1]} : vector<2x128xf32> to vector<2x32xf32>
    %340 = vector.extract_strided_slice %337 {offsets = [0, 96], sizes = [2, 32], strides = [1, 1]} : vector<2x128xf32> to vector<2x32xf32>
    %341 = vector.extract_strided_slice %332 {offsets = [0, 64], sizes = [2, 32], strides = [1, 1]} : vector<2x128xf32> to vector<2x32xf32>
    %342 = math.tanh %341 : vector<2x32xf32>
    %343 = arith.mulf %339, %327 : vector<2x32xf32>
    %344 = arith.mulf %338, %342 : vector<2x32xf32>
    %345 = arith.addf %343, %344 : vector<2x32xf32>
    %346 = math.tanh %345 : vector<2x32xf32>
    %347 = arith.mulf %340, %346 : vector<2x32xf32>
    %cst_67 = arith.constant dense<0.000000e+00> : vector<2x128xf32>
    %348 = tpu.matmul %347, %5, %cst_67 {dimension_numbers = #tpu.dot_dimension_numbers<[1], [0], [0], [1], [0, 0, 1, 1], [], []>} : vector<2x32xf32>, vector<32x128xf32>, vector<2x128xf32> -> vector<2x128xf32>
    %cst_68 = arith.constant dense<0.000000e+00> : vector<2x128xf32>
    %349 = tpu.matmul %328, %6, %cst_68 {dimension_numbers = #tpu.dot_dimension_numbers<[1], [0], [0], [1], [0, 0, 1, 1], [], []>} : vector<2x32xf32>, vector<32x128xf32>, vector<2x128xf32> -> vector<2x128xf32>
    %350 = arith.addf %348, %349 : vector<2x128xf32>
    %351 = vector.broadcast %7 : vector<1x128xf32> to vector<2x128xf32>
    %352 = arith.addf %350, %351 : vector<2x128xf32>
    %353 = arith.negf %352 : vector<2x128xf32>
    %354 = math.exp %353 : vector<2x128xf32>
    %cst_69 = arith.constant 1.000000e+00 : f32
    %355 = vector.broadcast %cst_69 : f32 to vector<2x128xf32>
    %356 = arith.addf %355, %354 : vector<2x128xf32>
    %357 = arith.divf %355, %356 : vector<2x128xf32>
    %358 = vector.extract_strided_slice %357 {offsets = [0, 0], sizes = [2, 32], strides = [1, 1]} : vector<2x128xf32> to vector<2x32xf32>
    %359 = vector.extract_strided_slice %357 {offsets = [0, 32], sizes = [2, 32], strides = [1, 1]} : vector<2x128xf32> to vector<2x32xf32>
    %360 = vector.extract_strided_slice %357 {offsets = [0, 96], sizes = [2, 32], strides = [1, 1]} : vector<2x128xf32> to vector<2x32xf32>
    %361 = vector.extract_strided_slice %352 {offsets = [0, 64], sizes = [2, 32], strides = [1, 1]} : vector<2x128xf32> to vector<2x32xf32>
    %362 = math.tanh %361 : vector<2x32xf32>
    %363 = arith.mulf %359, %329 : vector<2x32xf32>
    %364 = arith.mulf %358, %362 : vector<2x32xf32>
    %365 = arith.addf %363, %364 : vector<2x32xf32>
    %366 = math.tanh %365 : vector<2x32xf32>
    %367 = arith.mulf %360, %366 : vector<2x32xf32>
    %c14 = arith.constant 14 : index
    %c0_70 = arith.constant 0 : index
    %368 = vector.load %arg0[%c14, %c0_70] : memref<40x128xf32, #tpu.memory_space<vmem>>, vector<2x128xf32>
    %369 = vector.extract_strided_slice %368 {offsets = [0, 0], sizes = [2, 32], strides = [1, 1]} : vector<2x128xf32> to vector<2x32xf32>
    %cst_71 = arith.constant 5.000000e-01 : f32
    %370 = vector.broadcast %cst_71 : f32 to vector<2x32xf32>
    %371 = arith.cmpf ogt, %369, %370 : vector<2x32xf32>
    %372 = arith.select %371, %347, %326 : vector<2x32xi1>, vector<2x32xf32>
    %373 = arith.select %371, %345, %327 : vector<2x32xi1>, vector<2x32xf32>
    %374 = arith.select %371, %367, %328 : vector<2x32xi1>, vector<2x32xf32>
    %375 = arith.select %371, %365, %329 : vector<2x32xi1>, vector<2x32xf32>
    %c104 = arith.constant 104 : index
    %c0_72 = arith.constant 0 : index
    %376 = vector.load %arg1[%c104, %c0_72] : memref<272x128xf32, #tpu.memory_space<vmem>>, vector<16x128xf32>
    %c120 = arith.constant 120 : index
    %c0_73 = arith.constant 0 : index
    %377 = vector.load %arg1[%c120, %c0_73] : memref<272x128xf32, #tpu.memory_space<vmem>>, vector<32x128xf32>
    %c152 = arith.constant 152 : index
    %c0_74 = arith.constant 0 : index
    %378 = vector.load %arg1[%c152, %c0_74] : memref<272x128xf32, #tpu.memory_space<vmem>>, vector<1x128xf32>
    %c160 = arith.constant 160 : index
    %c0_75 = arith.constant 0 : index
    %379 = vector.load %arg1[%c160, %c0_75] : memref<272x128xf32, #tpu.memory_space<vmem>>, vector<32x128xf32>
    %c192 = arith.constant 192 : index
    %c0_76 = arith.constant 0 : index
    %380 = vector.load %arg1[%c192, %c0_76] : memref<272x128xf32, #tpu.memory_space<vmem>>, vector<32x128xf32>
    %c224 = arith.constant 224 : index
    %c0_77 = arith.constant 0 : index
    %381 = vector.load %arg1[%c224, %c0_77] : memref<272x128xf32, #tpu.memory_space<vmem>>, vector<1x128xf32>
    %c232 = arith.constant 232 : index
    %c0_78 = arith.constant 0 : index
    %382 = vector.load %arg1[%c232, %c0_78] : memref<272x128xf32, #tpu.memory_space<vmem>>, vector<32x128xf32>
    %c264 = arith.constant 264 : index
    %c0_79 = arith.constant 0 : index
    %383 = vector.load %arg1[%c264, %c0_79] : memref<272x128xf32, #tpu.memory_space<vmem>>, vector<1x128xf32>
    %c32_80 = arith.constant 32 : index
    %c0_81 = arith.constant 0 : index
    %384 = vector.load %arg0[%c32_80, %c0_81] : memref<40x128xf32, #tpu.memory_space<vmem>>, vector<2x128xf32>
    %385 = vector.extract_strided_slice %384 {offsets = [0, 0], sizes = [2, 16], strides = [1, 1]} : vector<2x128xf32> to vector<2x16xf32>
    %cst_82 = arith.constant 0.000000e+00 : f32
    %386 = vector.broadcast %cst_82 : f32 to vector<2x128xf32>
    %cst_83 = arith.constant dense<0.000000e+00> : vector<2x128xf32>
    %387 = tpu.matmul %385, %376, %cst_83 {dimension_numbers = #tpu.dot_dimension_numbers<[1], [0], [0], [1], [0, 0, 1, 1], [], []>} : vector<2x16xf32>, vector<16x128xf32>, vector<2x128xf32> -> vector<2x128xf32>
    %cst_84 = arith.constant dense<0.000000e+00> : vector<2x128xf32>
    %388 = tpu.matmul %372, %377, %cst_84 {dimension_numbers = #tpu.dot_dimension_numbers<[1], [0], [0], [1], [0, 0, 1, 1], [], []>} : vector<2x32xf32>, vector<32x128xf32>, vector<2x128xf32> -> vector<2x128xf32>
    %389 = arith.addf %387, %388 : vector<2x128xf32>
    %390 = vector.broadcast %378 : vector<1x128xf32> to vector<2x128xf32>
    %391 = arith.addf %389, %390 : vector<2x128xf32>
    %392 = arith.negf %391 : vector<2x128xf32>
    %393 = math.exp %392 : vector<2x128xf32>
    %cst_85 = arith.constant 1.000000e+00 : f32
    %394 = vector.broadcast %cst_85 : f32 to vector<2x128xf32>
    %395 = arith.addf %394, %393 : vector<2x128xf32>
    %396 = arith.divf %394, %395 : vector<2x128xf32>
    %397 = vector.extract_strided_slice %396 {offsets = [0, 0], sizes = [2, 32], strides = [1, 1]} : vector<2x128xf32> to vector<2x32xf32>
    %398 = vector.extract_strided_slice %396 {offsets = [0, 32], sizes = [2, 32], strides = [1, 1]} : vector<2x128xf32> to vector<2x32xf32>
    %399 = vector.extract_strided_slice %396 {offsets = [0, 96], sizes = [2, 32], strides = [1, 1]} : vector<2x128xf32> to vector<2x32xf32>
    %400 = vector.extract_strided_slice %391 {offsets = [0, 64], sizes = [2, 32], strides = [1, 1]} : vector<2x128xf32> to vector<2x32xf32>
    %401 = math.tanh %400 : vector<2x32xf32>
    %402 = arith.mulf %398, %373 : vector<2x32xf32>
    %403 = arith.mulf %397, %401 : vector<2x32xf32>
    %404 = arith.addf %402, %403 : vector<2x32xf32>
    %405 = math.tanh %404 : vector<2x32xf32>
    %406 = arith.mulf %399, %405 : vector<2x32xf32>
    %cst_86 = arith.constant dense<0.000000e+00> : vector<2x128xf32>
    %407 = tpu.matmul %406, %379, %cst_86 {dimension_numbers = #tpu.dot_dimension_numbers<[1], [0], [0], [1], [0, 0, 1, 1], [], []>} : vector<2x32xf32>, vector<32x128xf32>, vector<2x128xf32> -> vector<2x128xf32>
    %cst_87 = arith.constant dense<0.000000e+00> : vector<2x128xf32>
    %408 = tpu.matmul %374, %380, %cst_87 {dimension_numbers = #tpu.dot_dimension_numbers<[1], [0], [0], [1], [0, 0, 1, 1], [], []>} : vector<2x32xf32>, vector<32x128xf32>, vector<2x128xf32> -> vector<2x128xf32>
    %409 = arith.addf %407, %408 : vector<2x128xf32>
    %410 = vector.broadcast %381 : vector<1x128xf32> to vector<2x128xf32>
    %411 = arith.addf %409, %410 : vector<2x128xf32>
    %412 = arith.negf %411 : vector<2x128xf32>
    %413 = math.exp %412 : vector<2x128xf32>
    %cst_88 = arith.constant 1.000000e+00 : f32
    %414 = vector.broadcast %cst_88 : f32 to vector<2x128xf32>
    %415 = arith.addf %414, %413 : vector<2x128xf32>
    %416 = arith.divf %414, %415 : vector<2x128xf32>
    %417 = vector.extract_strided_slice %416 {offsets = [0, 0], sizes = [2, 32], strides = [1, 1]} : vector<2x128xf32> to vector<2x32xf32>
    %418 = vector.extract_strided_slice %416 {offsets = [0, 32], sizes = [2, 32], strides = [1, 1]} : vector<2x128xf32> to vector<2x32xf32>
    %419 = vector.extract_strided_slice %416 {offsets = [0, 96], sizes = [2, 32], strides = [1, 1]} : vector<2x128xf32> to vector<2x32xf32>
    %420 = vector.extract_strided_slice %411 {offsets = [0, 64], sizes = [2, 32], strides = [1, 1]} : vector<2x128xf32> to vector<2x32xf32>
    %421 = math.tanh %420 : vector<2x32xf32>
    %422 = arith.mulf %418, %375 : vector<2x32xf32>
    %423 = arith.mulf %417, %421 : vector<2x32xf32>
    %424 = arith.addf %422, %423 : vector<2x32xf32>
    %425 = math.tanh %424 : vector<2x32xf32>
    %426 = arith.mulf %419, %425 : vector<2x32xf32>
    %cst_89 = arith.constant dense<0.000000e+00> : vector<2x128xf32>
    %427 = tpu.matmul %426, %382, %cst_89 {dimension_numbers = #tpu.dot_dimension_numbers<[1], [0], [0], [1], [0, 0, 1, 1], [], []>} : vector<2x32xf32>, vector<32x128xf32>, vector<2x128xf32> -> vector<2x128xf32>
    %428 = vector.broadcast %383 : vector<1x128xf32> to vector<2x128xf32>
    %429 = arith.addf %427, %428 : vector<2x128xf32>
    %c16_i32 = arith.constant 16 : i32
    %430 = tpu.dynamic_rotate %429 by %c16_i32 dim 1 : vector<2x128xf32>, i32 -> vector<2x128xf32>
    %431 = arith.addf %386, %430 : vector<2x128xf32>
    %432 = vector.extract_strided_slice %429 {offsets = [0, 0], sizes = [2, 16], strides = [1, 1]} : vector<2x128xf32> to vector<2x16xf32>
    %cst_90 = arith.constant dense<0xFF800000> : vector<2xf32>
    %433 = vector.multi_reduction <maximumf>, %432, %cst_90 [1] : vector<2x16xf32> to vector<2xf32>
    %434 = vector.shape_cast %433 : vector<2xf32> to vector<2x1xf32>
    %435 = vector.broadcast %434 : vector<2x1xf32> to vector<2x16xf32>
    %436 = arith.cmpf oeq, %432, %435 : vector<2x16xf32>
    %437 = arith.extui %436 : vector<2x16xi1> to vector<2x16xi32>
    %438 = arith.sitofp %437 : vector<2x16xi32> to vector<2x16xf32>
    %cst_91 = arith.constant dense<0.000000e+00> : vector<2x128xf32>
    %439 = tpu.matmul %438, %376, %cst_91 {dimension_numbers = #tpu.dot_dimension_numbers<[1], [0], [0], [1], [0, 0, 1, 1], [], []>} : vector<2x16xf32>, vector<16x128xf32>, vector<2x128xf32> -> vector<2x128xf32>
    %cst_92 = arith.constant dense<0.000000e+00> : vector<2x128xf32>
    %440 = tpu.matmul %406, %377, %cst_92 {dimension_numbers = #tpu.dot_dimension_numbers<[1], [0], [0], [1], [0, 0, 1, 1], [], []>} : vector<2x32xf32>, vector<32x128xf32>, vector<2x128xf32> -> vector<2x128xf32>
    %441 = arith.addf %439, %440 : vector<2x128xf32>
    %442 = vector.broadcast %378 : vector<1x128xf32> to vector<2x128xf32>
    %443 = arith.addf %441, %442 : vector<2x128xf32>
    %444 = arith.negf %443 : vector<2x128xf32>
    %445 = math.exp %444 : vector<2x128xf32>
    %cst_93 = arith.constant 1.000000e+00 : f32
    %446 = vector.broadcast %cst_93 : f32 to vector<2x128xf32>
    %447 = arith.addf %446, %445 : vector<2x128xf32>
    %448 = arith.divf %446, %447 : vector<2x128xf32>
    %449 = vector.extract_strided_slice %448 {offsets = [0, 0], sizes = [2, 32], strides = [1, 1]} : vector<2x128xf32> to vector<2x32xf32>
    %450 = vector.extract_strided_slice %448 {offsets = [0, 32], sizes = [2, 32], strides = [1, 1]} : vector<2x128xf32> to vector<2x32xf32>
    %451 = vector.extract_strided_slice %448 {offsets = [0, 96], sizes = [2, 32], strides = [1, 1]} : vector<2x128xf32> to vector<2x32xf32>
    %452 = vector.extract_strided_slice %443 {offsets = [0, 64], sizes = [2, 32], strides = [1, 1]} : vector<2x128xf32> to vector<2x32xf32>
    %453 = math.tanh %452 : vector<2x32xf32>
    %454 = arith.mulf %450, %404 : vector<2x32xf32>
    %455 = arith.mulf %449, %453 : vector<2x32xf32>
    %456 = arith.addf %454, %455 : vector<2x32xf32>
    %457 = math.tanh %456 : vector<2x32xf32>
    %458 = arith.mulf %451, %457 : vector<2x32xf32>
    %cst_94 = arith.constant dense<0.000000e+00> : vector<2x128xf32>
    %459 = tpu.matmul %458, %379, %cst_94 {dimension_numbers = #tpu.dot_dimension_numbers<[1], [0], [0], [1], [0, 0, 1, 1], [], []>} : vector<2x32xf32>, vector<32x128xf32>, vector<2x128xf32> -> vector<2x128xf32>
    %cst_95 = arith.constant dense<0.000000e+00> : vector<2x128xf32>
    %460 = tpu.matmul %426, %380, %cst_95 {dimension_numbers = #tpu.dot_dimension_numbers<[1], [0], [0], [1], [0, 0, 1, 1], [], []>} : vector<2x32xf32>, vector<32x128xf32>, vector<2x128xf32> -> vector<2x128xf32>
    %461 = arith.addf %459, %460 : vector<2x128xf32>
    %462 = vector.broadcast %381 : vector<1x128xf32> to vector<2x128xf32>
    %463 = arith.addf %461, %462 : vector<2x128xf32>
    %464 = arith.negf %463 : vector<2x128xf32>
    %465 = math.exp %464 : vector<2x128xf32>
    %cst_96 = arith.constant 1.000000e+00 : f32
    %466 = vector.broadcast %cst_96 : f32 to vector<2x128xf32>
    %467 = arith.addf %466, %465 : vector<2x128xf32>
    %468 = arith.divf %466, %467 : vector<2x128xf32>
    %469 = vector.extract_strided_slice %468 {offsets = [0, 0], sizes = [2, 32], strides = [1, 1]} : vector<2x128xf32> to vector<2x32xf32>
    %470 = vector.extract_strided_slice %468 {offsets = [0, 32], sizes = [2, 32], strides = [1, 1]} : vector<2x128xf32> to vector<2x32xf32>
    %471 = vector.extract_strided_slice %468 {offsets = [0, 96], sizes = [2, 32], strides = [1, 1]} : vector<2x128xf32> to vector<2x32xf32>
    %472 = vector.extract_strided_slice %463 {offsets = [0, 64], sizes = [2, 32], strides = [1, 1]} : vector<2x128xf32> to vector<2x32xf32>
    %473 = math.tanh %472 : vector<2x32xf32>
    %474 = arith.mulf %470, %424 : vector<2x32xf32>
    %475 = arith.mulf %469, %473 : vector<2x32xf32>
    %476 = arith.addf %474, %475 : vector<2x32xf32>
    %477 = math.tanh %476 : vector<2x32xf32>
    %478 = arith.mulf %471, %477 : vector<2x32xf32>
    %cst_97 = arith.constant dense<0.000000e+00> : vector<2x128xf32>
    %479 = tpu.matmul %478, %382, %cst_97 {dimension_numbers = #tpu.dot_dimension_numbers<[1], [0], [0], [1], [0, 0, 1, 1], [], []>} : vector<2x32xf32>, vector<32x128xf32>, vector<2x128xf32> -> vector<2x128xf32>
    %480 = vector.broadcast %383 : vector<1x128xf32> to vector<2x128xf32>
    %481 = arith.addf %479, %480 : vector<2x128xf32>
    %c32_i32 = arith.constant 32 : i32
    %482 = tpu.dynamic_rotate %481 by %c32_i32 dim 1 : vector<2x128xf32>, i32 -> vector<2x128xf32>
    %483 = arith.addf %431, %482 : vector<2x128xf32>
    %484 = vector.extract_strided_slice %481 {offsets = [0, 0], sizes = [2, 16], strides = [1, 1]} : vector<2x128xf32> to vector<2x16xf32>
    %cst_98 = arith.constant dense<0xFF800000> : vector<2xf32>
    %485 = vector.multi_reduction <maximumf>, %484, %cst_98 [1] : vector<2x16xf32> to vector<2xf32>
    %486 = vector.shape_cast %485 : vector<2xf32> to vector<2x1xf32>
    %487 = vector.broadcast %486 : vector<2x1xf32> to vector<2x16xf32>
    %488 = arith.cmpf oeq, %484, %487 : vector<2x16xf32>
    %489 = arith.extui %488 : vector<2x16xi1> to vector<2x16xi32>
    %490 = arith.sitofp %489 : vector<2x16xi32> to vector<2x16xf32>
    %cst_99 = arith.constant dense<0.000000e+00> : vector<2x128xf32>
    %491 = tpu.matmul %490, %376, %cst_99 {dimension_numbers = #tpu.dot_dimension_numbers<[1], [0], [0], [1], [0, 0, 1, 1], [], []>} : vector<2x16xf32>, vector<16x128xf32>, vector<2x128xf32> -> vector<2x128xf32>
    %cst_100 = arith.constant dense<0.000000e+00> : vector<2x128xf32>
    %492 = tpu.matmul %458, %377, %cst_100 {dimension_numbers = #tpu.dot_dimension_numbers<[1], [0], [0], [1], [0, 0, 1, 1], [], []>} : vector<2x32xf32>, vector<32x128xf32>, vector<2x128xf32> -> vector<2x128xf32>
    %493 = arith.addf %491, %492 : vector<2x128xf32>
    %494 = vector.broadcast %378 : vector<1x128xf32> to vector<2x128xf32>
    %495 = arith.addf %493, %494 : vector<2x128xf32>
    %496 = arith.negf %495 : vector<2x128xf32>
    %497 = math.exp %496 : vector<2x128xf32>
    %cst_101 = arith.constant 1.000000e+00 : f32
    %498 = vector.broadcast %cst_101 : f32 to vector<2x128xf32>
    %499 = arith.addf %498, %497 : vector<2x128xf32>
    %500 = arith.divf %498, %499 : vector<2x128xf32>
    %501 = vector.extract_strided_slice %500 {offsets = [0, 0], sizes = [2, 32], strides = [1, 1]} : vector<2x128xf32> to vector<2x32xf32>
    %502 = vector.extract_strided_slice %500 {offsets = [0, 32], sizes = [2, 32], strides = [1, 1]} : vector<2x128xf32> to vector<2x32xf32>
    %503 = vector.extract_strided_slice %500 {offsets = [0, 96], sizes = [2, 32], strides = [1, 1]} : vector<2x128xf32> to vector<2x32xf32>
    %504 = vector.extract_strided_slice %495 {offsets = [0, 64], sizes = [2, 32], strides = [1, 1]} : vector<2x128xf32> to vector<2x32xf32>
    %505 = math.tanh %504 : vector<2x32xf32>
    %506 = arith.mulf %502, %456 : vector<2x32xf32>
    %507 = arith.mulf %501, %505 : vector<2x32xf32>
    %508 = arith.addf %506, %507 : vector<2x32xf32>
    %509 = math.tanh %508 : vector<2x32xf32>
    %510 = arith.mulf %503, %509 : vector<2x32xf32>
    %cst_102 = arith.constant dense<0.000000e+00> : vector<2x128xf32>
    %511 = tpu.matmul %510, %379, %cst_102 {dimension_numbers = #tpu.dot_dimension_numbers<[1], [0], [0], [1], [0, 0, 1, 1], [], []>} : vector<2x32xf32>, vector<32x128xf32>, vector<2x128xf32> -> vector<2x128xf32>
    %cst_103 = arith.constant dense<0.000000e+00> : vector<2x128xf32>
    %512 = tpu.matmul %478, %380, %cst_103 {dimension_numbers = #tpu.dot_dimension_numbers<[1], [0], [0], [1], [0, 0, 1, 1], [], []>} : vector<2x32xf32>, vector<32x128xf32>, vector<2x128xf32> -> vector<2x128xf32>
    %513 = arith.addf %511, %512 : vector<2x128xf32>
    %514 = vector.broadcast %381 : vector<1x128xf32> to vector<2x128xf32>
    %515 = arith.addf %513, %514 : vector<2x128xf32>
    %516 = arith.negf %515 : vector<2x128xf32>
    %517 = math.exp %516 : vector<2x128xf32>
    %cst_104 = arith.constant 1.000000e+00 : f32
    %518 = vector.broadcast %cst_104 : f32 to vector<2x128xf32>
    %519 = arith.addf %518, %517 : vector<2x128xf32>
    %520 = arith.divf %518, %519 : vector<2x128xf32>
    %521 = vector.extract_strided_slice %520 {offsets = [0, 0], sizes = [2, 32], strides = [1, 1]} : vector<2x128xf32> to vector<2x32xf32>
    %522 = vector.extract_strided_slice %520 {offsets = [0, 32], sizes = [2, 32], strides = [1, 1]} : vector<2x128xf32> to vector<2x32xf32>
    %523 = vector.extract_strided_slice %520 {offsets = [0, 96], sizes = [2, 32], strides = [1, 1]} : vector<2x128xf32> to vector<2x32xf32>
    %524 = vector.extract_strided_slice %515 {offsets = [0, 64], sizes = [2, 32], strides = [1, 1]} : vector<2x128xf32> to vector<2x32xf32>
    %525 = math.tanh %524 : vector<2x32xf32>
    %526 = arith.mulf %522, %476 : vector<2x32xf32>
    %527 = arith.mulf %521, %525 : vector<2x32xf32>
    %528 = arith.addf %526, %527 : vector<2x32xf32>
    %529 = math.tanh %528 : vector<2x32xf32>
    %530 = arith.mulf %523, %529 : vector<2x32xf32>
    %cst_105 = arith.constant dense<0.000000e+00> : vector<2x128xf32>
    %531 = tpu.matmul %530, %382, %cst_105 {dimension_numbers = #tpu.dot_dimension_numbers<[1], [0], [0], [1], [0, 0, 1, 1], [], []>} : vector<2x32xf32>, vector<32x128xf32>, vector<2x128xf32> -> vector<2x128xf32>
    %532 = vector.broadcast %383 : vector<1x128xf32> to vector<2x128xf32>
    %533 = arith.addf %531, %532 : vector<2x128xf32>
    %c48_i32 = arith.constant 48 : i32
    %534 = tpu.dynamic_rotate %533 by %c48_i32 dim 1 : vector<2x128xf32>, i32 -> vector<2x128xf32>
    %535 = arith.addf %483, %534 : vector<2x128xf32>
    %536 = vector.extract_strided_slice %533 {offsets = [0, 0], sizes = [2, 16], strides = [1, 1]} : vector<2x128xf32> to vector<2x16xf32>
    %cst_106 = arith.constant dense<0xFF800000> : vector<2xf32>
    %537 = vector.multi_reduction <maximumf>, %536, %cst_106 [1] : vector<2x16xf32> to vector<2xf32>
    %538 = vector.shape_cast %537 : vector<2xf32> to vector<2x1xf32>
    %539 = vector.broadcast %538 : vector<2x1xf32> to vector<2x16xf32>
    %540 = arith.cmpf oeq, %536, %539 : vector<2x16xf32>
    %541 = arith.extui %540 : vector<2x16xi1> to vector<2x16xi32>
    %542 = arith.sitofp %541 : vector<2x16xi32> to vector<2x16xf32>
    %cst_107 = arith.constant dense<0.000000e+00> : vector<2x128xf32>
    %543 = tpu.matmul %542, %376, %cst_107 {dimension_numbers = #tpu.dot_dimension_numbers<[1], [0], [0], [1], [0, 0, 1, 1], [], []>} : vector<2x16xf32>, vector<16x128xf32>, vector<2x128xf32> -> vector<2x128xf32>
    %cst_108 = arith.constant dense<0.000000e+00> : vector<2x128xf32>
    %544 = tpu.matmul %510, %377, %cst_108 {dimension_numbers = #tpu.dot_dimension_numbers<[1], [0], [0], [1], [0, 0, 1, 1], [], []>} : vector<2x32xf32>, vector<32x128xf32>, vector<2x128xf32> -> vector<2x128xf32>
    %545 = arith.addf %543, %544 : vector<2x128xf32>
    %546 = vector.broadcast %378 : vector<1x128xf32> to vector<2x128xf32>
    %547 = arith.addf %545, %546 : vector<2x128xf32>
    %548 = arith.negf %547 : vector<2x128xf32>
    %549 = math.exp %548 : vector<2x128xf32>
    %cst_109 = arith.constant 1.000000e+00 : f32
    %550 = vector.broadcast %cst_109 : f32 to vector<2x128xf32>
    %551 = arith.addf %550, %549 : vector<2x128xf32>
    %552 = arith.divf %550, %551 : vector<2x128xf32>
    %553 = vector.extract_strided_slice %552 {offsets = [0, 0], sizes = [2, 32], strides = [1, 1]} : vector<2x128xf32> to vector<2x32xf32>
    %554 = vector.extract_strided_slice %552 {offsets = [0, 32], sizes = [2, 32], strides = [1, 1]} : vector<2x128xf32> to vector<2x32xf32>
    %555 = vector.extract_strided_slice %552 {offsets = [0, 96], sizes = [2, 32], strides = [1, 1]} : vector<2x128xf32> to vector<2x32xf32>
    %556 = vector.extract_strided_slice %547 {offsets = [0, 64], sizes = [2, 32], strides = [1, 1]} : vector<2x128xf32> to vector<2x32xf32>
    %557 = math.tanh %556 : vector<2x32xf32>
    %558 = arith.mulf %554, %508 : vector<2x32xf32>
    %559 = arith.mulf %553, %557 : vector<2x32xf32>
    %560 = arith.addf %558, %559 : vector<2x32xf32>
    %561 = math.tanh %560 : vector<2x32xf32>
    %562 = arith.mulf %555, %561 : vector<2x32xf32>
    %cst_110 = arith.constant dense<0.000000e+00> : vector<2x128xf32>
    %563 = tpu.matmul %562, %379, %cst_110 {dimension_numbers = #tpu.dot_dimension_numbers<[1], [0], [0], [1], [0, 0, 1, 1], [], []>} : vector<2x32xf32>, vector<32x128xf32>, vector<2x128xf32> -> vector<2x128xf32>
    %cst_111 = arith.constant dense<0.000000e+00> : vector<2x128xf32>
    %564 = tpu.matmul %530, %380, %cst_111 {dimension_numbers = #tpu.dot_dimension_numbers<[1], [0], [0], [1], [0, 0, 1, 1], [], []>} : vector<2x32xf32>, vector<32x128xf32>, vector<2x128xf32> -> vector<2x128xf32>
    %565 = arith.addf %563, %564 : vector<2x128xf32>
    %566 = vector.broadcast %381 : vector<1x128xf32> to vector<2x128xf32>
    %567 = arith.addf %565, %566 : vector<2x128xf32>
    %568 = arith.negf %567 : vector<2x128xf32>
    %569 = math.exp %568 : vector<2x128xf32>
    %cst_112 = arith.constant 1.000000e+00 : f32
    %570 = vector.broadcast %cst_112 : f32 to vector<2x128xf32>
    %571 = arith.addf %570, %569 : vector<2x128xf32>
    %572 = arith.divf %570, %571 : vector<2x128xf32>
    %573 = vector.extract_strided_slice %572 {offsets = [0, 0], sizes = [2, 32], strides = [1, 1]} : vector<2x128xf32> to vector<2x32xf32>
    %574 = vector.extract_strided_slice %572 {offsets = [0, 32], sizes = [2, 32], strides = [1, 1]} : vector<2x128xf32> to vector<2x32xf32>
    %575 = vector.extract_strided_slice %572 {offsets = [0, 96], sizes = [2, 32], strides = [1, 1]} : vector<2x128xf32> to vector<2x32xf32>
    %576 = vector.extract_strided_slice %567 {offsets = [0, 64], sizes = [2, 32], strides = [1, 1]} : vector<2x128xf32> to vector<2x32xf32>
    %577 = math.tanh %576 : vector<2x32xf32>
    %578 = arith.mulf %574, %528 : vector<2x32xf32>
    %579 = arith.mulf %573, %577 : vector<2x32xf32>
    %580 = arith.addf %578, %579 : vector<2x32xf32>
    %581 = math.tanh %580 : vector<2x32xf32>
    %582 = arith.mulf %575, %581 : vector<2x32xf32>
    %cst_113 = arith.constant dense<0.000000e+00> : vector<2x128xf32>
    %583 = tpu.matmul %582, %382, %cst_113 {dimension_numbers = #tpu.dot_dimension_numbers<[1], [0], [0], [1], [0, 0, 1, 1], [], []>} : vector<2x32xf32>, vector<32x128xf32>, vector<2x128xf32> -> vector<2x128xf32>
    %584 = vector.broadcast %383 : vector<1x128xf32> to vector<2x128xf32>
    %585 = arith.addf %583, %584 : vector<2x128xf32>
    %c64_i32 = arith.constant 64 : i32
    %586 = tpu.dynamic_rotate %585 by %c64_i32 dim 1 : vector<2x128xf32>, i32 -> vector<2x128xf32>
    %587 = arith.addf %535, %586 : vector<2x128xf32>
    %588 = vector.extract_strided_slice %585 {offsets = [0, 0], sizes = [2, 16], strides = [1, 1]} : vector<2x128xf32> to vector<2x16xf32>
    %cst_114 = arith.constant dense<0xFF800000> : vector<2xf32>
    %589 = vector.multi_reduction <maximumf>, %588, %cst_114 [1] : vector<2x16xf32> to vector<2xf32>
    %590 = vector.shape_cast %589 : vector<2xf32> to vector<2x1xf32>
    %591 = vector.broadcast %590 : vector<2x1xf32> to vector<2x16xf32>
    %592 = arith.cmpf oeq, %588, %591 : vector<2x16xf32>
    %593 = arith.extui %592 : vector<2x16xi1> to vector<2x16xi32>
    %594 = arith.sitofp %593 : vector<2x16xi32> to vector<2x16xf32>
    %cst_115 = arith.constant dense<0.000000e+00> : vector<2x128xf32>
    %595 = tpu.matmul %594, %376, %cst_115 {dimension_numbers = #tpu.dot_dimension_numbers<[1], [0], [0], [1], [0, 0, 1, 1], [], []>} : vector<2x16xf32>, vector<16x128xf32>, vector<2x128xf32> -> vector<2x128xf32>
    %cst_116 = arith.constant dense<0.000000e+00> : vector<2x128xf32>
    %596 = tpu.matmul %562, %377, %cst_116 {dimension_numbers = #tpu.dot_dimension_numbers<[1], [0], [0], [1], [0, 0, 1, 1], [], []>} : vector<2x32xf32>, vector<32x128xf32>, vector<2x128xf32> -> vector<2x128xf32>
    %597 = arith.addf %595, %596 : vector<2x128xf32>
    %598 = vector.broadcast %378 : vector<1x128xf32> to vector<2x128xf32>
    %599 = arith.addf %597, %598 : vector<2x128xf32>
    %600 = arith.negf %599 : vector<2x128xf32>
    %601 = math.exp %600 : vector<2x128xf32>
    %cst_117 = arith.constant 1.000000e+00 : f32
    %602 = vector.broadcast %cst_117 : f32 to vector<2x128xf32>
    %603 = arith.addf %602, %601 : vector<2x128xf32>
    %604 = arith.divf %602, %603 : vector<2x128xf32>
    %605 = vector.extract_strided_slice %604 {offsets = [0, 0], sizes = [2, 32], strides = [1, 1]} : vector<2x128xf32> to vector<2x32xf32>
    %606 = vector.extract_strided_slice %604 {offsets = [0, 32], sizes = [2, 32], strides = [1, 1]} : vector<2x128xf32> to vector<2x32xf32>
    %607 = vector.extract_strided_slice %604 {offsets = [0, 96], sizes = [2, 32], strides = [1, 1]} : vector<2x128xf32> to vector<2x32xf32>
    %608 = vector.extract_strided_slice %599 {offsets = [0, 64], sizes = [2, 32], strides = [1, 1]} : vector<2x128xf32> to vector<2x32xf32>
    %609 = math.tanh %608 : vector<2x32xf32>
    %610 = arith.mulf %606, %560 : vector<2x32xf32>
    %611 = arith.mulf %605, %609 : vector<2x32xf32>
    %612 = arith.addf %610, %611 : vector<2x32xf32>
    %613 = math.tanh %612 : vector<2x32xf32>
    %614 = arith.mulf %607, %613 : vector<2x32xf32>
    %cst_118 = arith.constant dense<0.000000e+00> : vector<2x128xf32>
    %615 = tpu.matmul %614, %379, %cst_118 {dimension_numbers = #tpu.dot_dimension_numbers<[1], [0], [0], [1], [0, 0, 1, 1], [], []>} : vector<2x32xf32>, vector<32x128xf32>, vector<2x128xf32> -> vector<2x128xf32>
    %cst_119 = arith.constant dense<0.000000e+00> : vector<2x128xf32>
    %616 = tpu.matmul %582, %380, %cst_119 {dimension_numbers = #tpu.dot_dimension_numbers<[1], [0], [0], [1], [0, 0, 1, 1], [], []>} : vector<2x32xf32>, vector<32x128xf32>, vector<2x128xf32> -> vector<2x128xf32>
    %617 = arith.addf %615, %616 : vector<2x128xf32>
    %618 = vector.broadcast %381 : vector<1x128xf32> to vector<2x128xf32>
    %619 = arith.addf %617, %618 : vector<2x128xf32>
    %620 = arith.negf %619 : vector<2x128xf32>
    %621 = math.exp %620 : vector<2x128xf32>
    %cst_120 = arith.constant 1.000000e+00 : f32
    %622 = vector.broadcast %cst_120 : f32 to vector<2x128xf32>
    %623 = arith.addf %622, %621 : vector<2x128xf32>
    %624 = arith.divf %622, %623 : vector<2x128xf32>
    %625 = vector.extract_strided_slice %624 {offsets = [0, 0], sizes = [2, 32], strides = [1, 1]} : vector<2x128xf32> to vector<2x32xf32>
    %626 = vector.extract_strided_slice %624 {offsets = [0, 32], sizes = [2, 32], strides = [1, 1]} : vector<2x128xf32> to vector<2x32xf32>
    %627 = vector.extract_strided_slice %624 {offsets = [0, 96], sizes = [2, 32], strides = [1, 1]} : vector<2x128xf32> to vector<2x32xf32>
    %628 = vector.extract_strided_slice %619 {offsets = [0, 64], sizes = [2, 32], strides = [1, 1]} : vector<2x128xf32> to vector<2x32xf32>
    %629 = math.tanh %628 : vector<2x32xf32>
    %630 = arith.mulf %626, %580 : vector<2x32xf32>
    %631 = arith.mulf %625, %629 : vector<2x32xf32>
    %632 = arith.addf %630, %631 : vector<2x32xf32>
    %633 = math.tanh %632 : vector<2x32xf32>
    %634 = arith.mulf %627, %633 : vector<2x32xf32>
    %cst_121 = arith.constant dense<0.000000e+00> : vector<2x128xf32>
    %635 = tpu.matmul %634, %382, %cst_121 {dimension_numbers = #tpu.dot_dimension_numbers<[1], [0], [0], [1], [0, 0, 1, 1], [], []>} : vector<2x32xf32>, vector<32x128xf32>, vector<2x128xf32> -> vector<2x128xf32>
    %636 = vector.broadcast %383 : vector<1x128xf32> to vector<2x128xf32>
    %637 = arith.addf %635, %636 : vector<2x128xf32>
    %c80_i32 = arith.constant 80 : i32
    %638 = tpu.dynamic_rotate %637 by %c80_i32 dim 1 : vector<2x128xf32>, i32 -> vector<2x128xf32>
    %639 = arith.addf %587, %638 : vector<2x128xf32>
    %640 = vector.extract_strided_slice %637 {offsets = [0, 0], sizes = [2, 16], strides = [1, 1]} : vector<2x128xf32> to vector<2x16xf32>
    %cst_122 = arith.constant dense<0xFF800000> : vector<2xf32>
    %641 = vector.multi_reduction <maximumf>, %640, %cst_122 [1] : vector<2x16xf32> to vector<2xf32>
    %642 = vector.shape_cast %641 : vector<2xf32> to vector<2x1xf32>
    %643 = vector.broadcast %642 : vector<2x1xf32> to vector<2x16xf32>
    %644 = arith.cmpf oeq, %640, %643 : vector<2x16xf32>
    %645 = arith.extui %644 : vector<2x16xi1> to vector<2x16xi32>
    %646 = arith.sitofp %645 : vector<2x16xi32> to vector<2x16xf32>
    %cst_123 = arith.constant dense<0.000000e+00> : vector<2x128xf32>
    %647 = tpu.matmul %646, %376, %cst_123 {dimension_numbers = #tpu.dot_dimension_numbers<[1], [0], [0], [1], [0, 0, 1, 1], [], []>} : vector<2x16xf32>, vector<16x128xf32>, vector<2x128xf32> -> vector<2x128xf32>
    %cst_124 = arith.constant dense<0.000000e+00> : vector<2x128xf32>
    %648 = tpu.matmul %614, %377, %cst_124 {dimension_numbers = #tpu.dot_dimension_numbers<[1], [0], [0], [1], [0, 0, 1, 1], [], []>} : vector<2x32xf32>, vector<32x128xf32>, vector<2x128xf32> -> vector<2x128xf32>
    %649 = arith.addf %647, %648 : vector<2x128xf32>
    %650 = vector.broadcast %378 : vector<1x128xf32> to vector<2x128xf32>
    %651 = arith.addf %649, %650 : vector<2x128xf32>
    %652 = arith.negf %651 : vector<2x128xf32>
    %653 = math.exp %652 : vector<2x128xf32>
    %cst_125 = arith.constant 1.000000e+00 : f32
    %654 = vector.broadcast %cst_125 : f32 to vector<2x128xf32>
    %655 = arith.addf %654, %653 : vector<2x128xf32>
    %656 = arith.divf %654, %655 : vector<2x128xf32>
    %657 = vector.extract_strided_slice %656 {offsets = [0, 0], sizes = [2, 32], strides = [1, 1]} : vector<2x128xf32> to vector<2x32xf32>
    %658 = vector.extract_strided_slice %656 {offsets = [0, 32], sizes = [2, 32], strides = [1, 1]} : vector<2x128xf32> to vector<2x32xf32>
    %659 = vector.extract_strided_slice %656 {offsets = [0, 96], sizes = [2, 32], strides = [1, 1]} : vector<2x128xf32> to vector<2x32xf32>
    %660 = vector.extract_strided_slice %651 {offsets = [0, 64], sizes = [2, 32], strides = [1, 1]} : vector<2x128xf32> to vector<2x32xf32>
    %661 = math.tanh %660 : vector<2x32xf32>
    %662 = arith.mulf %658, %612 : vector<2x32xf32>
    %663 = arith.mulf %657, %661 : vector<2x32xf32>
    %664 = arith.addf %662, %663 : vector<2x32xf32>
    %665 = math.tanh %664 : vector<2x32xf32>
    %666 = arith.mulf %659, %665 : vector<2x32xf32>
    %cst_126 = arith.constant dense<0.000000e+00> : vector<2x128xf32>
    %667 = tpu.matmul %666, %379, %cst_126 {dimension_numbers = #tpu.dot_dimension_numbers<[1], [0], [0], [1], [0, 0, 1, 1], [], []>} : vector<2x32xf32>, vector<32x128xf32>, vector<2x128xf32> -> vector<2x128xf32>
    %cst_127 = arith.constant dense<0.000000e+00> : vector<2x128xf32>
    %668 = tpu.matmul %634, %380, %cst_127 {dimension_numbers = #tpu.dot_dimension_numbers<[1], [0], [0], [1], [0, 0, 1, 1], [], []>} : vector<2x32xf32>, vector<32x128xf32>, vector<2x128xf32> -> vector<2x128xf32>
    %669 = arith.addf %667, %668 : vector<2x128xf32>
    %670 = vector.broadcast %381 : vector<1x128xf32> to vector<2x128xf32>
    %671 = arith.addf %669, %670 : vector<2x128xf32>
    %672 = arith.negf %671 : vector<2x128xf32>
    %673 = math.exp %672 : vector<2x128xf32>
    %cst_128 = arith.constant 1.000000e+00 : f32
    %674 = vector.broadcast %cst_128 : f32 to vector<2x128xf32>
    %675 = arith.addf %674, %673 : vector<2x128xf32>
    %676 = arith.divf %674, %675 : vector<2x128xf32>
    %677 = vector.extract_strided_slice %676 {offsets = [0, 0], sizes = [2, 32], strides = [1, 1]} : vector<2x128xf32> to vector<2x32xf32>
    %678 = vector.extract_strided_slice %676 {offsets = [0, 32], sizes = [2, 32], strides = [1, 1]} : vector<2x128xf32> to vector<2x32xf32>
    %679 = vector.extract_strided_slice %676 {offsets = [0, 96], sizes = [2, 32], strides = [1, 1]} : vector<2x128xf32> to vector<2x32xf32>
    %680 = vector.extract_strided_slice %671 {offsets = [0, 64], sizes = [2, 32], strides = [1, 1]} : vector<2x128xf32> to vector<2x32xf32>
    %681 = math.tanh %680 : vector<2x32xf32>
    %682 = arith.mulf %678, %632 : vector<2x32xf32>
    %683 = arith.mulf %677, %681 : vector<2x32xf32>
    %684 = arith.addf %682, %683 : vector<2x32xf32>
    %685 = math.tanh %684 : vector<2x32xf32>
    %686 = arith.mulf %679, %685 : vector<2x32xf32>
    %cst_129 = arith.constant dense<0.000000e+00> : vector<2x128xf32>
    %687 = tpu.matmul %686, %382, %cst_129 {dimension_numbers = #tpu.dot_dimension_numbers<[1], [0], [0], [1], [0, 0, 1, 1], [], []>} : vector<2x32xf32>, vector<32x128xf32>, vector<2x128xf32> -> vector<2x128xf32>
    %688 = vector.broadcast %383 : vector<1x128xf32> to vector<2x128xf32>
    %689 = arith.addf %687, %688 : vector<2x128xf32>
    %c96_i32 = arith.constant 96 : i32
    %690 = tpu.dynamic_rotate %689 by %c96_i32 dim 1 : vector<2x128xf32>, i32 -> vector<2x128xf32>
    %691 = arith.addf %639, %690 : vector<2x128xf32>
    %692 = vector.extract_strided_slice %689 {offsets = [0, 0], sizes = [2, 16], strides = [1, 1]} : vector<2x128xf32> to vector<2x16xf32>
    %cst_130 = arith.constant dense<0xFF800000> : vector<2xf32>
    %693 = vector.multi_reduction <maximumf>, %692, %cst_130 [1] : vector<2x16xf32> to vector<2xf32>
    %694 = vector.shape_cast %693 : vector<2xf32> to vector<2x1xf32>
    %695 = vector.broadcast %694 : vector<2x1xf32> to vector<2x16xf32>
    %696 = arith.cmpf oeq, %692, %695 : vector<2x16xf32>
    %697 = arith.extui %696 : vector<2x16xi1> to vector<2x16xi32>
    %698 = arith.sitofp %697 : vector<2x16xi32> to vector<2x16xf32>
    %cst_131 = arith.constant dense<0.000000e+00> : vector<2x128xf32>
    %699 = tpu.matmul %698, %376, %cst_131 {dimension_numbers = #tpu.dot_dimension_numbers<[1], [0], [0], [1], [0, 0, 1, 1], [], []>} : vector<2x16xf32>, vector<16x128xf32>, vector<2x128xf32> -> vector<2x128xf32>
    %cst_132 = arith.constant dense<0.000000e+00> : vector<2x128xf32>
    %700 = tpu.matmul %666, %377, %cst_132 {dimension_numbers = #tpu.dot_dimension_numbers<[1], [0], [0], [1], [0, 0, 1, 1], [], []>} : vector<2x32xf32>, vector<32x128xf32>, vector<2x128xf32> -> vector<2x128xf32>
    %701 = arith.addf %699, %700 : vector<2x128xf32>
    %702 = vector.broadcast %378 : vector<1x128xf32> to vector<2x128xf32>
    %703 = arith.addf %701, %702 : vector<2x128xf32>
    %704 = arith.negf %703 : vector<2x128xf32>
    %705 = math.exp %704 : vector<2x128xf32>
    %cst_133 = arith.constant 1.000000e+00 : f32
    %706 = vector.broadcast %cst_133 : f32 to vector<2x128xf32>
    %707 = arith.addf %706, %705 : vector<2x128xf32>
    %708 = arith.divf %706, %707 : vector<2x128xf32>
    %709 = vector.extract_strided_slice %708 {offsets = [0, 0], sizes = [2, 32], strides = [1, 1]} : vector<2x128xf32> to vector<2x32xf32>
    %710 = vector.extract_strided_slice %708 {offsets = [0, 32], sizes = [2, 32], strides = [1, 1]} : vector<2x128xf32> to vector<2x32xf32>
    %711 = vector.extract_strided_slice %708 {offsets = [0, 96], sizes = [2, 32], strides = [1, 1]} : vector<2x128xf32> to vector<2x32xf32>
    %712 = vector.extract_strided_slice %703 {offsets = [0, 64], sizes = [2, 32], strides = [1, 1]} : vector<2x128xf32> to vector<2x32xf32>
    %713 = math.tanh %712 : vector<2x32xf32>
    %714 = arith.mulf %710, %664 : vector<2x32xf32>
    %715 = arith.mulf %709, %713 : vector<2x32xf32>
    %716 = arith.addf %714, %715 : vector<2x32xf32>
    %717 = math.tanh %716 : vector<2x32xf32>
    %718 = arith.mulf %711, %717 : vector<2x32xf32>
    %cst_134 = arith.constant dense<0.000000e+00> : vector<2x128xf32>
    %719 = tpu.matmul %718, %379, %cst_134 {dimension_numbers = #tpu.dot_dimension_numbers<[1], [0], [0], [1], [0, 0, 1, 1], [], []>} : vector<2x32xf32>, vector<32x128xf32>, vector<2x128xf32> -> vector<2x128xf32>
    %cst_135 = arith.constant dense<0.000000e+00> : vector<2x128xf32>
    %720 = tpu.matmul %686, %380, %cst_135 {dimension_numbers = #tpu.dot_dimension_numbers<[1], [0], [0], [1], [0, 0, 1, 1], [], []>} : vector<2x32xf32>, vector<32x128xf32>, vector<2x128xf32> -> vector<2x128xf32>
    %721 = arith.addf %719, %720 : vector<2x128xf32>
    %722 = vector.broadcast %381 : vector<1x128xf32> to vector<2x128xf32>
    %723 = arith.addf %721, %722 : vector<2x128xf32>
    %724 = arith.negf %723 : vector<2x128xf32>
    %725 = math.exp %724 : vector<2x128xf32>
    %cst_136 = arith.constant 1.000000e+00 : f32
    %726 = vector.broadcast %cst_136 : f32 to vector<2x128xf32>
    %727 = arith.addf %726, %725 : vector<2x128xf32>
    %728 = arith.divf %726, %727 : vector<2x128xf32>
    %729 = vector.extract_strided_slice %728 {offsets = [0, 0], sizes = [2, 32], strides = [1, 1]} : vector<2x128xf32> to vector<2x32xf32>
    %730 = vector.extract_strided_slice %728 {offsets = [0, 32], sizes = [2, 32], strides = [1, 1]} : vector<2x128xf32> to vector<2x32xf32>
    %731 = vector.extract_strided_slice %728 {offsets = [0, 96], sizes = [2, 32], strides = [1, 1]} : vector<2x128xf32> to vector<2x32xf32>
    %732 = vector.extract_strided_slice %723 {offsets = [0, 64], sizes = [2, 32], strides = [1, 1]} : vector<2x128xf32> to vector<2x32xf32>
    %733 = math.tanh %732 : vector<2x32xf32>
    %734 = arith.mulf %730, %684 : vector<2x32xf32>
    %735 = arith.mulf %729, %733 : vector<2x32xf32>
    %736 = arith.addf %734, %735 : vector<2x32xf32>
    %737 = math.tanh %736 : vector<2x32xf32>
    %738 = arith.mulf %731, %737 : vector<2x32xf32>
    %cst_137 = arith.constant dense<0.000000e+00> : vector<2x128xf32>
    %739 = tpu.matmul %738, %382, %cst_137 {dimension_numbers = #tpu.dot_dimension_numbers<[1], [0], [0], [1], [0, 0, 1, 1], [], []>} : vector<2x32xf32>, vector<32x128xf32>, vector<2x128xf32> -> vector<2x128xf32>
    %740 = vector.broadcast %383 : vector<1x128xf32> to vector<2x128xf32>
    %741 = arith.addf %739, %740 : vector<2x128xf32>
    %c112_i32 = arith.constant 112 : i32
    %742 = tpu.dynamic_rotate %741 by %c112_i32 dim 1 : vector<2x128xf32>, i32 -> vector<2x128xf32>
    %743 = arith.addf %691, %742 : vector<2x128xf32>
    %c0_138 = arith.constant 0 : index
    %c0_139 = arith.constant 0 : index
    %744 = vector.load %arg2[%c0_138, %c0_139] : memref<2x128xf32, #tpu.memory_space<vmem>>, vector<2x128xf32>
    tpu.vector_store %arg2[%c0_138, %c0_139], %743 {strides = array<i32>} : memref<2x128xf32, #tpu.memory_space<vmem>>, vector<2x128xf32>,
    return
  }
}

</mosaic_0001>

<bundles_post_ra>
// kernel: seq2seq_forward.1
= control target key start
LH: loop header
LB: loop body
LE: loop exit
PB: predicated region body
PF: predicated region fallthrough
CT: control target
= control target key end

     0   :  { %v6695_v0 = vmov 0.0   ;;  %vm6696_vm0 = vmmov 0   ;;  %s6697_s19 = smov 64   ;;  %s6698_s20 = smov 32   ;;  %vm25_vm2 = vcmask 261120   ;;  %vm2505_vm10 = vcmask 130048   ;;  %s8209_s1 = inlined_call_operand.vmem [shape: f32[272,128], index: 1, kind: input, shape index: {}]   ;;  %s8210_s0 = inlined_call_operand.vmem [shape: f32[40,128], index: 0, kind: input, shape index: {}]   ;;  %s8211_s2 = inlined_call_operand.vmem [shape: f32[2,128], index: 2, kind: output, shape index: {}]  }
   0x1   :  { %5791 = vmatprep.subr.mxu0 %v6695_v0  ;;  %v6723_v1 = vld [vmem:[%s8209_s1 + $0x18] sm:$0xff]  ;;  %v6728_v2 = vld [vmem:[%s8209_s1 + $0x10] sm:$0xff]  ;;  %5799 = vmatprep.mubr.msk.f32.mxu0 %vm6696_vm0, %v6695_v0  ;;  %v6738_v3 = vld [vmem:[%s8209_s1 + $0x8] sm:$0xff]  ;;  %s6699_s9 = smov 96   ;;  %vm2875_vm11 = vcmask 123904   ;;  %s6702_s28 = smov 80  }
   0x2   :  { %5792 = vmatpush3.msra.mxu0 %v6723_v1  ;;  %5802 = vmatprep.subr.mxu1 %v6695_v0  ;;  %v6747_v4 = vld [vmem:[%s8209_s1] sm:$0xff]  ;;  %v24_v5 = vld [vmem:[%s8210_s0 + $0x10] sm:$0x3]  ;;  %v6764_v19 = vld [vmem:[%s8209_s1 + $0x58] sm:$0xff] }
   0x3   :  { %5793 = vmatprep.subr.mxu0 %v6695_v0  ;;  %5810 = vmatprep.mubr.msk.f32.mxu1 %vm6696_vm0, %v6695_v0  ;;  %v6769_v20 = vld [vmem:[%s8209_s1 + $0x50] sm:$0xff]  ;;  %v6775_v21 = vld [vmem:[%s8209_s1 + $0x38] sm:$0xff]  ;;  %v6786_v23 = vld [vmem:[%s8209_s1 + $0x48] sm:$0xff] }
   0x4   :  { %5794 = vmatpush3.msra.mxu0 %v6728_v2  ;;  %5803 = vmatpush3.msra.mxu1 %v6764_v19  ;;  %v6780_v22 = vld [vmem:[%s8209_s1 + $0x30] sm:$0xff]  ;;  %v6794_v24 = vld [vmem:[%s8209_s1 + $0x28] sm:$0xff]  ;;  %v6800_v25 = vld [vmem:[%s8209_s1 + $0x40] sm:$0xff] }
   0x5   :  { %5795 = vmatprep.subr.mxu0 %v6695_v0  ;;  %5804 = vmatprep.subr.mxu1 %v6695_v0  ;;  %v6812_v27 = vld [vmem:[%s8209_s1 + $0x20] sm:$0xff]  ;;  %v317_v39 = vld [vmem:[%s8210_s0 + $0x12] sm:$0x3] }
   0x6   :  { %5796 = vmatpush3.msra.mxu0 %v6738_v3  ;;  %5805 = vmatpush3.msra.mxu1 %v6769_v20  ;;  %v6834_v32 = vld [vmem:[%s8210_s0] sm:$0x3] }
   0x7   :  { %5797 = vmatprep.subr.mxu0 %v6695_v0  ;;  %5806 = vmatprep.subr.mxu1 %v6695_v0  ;;  %vm299_vm1 = vcmp.gt.f32.partialorder %v6834_v32, 0.5  ;;  %v6867_v35 = vld [vmem:[%s8209_s1 + $0x60] ss:$0 sm:$0xff] }
   0x8   :  { %5798 = vmatpush3.msra.mxu0 %v6747_v4  ;;  %5807 = vmatpush3.msra.mxu1 %v6786_v23 }
   0x9   :  { %5800 = vmatmul.mubr.f32.vlgmr.msra.gmra.mxu0 %v6695_v0  ;;  %5813 = vmatprep.subr.mxu0 %v6695_v0 }
   0xa   :  { %5821 = vmatprep.mubr.msk.f32.mxu0 %vm6696_vm0, %v6695_v0  ;;  %5814 = vmatpush3.msra.mxu0 %v6775_v21 }
   0xb   :  { %5815 = vmatprep.subr.mxu0 %v6695_v0  ;;  %5808 = vmatprep.subr.mxu1 %v6695_v0 }
   0xc   :  { %5816 = vmatpush3.msra.mxu0 %v6780_v22  ;;  %5809 = vmatpush3.msra.mxu1 %v6800_v25 }
   0xd   :  { %5817 = vmatprep.subr.mxu0 %v6695_v0  ;;  %5824 = vmatprep.subr.mxu1 %v6695_v0 }
   0xe   :  { %5818 = vmatpush3.msra.mxu0 %v6794_v24  ;;  %5811 = vmatmul.mubr.f32.vlgmr.msra.gmra.mxu1 %v6695_v0 }
   0xf   :  { %5825 = vmatpush3.msra.mxu1 %v6723_v1  ;;  %5819 = vmatprep.subr.mxu0 %v6695_v0 }
  0x10   :  { %5826 = vmatprep.subr.mxu1 %v6695_v0  ;;  %5820 = vmatpush3.msra.mxu0 %v6812_v27 }
  0x11   :  { %5827 = vmatpush3.msra.mxu1 %v6728_v2  ;;  %5832 = vmatprep.mubr.msk.f32.mxu1 %vm6696_vm0, %v6695_v0 }
  0x12   :  { %5828 = vmatprep.subr.mxu1 %v6695_v0  ;;  %5835 = vmatprep.subr.mxu0 %v6695_v0 }
  0x13   :  { %5829 = vmatpush3.msra.mxu1 %v6738_v3 }
  0x14   :  { %5830 = vmatprep.subr.mxu1 %v6695_v0 }
  0x15   :  { %5831 = vmatpush3.msra.mxu1 %v6747_v4 }
  0x16   :  { %5846 = vmatprep.subr.mxu1 %v6695_v0 }
  0xc9   :  { %v95_v6 = vpop.f32.mrf.mxu0 }
  0xca   :  { %v99_v7 = vadd.f32 %v95_v6, %v24_v5 }
  0xcb   :  { %v5801_v8 = vpop.f32.mrf.mxu0 }
  0xcc   :  { %6421 = vtanh.f32 %v99_v7  ;;  %v5413_v10 = vmul.f32 -1.442695, %v99_v7 }
  0xce   :  { %6423 = vpow2.f32 %v5413_v10  ;;  %v190_v30 = vpop.f32.mrf.mxu1 }
  0xd0   :  { %v5812_v31 = vpop.f32.mrf.mxu1 }
  0xd9   :  { %v6422_v9 = vpop.eup %6421 }
  0xda   :  { %109 = vrot.lane.b32.xlu0 %v6422_v9, %s6697_s19 }
  0xdb   :  { %v6424_v11 = vpop.eup %6423 }
  0xdc   :  { %v103_v12 = vadd.f32 1.0, %v6424_v11 }
  0xde   :  { %6425 = vrcp.f32 %v103_v12 }
  0xeb   :  { %v6426_v13 = vpop.eup %6425 }
  0xec   :  { %v107_v16 = vmul.f32 0.0, %v6426_v13 }
 0x14c   :  { %v110_v14 = vpop.permute.xlu0 %109 }
 0x14d   :  { %v112_v15 = vmul.f32 %v6426_v13, %v110_v14 }
 0x14f   :  { %114 = vrot.lane.b32.xlu0 %v112_v15, %s6698_s20 }
 0x1c1   :  { %v115_v17 = vpop.permute.xlu0 %114 }
 0x1c2   :  { %v117_v18 = vadd.f32 %v115_v17, %v107_v16  ;;  %v6899_v16 = vld [vmem:[%s8210_s0 + $0x2] sm:$0x3] }
 0x1c3   :  { %vm598_vm3 = vcmp.gt.f32.partialorder %v6899_v16, 0.5 }
 0x1c4   :  { %6427 = vtanh.f32 %v117_v18 }
 0x1d1   :  { %v6428_v26 = vpop.eup %6427 }
 0x1d2   :  { %120 = vrot.lane.b32.xlu1 %v6428_v26, %s6697_s19 }
 0x244   :  { %v121_v28 = vpop.permute.xlu1 %120 }
 0x245   :  { %v123_v29 = vmul.f32 %v6426_v13, %v121_v28 }
 0x247   :  { %195 = vrot.lane.b32.xlu1 %v123_v29, %s6698_s20 }
 0x24b   :  { %303 = vrot.lane.b32.xlu1 %v117_v18, %s6699_s9 }
 0x2b9   :  { %v196_v33 = vpop.permute.xlu1 %195 }
 0x2ba   :  { %v6839_v34 = vsel %vm299_vm1, %v196_v33, 0.0  ;;  %5822 = vmatmul.mubr.msk.f32.vlgmr.msra.gmra.mxu0 %vm25_vm2, %v196_v33 }
 0x2bb   :  { %5833 = vmatmul.mubr.msk.f32.vlgmr.msra.gmra.mxu1 %vm25_vm2, %v6839_v34  ;;  %5836 = vmatpush3.msra.mxu0 %v6764_v19 }
 0x2bc   :  { %5837 = vmatprep.subr.mxu0 %v6695_v0  ;;  %5847 = vmatpush3.msra.mxu1 %v6775_v21 }
 0x2bd   :  { %5838 = vmatpush3.msra.mxu0 %v6769_v20  ;;  %5848 = vmatprep.subr.mxu1 %v6695_v0  ;;  %v304_v46 = vpop.permute.xlu1 %303 }
 0x2be   :  { %5839 = vmatprep.subr.mxu0 %v6695_v0  ;;  %5849 = vmatpush3.msra.mxu1 %v6780_v22  ;;  %v6877_v47 = vsel %vm299_vm1, %v304_v46, 0.0 }
 0x2bf   :  { %5840 = vmatpush3.msra.mxu0 %v6786_v23  ;;  %5843 = vmatprep.mubr.msk.f32.mxu0 %vm6696_vm0, %v6695_v0 }
 0x2c0   :  { %5841 = vmatprep.subr.mxu0 %v6695_v0  ;;  %5850 = vmatprep.subr.mxu1 %v6695_v0 }
 0x2c1   :  { %5842 = vmatpush3.msra.mxu0 %v6800_v25  ;;  %5851 = vmatpush3.msra.mxu1 %v6794_v24 }
 0x2c2   :  { %5857 = vmatprep.subr.mxu0 %v6695_v0  ;;  %5852 = vmatprep.subr.mxu1 %v6695_v0 }
 0x2c3   :  { %5853 = vmatpush3.msra.mxu1 %v6812_v27  ;;  %5854 = vmatprep.mubr.msk.f32.mxu1 %vm6696_vm0, %v6695_v0 }
 0x2c4   :  { %5868 = vmatprep.subr.mxu1 %v6695_v0 }
 0x37a   :  { %v265_v36 = vpop.f32.mrf.mxu0 }
 0x37b   :  { %v266_v37 = vadd.f32 %v265_v36, %v190_v30  ;;  %v387_v38 = vpop.f32.mrf.mxu1 }
 0x37c   :  { %v5823_v40 = vpop.f32.mrf.mxu0  ;;  %v391_v43 = vadd.f32 %v387_v38, %v317_v39  ;;  %v616_v38 = vld [vmem:[%s8210_s0 + $0x14] sm:$0x3] }
 0x37d   :  { %v273_v41 = vadd.f32 %v6867_v35, %v266_v37  ;;  %v5834_v42 = vpop.f32.mrf.mxu1 }
 0x37e   :  { %v5418_v49 = vmul.f32 -1.442695, %v391_v43 }
 0x37f   :  { %6429 = vtanh.f32 %v273_v41  ;;  %v5416_v48 = vmul.f32 -1.442695, %v273_v41 }
 0x380   :  { %6431 = vtanh.f32 %v391_v43 }
 0x381   :  { %6433 = vpow2.f32 %v5416_v48 }
 0x382   :  { %6435 = vpow2.f32 %v5418_v49 }
 0x38c   :  { %v6430_v44 = vpop.eup %6429 }
 0x38d   :  { %283 = vrot.lane.b32.xlu0 %v6430_v44, %s6697_s19  ;;  %v6432_v45 = vpop.eup %6431 }
 0x38e   :  { %v6434_v50 = vpop.eup %6433 }
 0x38f   :  { %v277_v51 = vadd.f32 1.0, %v6434_v50  ;;  %v6436_v52 = vpop.eup %6435 }
 0x390   :  { %v395_v53 = vadd.f32 1.0, %v6436_v52 }
 0x391   :  { %405 = vrot.lane.b32.xlu0 %v6432_v45, %s6697_s19  ;;  %6437 = vrcp.f32 %v277_v51 }
 0x392   :  { %6439 = vrcp.f32 %v395_v53 }
 0x395   :  { %400 = vrot.lane.b32.xlu0 %v6877_v47, %s6698_s20 }
 0x39e   :  { %v6438_v54 = vpop.eup %6437 }
 0x39f   :  { %v6440_v57 = vpop.eup %6439  ;;  %v281_v60 = vmul.f32 0.0, %v6438_v54 }
 0x3ff   :  { %v284_v55 = vpop.permute.xlu0 %283 }
 0x400   :  { %v286_v56 = vmul.f32 %v6438_v54, %v284_v55 }
 0x402   :  { %288 = vrot.lane.b32.xlu1 %v286_v56, %s6698_s20 }
 0x403   :  { %v406_v58 = vpop.permute.xlu0 %405 }
 0x404   :  { %v408_v59 = vmul.f32 %v6440_v57, %v406_v58 }
 0x406   :  { %410 = vrot.lane.b32.xlu1 %v408_v59, %s6698_s20 }
 0x407   :  { %v401_v61 = vpop.permute.xlu0 %400 }
 0x408   :  { %v403_v5 = vmul.f32 %v6440_v57, %v401_v61 }
 0x474   :  { %v289_v62 = vpop.permute.xlu1 %288 }
 0x475   :  { %v291_v63 = vadd.f32 %v289_v62, %v281_v60 }
 0x477   :  { %6441 = vtanh.f32 %v291_v63 }
 0x478   :  { %v411_v6 = vpop.permute.xlu1 %410 }
 0x479   :  { %v413_v7 = vadd.f32 %v411_v6, %v403_v5 }
 0x47b   :  { %6443 = vtanh.f32 %v413_v7 }
 0x484   :  { %v6442_v8 = vpop.eup %6441 }
 0x485   :  { %294 = vrot.lane.b32.xlu0 %v6442_v8, %s6697_s19 }
 0x488   :  { %v6444_v9 = vpop.eup %6443 }
 0x489   :  { %416 = vrot.lane.b32.xlu1 %v6444_v9, %s6697_s19 }
 0x4f7   :  { %v295_v10 = vpop.permute.xlu0 %294 }
 0x4f8   :  { %v297_v11 = vmul.f32 %v6438_v54, %v295_v10 }
 0x4fa   :  { %308 = vrot.lane.b32.xlu0 %v297_v11, %s6698_s20 }
 0x4fb   :  { %v417_v12 = vpop.permute.xlu1 %416 }
 0x4fc   :  { %v419_v13 = vmul.f32 %v6440_v57, %v417_v12 }
 0x4fe   :  { %313 = vrot.lane.b32.xlu0 %v291_v63, %s6699_s9  ;;  %494 = vrot.lane.b32.xlu1 %v419_v13, %s6698_s20  ;;  %v6977_v13 = vld [vmem:[%s8210_s0 + $0x4] sm:$0x3] }
 0x4ff   :  { %vm897_vm4 = vcmp.gt.f32.partialorder %v6977_v13, 0.5 }
 0x502   :  { %602 = vrot.lane.b32.xlu0 %v413_v7, %s6699_s9 }
 0x56c   :  { %v309_v14 = vpop.permute.xlu0 %308 }
 0x56d   :  { %v6891_v15 = vsel %vm299_vm1, %v309_v14, 0.0 }
 0x56e   :  { %5844 = vmatmul.mubr.msk.f32.vlgmr.msra.gmra.mxu0 %vm25_vm2, %v6891_v15 }
 0x56f   :  { %5858 = vmatpush3.msra.mxu0 %v6723_v1  ;;  %5865 = vmatprep.mubr.msk.f32.mxu0 %vm6696_vm0, %v6695_v0 }
 0x570   :  { %5859 = vmatprep.subr.mxu0 %v6695_v0  ;;  %v314_v17 = vpop.permute.xlu0 %313  ;;  %v495_v18 = vpop.permute.xlu1 %494 }
 0x571   :  { %5860 = vmatpush3.msra.mxu0 %v6728_v2  ;;  %5855 = vmatmul.mubr.msk.f32.vlgmr.msra.gmra.mxu1 %vm25_vm2, %v495_v18  ;;  %v6908_v26 = vsel %vm299_vm1, %v314_v17, 0.0  ;;  %v6921_v29 = vsel %vm598_vm3, %v495_v18, %v6839_v34 }
 0x572   :  { %5861 = vmatprep.subr.mxu0 %v6695_v0  ;;  %577 = vrot.lane.b32.xlu0 %v6908_v26, %s6698_s20 }
 0x573   :  { %5862 = vmatpush3.msra.mxu0 %v6738_v3  ;;  %5869 = vmatpush3.msra.mxu1 %v6764_v19 }
 0x574   :  { %5863 = vmatprep.subr.mxu0 %v6695_v0  ;;  %v603_v28 = vpop.permute.xlu0 %602  ;;  %5870 = vmatprep.subr.mxu1 %v6695_v0 }
 0x575   :  { %5864 = vmatpush3.msra.mxu0 %v6747_v4  ;;  %v6927_v30 = vsel %vm598_vm3, %v603_v28, %v6877_v47  ;;  %5871 = vmatpush3.msra.mxu1 %v6769_v20 }
 0x576   :  { %5866 = vmatmul.mubr.msk.f32.vlgmr.msra.gmra.mxu0 %vm25_vm2, %v6921_v29  ;;  %699 = vrot.lane.b32.xlu0 %v6927_v30, %s6698_s20 }
 0x577   :  { %5872 = vmatprep.subr.mxu1 %v6695_v0  ;;  %5879 = vmatprep.subr.mxu0 %v6695_v0 }
 0x578   :  { %5873 = vmatpush3.msra.mxu1 %v6786_v23  ;;  %5880 = vmatpush3.msra.mxu0 %v6775_v21 }
 0x579   :  { %5874 = vmatprep.subr.mxu1 %v6695_v0  ;;  %5881 = vmatprep.subr.mxu0 %v6695_v0 }
 0x57a   :  { %5875 = vmatpush3.msra.mxu1 %v6800_v25  ;;  %5882 = vmatpush3.msra.mxu0 %v6780_v22 }
 0x57b   :  { %5876 = vmatprep.mubr.msk.f32.mxu1 %vm6696_vm0, %v6695_v0  ;;  %5883 = vmatprep.subr.mxu0 %v6695_v0 }
 0x57c   :  { %5890 = vmatprep.subr.mxu1 %v6695_v0  ;;  %5884 = vmatpush3.msra.mxu0 %v6794_v24 }
 0x57d   :  { %5885 = vmatprep.subr.mxu0 %v6695_v0  ;;  %5887 = vmatprep.mubr.msk.f32.mxu0 %vm6696_vm0, %v6695_v0 }
 0x57e   :  { %5886 = vmatpush3.msra.mxu0 %v6812_v27 }
 0x57f   :  { %5901 = vmatprep.subr.mxu0 %v6695_v0 }
 0x5e4   :  { %v578_v56 = vpop.permute.xlu0 %577 }
 0x5e8   :  { %v700_v60 = vpop.permute.xlu0 %699 }
 0x62e   :  { %v489_v31 = vpop.f32.mrf.mxu0 }
 0x630   :  { %v5845_v32 = vpop.f32.mrf.mxu0 }
 0x631   :  { %v564_v33 = vpop.f32.mrf.mxu1 }
 0x632   :  { %v565_v34 = vadd.f32 %v564_v33, %v489_v31 }
 0x633   :  { %v5856_v36 = vpop.f32.mrf.mxu1 }
 0x634   :  { %v568_v37 = vadd.f32 %v6867_v35, %v565_v34  ;;  %v915_v34 = vld [vmem:[%s8210_s0 + $0x16] sm:$0x3] }
 0x636   :  { %6445 = vtanh.f32 %v568_v37  ;;  %v686_v39 = vpop.f32.mrf.mxu0  ;;  %v5421_v44 = vmul.f32 -1.442695, %v568_v37 }
 0x637   :  { %v690_v40 = vadd.f32 %v686_v39, %v616_v38 }
 0x638   :  { %v5867_v41 = vpop.f32.mrf.mxu0 }
 0x639   :  { %6447 = vtanh.f32 %v690_v40  ;;  %v5423_v45 = vmul.f32 -1.442695, %v690_v40 }
 0x63a   :  { %6449 = vpow2.f32 %v5421_v44 }
 0x63b   :  { %6451 = vpow2.f32 %v5423_v45 }
 0x643   :  { %v6446_v42 = vpop.eup %6445 }
 0x644   :  { %582 = vrot.lane.b32.xlu1 %v6446_v42, %s6697_s19 }
 0x646   :  { %v6448_v43 = vpop.eup %6447 }
 0x647   :  { %v6450_v46 = vpop.eup %6449 }
 0x648   :  { %704 = vrot.lane.b32.xlu1 %v6448_v43, %s6697_s19  ;;  %v572_v47 = vadd.f32 1.0, %v6450_v46  ;;  %v6452_v48 = vpop.eup %6451 }
 0x649   :  { %v694_v49 = vadd.f32 1.0, %v6452_v48 }
 0x64a   :  { %6453 = vrcp.f32 %v572_v47 }
 0x64b   :  { %6455 = vrcp.f32 %v694_v49 }
 0x657   :  { %v6454_v50 = vpop.eup %6453 }
 0x658   :  { %v6456_v53 = vpop.eup %6455  ;;  %v580_v57 = vmul.f32 %v6454_v50, %v578_v56 }
 0x659   :  { %v702_v61 = vmul.f32 %v6456_v53, %v700_v60 }
 0x6b6   :  { %v583_v51 = vpop.permute.xlu1 %582 }
 0x6b7   :  { %v585_v52 = vmul.f32 %v6454_v50, %v583_v51 }
 0x6b9   :  { %587 = vrot.lane.b32.xlu1 %v585_v52, %s6698_s20 }
 0x6ba   :  { %v705_v54 = vpop.permute.xlu1 %704 }
 0x6bb   :  { %v707_v55 = vmul.f32 %v6456_v53, %v705_v54 }
 0x6bd   :  { %709 = vrot.lane.b32.xlu1 %v707_v55, %s6698_s20 }
 0x72b   :  { %v588_v58 = vpop.permute.xlu1 %587 }
 0x72c   :  { %v590_v59 = vadd.f32 %v588_v58, %v580_v57 }
 0x72e   :  { %6457 = vtanh.f32 %v590_v59 }
 0x72f   :  { %v710_v62 = vpop.permute.xlu1 %709 }
 0x730   :  { %v712_v63 = vadd.f32 %v710_v62, %v702_v61 }
 0x732   :  { %6459 = vtanh.f32 %v712_v63 }
 0x73b   :  { %v6458_v5 = vpop.eup %6457 }
 0x73c   :  { %593 = vrot.lane.b32.xlu0 %v6458_v5, %s6697_s19 }
 0x73f   :  { %v6460_v6 = vpop.eup %6459 }
 0x740   :  { %715 = vrot.lane.b32.xlu1 %v6460_v6, %s6697_s19 }
 0x7ae   :  { %v594_v7 = vpop.permute.xlu0 %593 }
 0x7af   :  { %v596_v8 = vmul.f32 %v6454_v50, %v594_v7 }
 0x7b1   :  { %607 = vrot.lane.b32.xlu0 %v596_v8, %s6698_s20 }
 0x7b2   :  { %v716_v9 = vpop.permute.xlu1 %715 }
 0x7b3   :  { %v718_v10 = vmul.f32 %v6456_v53, %v716_v9 }
 0x7b5   :  { %612 = vrot.lane.b32.xlu0 %v590_v59, %s6699_s9  ;;  %793 = vrot.lane.b32.xlu1 %v718_v10, %s6698_s20  ;;  %v7056_v10 = vld [vmem:[%s8210_s0 + $0x6] sm:$0x3] }
 0x7b6   :  { %vm1196_vm5 = vcmp.gt.f32.partialorder %v7056_v10, 0.5 }
 0x7b9   :  { %901 = vrot.lane.b32.xlu0 %v712_v63, %s6699_s9 }
 0x823   :  { %v608_v11 = vpop.permute.xlu0 %607 }
 0x824   :  { %v6969_v12 = vsel %vm598_vm3, %v608_v11, %v6891_v15 }
 0x825   :  { %5877 = vmatmul.mubr.msk.f32.vlgmr.msra.gmra.mxu1 %vm25_vm2, %v6969_v12 }
 0x826   :  { %5891 = vmatpush3.msra.mxu1 %v6723_v1  ;;  %5898 = vmatprep.mubr.msk.f32.mxu1 %vm6696_vm0, %v6695_v0 }
 0x827   :  { %5892 = vmatprep.subr.mxu1 %v6695_v0  ;;  %v613_v14 = vpop.permute.xlu0 %612  ;;  %v794_v17 = vpop.permute.xlu1 %793 }
 0x828   :  { %5893 = vmatpush3.msra.mxu1 %v6728_v2  ;;  %5888 = vmatmul.mubr.msk.f32.vlgmr.msra.gmra.mxu0 %vm25_vm2, %v794_v17  ;;  %v6987_v15 = vsel %vm598_vm3, %v613_v14, %v6908_v26  ;;  %v7000_v16 = vsel %vm897_vm4, %v794_v17, %v6921_v29 }
 0x829   :  { %5894 = vmatprep.subr.mxu1 %v6695_v0  ;;  %876 = vrot.lane.b32.xlu0 %v6987_v15, %s6698_s20 }
 0x82a   :  { %5895 = vmatpush3.msra.mxu1 %v6738_v3  ;;  %5902 = vmatpush3.msra.mxu0 %v6764_v19 }
 0x82b   :  { %5896 = vmatprep.subr.mxu1 %v6695_v0  ;;  %v902_v18 = vpop.permute.xlu0 %901  ;;  %5903 = vmatprep.subr.mxu0 %v6695_v0 }
 0x82c   :  { %5897 = vmatpush3.msra.mxu1 %v6747_v4  ;;  %v7006_v26 = vsel %vm897_vm4, %v902_v18, %v6927_v30  ;;  %5904 = vmatpush3.msra.mxu0 %v6769_v20 }
 0x82d   :  { %5899 = vmatmul.mubr.msk.f32.vlgmr.msra.gmra.mxu1 %vm25_vm2, %v7000_v16  ;;  %998 = vrot.lane.b32.xlu0 %v7006_v26, %s6698_s20 }
 0x82e   :  { %5905 = vmatprep.subr.mxu0 %v6695_v0  ;;  %5912 = vmatprep.subr.mxu1 %v6695_v0 }
 0x82f   :  { %5906 = vmatpush3.msra.mxu0 %v6786_v23  ;;  %5913 = vmatpush3.msra.mxu1 %v6775_v21 }
 0x830   :  { %5907 = vmatprep.subr.mxu0 %v6695_v0  ;;  %5914 = vmatprep.subr.mxu1 %v6695_v0 }
 0x831   :  { %5908 = vmatpush3.msra.mxu0 %v6800_v25  ;;  %5915 = vmatpush3.msra.mxu1 %v6780_v22 }
 0x832   :  { %5909 = vmatprep.mubr.msk.f32.mxu0 %vm6696_vm0, %v6695_v0  ;;  %5916 = vmatprep.subr.mxu1 %v6695_v0 }
 0x833   :  { %5923 = vmatprep.subr.mxu0 %v6695_v0  ;;  %5917 = vmatpush3.msra.mxu1 %v6794_v24 }
 0x834   :  { %5918 = vmatprep.subr.mxu1 %v6695_v0  ;;  %5920 = vmatprep.mubr.msk.f32.mxu1 %vm6696_vm0, %v6695_v0 }
 0x835   :  { %5919 = vmatpush3.msra.mxu1 %v6812_v27 }
 0x836   :  { %5934 = vmatprep.subr.mxu1 %v6695_v0 }
 0x89b   :  { %v877_v53 = vpop.permute.xlu0 %876 }
 0x89f   :  { %v999_v57 = vpop.permute.xlu0 %998 }
 0x8e5   :  { %v788_v28 = vpop.f32.mrf.mxu1 }
 0x8e7   :  { %v5878_v29 = vpop.f32.mrf.mxu1 }
 0x8e8   :  { %v863_v30 = vpop.f32.mrf.mxu0 }
 0x8e9   :  { %v864_v31 = vadd.f32 %v863_v30, %v788_v28 }
 0x8ea   :  { %v5889_v32 = vpop.f32.mrf.mxu0 }
 0x8eb   :  { %v867_v33 = vadd.f32 %v6867_v35, %v864_v31  ;;  %v1214_v31 = vld [vmem:[%s8210_s0 + $0x18] sm:$0x3] }
 0x8ed   :  { %6461 = vtanh.f32 %v867_v33  ;;  %v985_v36 = vpop.f32.mrf.mxu1  ;;  %v5426_v41 = vmul.f32 -1.442695, %v867_v33 }
 0x8ee   :  { %v989_v37 = vadd.f32 %v985_v36, %v915_v34 }
 0x8ef   :  { %v5900_v38 = vpop.f32.mrf.mxu1 }
 0x8f0   :  { %6463 = vtanh.f32 %v989_v37  ;;  %v5428_v42 = vmul.f32 -1.442695, %v989_v37 }
 0x8f1   :  { %6465 = vpow2.f32 %v5426_v41 }
 0x8f2   :  { %6467 = vpow2.f32 %v5428_v42 }
 0x8fa   :  { %v6462_v39 = vpop.eup %6461 }
 0x8fb   :  { %881 = vrot.lane.b32.xlu1 %v6462_v39, %s6697_s19 }
 0x8fd   :  { %v6464_v40 = vpop.eup %6463 }
 0x8fe   :  { %v6466_v43 = vpop.eup %6465 }
 0x8ff   :  { %1003 = vrot.lane.b32.xlu1 %v6464_v40, %s6697_s19  ;;  %v871_v44 = vadd.f32 1.0, %v6466_v43  ;;  %v6468_v45 = vpop.eup %6467 }
 0x900   :  { %v993_v46 = vadd.f32 1.0, %v6468_v45 }
 0x901   :  { %6469 = vrcp.f32 %v871_v44 }
 0x902   :  { %6471 = vrcp.f32 %v993_v46 }
 0x90e   :  { %v6470_v47 = vpop.eup %6469 }
 0x90f   :  { %v6472_v50 = vpop.eup %6471  ;;  %v879_v54 = vmul.f32 %v6470_v47, %v877_v53 }
 0x910   :  { %v1001_v58 = vmul.f32 %v6472_v50, %v999_v57 }
 0x96d   :  { %v882_v48 = vpop.permute.xlu1 %881 }
 0x96e   :  { %v884_v49 = vmul.f32 %v6470_v47, %v882_v48 }
 0x970   :  { %886 = vrot.lane.b32.xlu1 %v884_v49, %s6698_s20 }
 0x971   :  { %v1004_v51 = vpop.permute.xlu1 %1003 }
 0x972   :  { %v1006_v52 = vmul.f32 %v6472_v50, %v1004_v51 }
 0x974   :  { %1008 = vrot.lane.b32.xlu1 %v1006_v52, %s6698_s20 }
 0x9e2   :  { %v887_v55 = vpop.permute.xlu1 %886 }
 0x9e3   :  { %v889_v56 = vadd.f32 %v887_v55, %v879_v54 }
 0x9e5   :  { %6473 = vtanh.f32 %v889_v56 }
 0x9e6   :  { %v1009_v59 = vpop.permute.xlu1 %1008 }
 0x9e7   :  { %v1011_v60 = vadd.f32 %v1009_v59, %v1001_v58 }
 0x9e9   :  { %6475 = vtanh.f32 %v1011_v60 }
 0x9f2   :  { %v6474_v61 = vpop.eup %6473 }
 0x9f3   :  { %892 = vrot.lane.b32.xlu0 %v6474_v61, %s6697_s19 }
 0x9f6   :  { %v6476_v62 = vpop.eup %6475 }
 0x9f7   :  { %1014 = vrot.lane.b32.xlu1 %v6476_v62, %s6697_s19 }
 0xa65   :  { %v893_v63 = vpop.permute.xlu0 %892 }
 0xa66   :  { %v895_v5 = vmul.f32 %v6470_v47, %v893_v63 }
 0xa68   :  { %906 = vrot.lane.b32.xlu0 %v895_v5, %s6698_s20 }
 0xa69   :  { %v1015_v6 = vpop.permute.xlu1 %1014 }
 0xa6a   :  { %v1017_v7 = vmul.f32 %v6472_v50, %v1015_v6 }
 0xa6c   :  { %1092 = vrot.lane.b32.xlu1 %v1017_v7, %s6698_s20  ;;  %911 = vrot.lane.b32.xlu0 %v889_v56, %s6699_s9  ;;  %v7135_v7 = vld [vmem:[%s8210_s0 + $0x8] sm:$0x3] }
 0xa6d   :  { %vm1495_vm6 = vcmp.gt.f32.partialorder %v7135_v7, 0.5  ;;  %v7299_v7 = vld [vmem:[%s8209_s1 + $0x40] sm:$0xff] }
 0xa70   :  { %1200 = vrot.lane.b32.xlu0 %v1011_v60, %s6699_s9 }
 0xada   :  { %v907_v8 = vpop.permute.xlu0 %906 }
 0xadb   :  { %v7048_v9 = vsel %vm897_vm4, %v907_v8, %v6969_v12 }
 0xadc   :  { %5910 = vmatmul.mubr.msk.f32.vlgmr.msra.gmra.mxu0 %vm25_vm2, %v7048_v9 }
 0xadd   :  { %5924 = vmatpush3.msra.mxu0 %v6723_v1  ;;  %5931 = vmatprep.mubr.msk.f32.mxu0 %vm6696_vm0, %v6695_v0 }
 0xade   :  { %5925 = vmatprep.subr.mxu0 %v6695_v0  ;;  %v1093_v11 = vpop.permute.xlu1 %1092  ;;  %v912_v14 = vpop.permute.xlu0 %911 }
 0xadf   :  { %5926 = vmatpush3.msra.mxu0 %v6728_v2  ;;  %5921 = vmatmul.mubr.msk.f32.vlgmr.msra.gmra.mxu1 %vm25_vm2, %v1093_v11  ;;  %v7066_v12 = vsel %vm897_vm4, %v912_v14, %v6987_v15  ;;  %v7079_v13 = vsel %vm1196_vm5, %v1093_v11, %v7000_v16 }
 0xae0   :  { %5927 = vmatprep.subr.mxu0 %v6695_v0  ;;  %1175 = vrot.lane.b32.xlu0 %v7066_v12, %s6698_s20 }
 0xae1   :  { %5928 = vmatpush3.msra.mxu0 %v6738_v3  ;;  %5935 = vmatpush3.msra.mxu1 %v6764_v19 }
 0xae2   :  { %5929 = vmatprep.subr.mxu0 %v6695_v0  ;;  %v1201_v17 = vpop.permute.xlu0 %1200  ;;  %5936 = vmatprep.subr.mxu1 %v6695_v0 }
 0xae3   :  { %5930 = vmatpush3.msra.mxu0 %v6747_v4  ;;  %v7085_v15 = vsel %vm1196_vm5, %v1201_v17, %v7006_v26  ;;  %5937 = vmatpush3.msra.mxu1 %v6769_v20 }
 0xae4   :  { %5932 = vmatmul.mubr.msk.f32.vlgmr.msra.gmra.mxu0 %vm25_vm2, %v7079_v13  ;;  %1297 = vrot.lane.b32.xlu0 %v7085_v15, %s6698_s20 }
 0xae5   :  { %5938 = vmatprep.subr.mxu1 %v6695_v0  ;;  %5945 = vmatprep.subr.mxu0 %v6695_v0 }
 0xae6   :  { %5939 = vmatpush3.msra.mxu1 %v6786_v23  ;;  %5946 = vmatpush3.msra.mxu0 %v6775_v21 }
 0xae7   :  { %5940 = vmatprep.subr.mxu1 %v6695_v0  ;;  %5947 = vmatprep.subr.mxu0 %v6695_v0 }
 0xae8   :  { %5941 = vmatpush3.msra.mxu1 %v6800_v25  ;;  %5948 = vmatpush3.msra.mxu0 %v6780_v22 }
 0xae9   :  { %5942 = vmatprep.mubr.msk.f32.mxu1 %vm6696_vm0, %v6695_v0  ;;  %5949 = vmatprep.subr.mxu0 %v6695_v0 }
 0xaea   :  { %5956 = vmatprep.subr.mxu1 %v6695_v0  ;;  %5950 = vmatpush3.msra.mxu0 %v6794_v24 }
 0xaeb   :  { %5951 = vmatprep.subr.mxu0 %v6695_v0  ;;  %5953 = vmatprep.mubr.msk.f32.mxu0 %vm6696_vm0, %v6695_v0 }
 0xaec   :  { %5952 = vmatpush3.msra.mxu0 %v6812_v27 }
 0xaed   :  { %5967 = vmatprep.subr.mxu0 %v6695_v0 }
 0xb52   :  { %v1176_v50 = vpop.permute.xlu0 %1175 }
 0xb56   :  { %v1298_v54 = vpop.permute.xlu0 %1297 }
 0xb9c   :  { %v1087_v18 = vpop.f32.mrf.mxu0 }
 0xb9e   :  { %v5911_v16 = vpop.f32.mrf.mxu0 }
 0xb9f   :  { %v1162_v26 = vpop.f32.mrf.mxu1 }
 0xba0   :  { %v1163_v28 = vadd.f32 %v1162_v26, %v1087_v18 }
 0xba1   :  { %v5922_v29 = vpop.f32.mrf.mxu1 }
 0xba2   :  { %v1166_v30 = vadd.f32 %v6867_v35, %v1163_v28 }
 0xba4   :  { %6477 = vtanh.f32 %v1166_v30  ;;  %v1284_v32 = vpop.f32.mrf.mxu0  ;;  %v5431_v38 = vmul.f32 -1.442695, %v1166_v30 }
 0xba5   :  { %v1288_v33 = vadd.f32 %v1284_v32, %v1214_v31 }
 0xba6   :  { %v5933_v34 = vpop.f32.mrf.mxu0 }
 0xba7   :  { %6479 = vtanh.f32 %v1288_v33  ;;  %v5433_v39 = vmul.f32 -1.442695, %v1288_v33 }
 0xba8   :  { %6481 = vpow2.f32 %v5431_v38 }
 0xba9   :  { %6483 = vpow2.f32 %v5433_v39 }
 0xbb1   :  { %v6478_v36 = vpop.eup %6477 }
 0xbb2   :  { %1180 = vrot.lane.b32.xlu1 %v6478_v36, %s6697_s19 }
 0xbb4   :  { %v6480_v37 = vpop.eup %6479 }
 0xbb5   :  { %v6482_v40 = vpop.eup %6481 }
 0xbb6   :  { %1302 = vrot.lane.b32.xlu1 %v6480_v37, %s6697_s19  ;;  %v1170_v41 = vadd.f32 1.0, %v6482_v40  ;;  %v6484_v42 = vpop.eup %6483 }
 0xbb7   :  { %v1292_v43 = vadd.f32 1.0, %v6484_v42 }
 0xbb8   :  { %6485 = vrcp.f32 %v1170_v41 }
 0xbb9   :  { %6487 = vrcp.f32 %v1292_v43 }
 0xbc5   :  { %v6486_v44 = vpop.eup %6485 }
 0xbc6   :  { %v6488_v47 = vpop.eup %6487  ;;  %v1178_v51 = vmul.f32 %v6486_v44, %v1176_v50 }
 0xbc7   :  { %v1300_v55 = vmul.f32 %v6488_v47, %v1298_v54 }
 0xc24   :  { %v1181_v45 = vpop.permute.xlu1 %1180 }
 0xc25   :  { %v1183_v46 = vmul.f32 %v6486_v44, %v1181_v45 }
 0xc27   :  { %1185 = vrot.lane.b32.xlu1 %v1183_v46, %s6698_s20 }
 0xc28   :  { %v1303_v48 = vpop.permute.xlu1 %1302 }
 0xc29   :  { %v1305_v49 = vmul.f32 %v6488_v47, %v1303_v48 }
 0xc2b   :  { %1307 = vrot.lane.b32.xlu1 %v1305_v49, %s6698_s20 }
 0xc99   :  { %v1186_v52 = vpop.permute.xlu1 %1185 }
 0xc9a   :  { %v1188_v53 = vadd.f32 %v1186_v52, %v1178_v51  ;;  %v7213_v51 = vld [vmem:[%s8209_s1 + $0x18] sm:$0xff]  ;;  %v7219_v52 = vld [vmem:[%s8210_s0 + $0xa] sm:$0x3] }
 0xc9b   :  { %vm1794_vm7 = vcmp.gt.f32.partialorder %v7219_v52, 0.5 }
 0xc9c   :  { %6489 = vtanh.f32 %v1188_v53 }
 0xc9d   :  { %v1308_v56 = vpop.permute.xlu1 %1307 }
 0xc9e   :  { %v1310_v57 = vadd.f32 %v1308_v56, %v1300_v55  ;;  %v7227_v55 = vld [vmem:[%s8209_s1 + $0x10] sm:$0xff] }
 0xca0   :  { %6491 = vtanh.f32 %v1310_v57 }
 0xca9   :  { %v6490_v58 = vpop.eup %6489 }
 0xcaa   :  { %1191 = vrot.lane.b32.xlu0 %v6490_v58, %s6697_s19  ;;  %v7249_v58 = vld [vmem:[%s8209_s1 + $0x58] sm:$0xff] }
 0xcad   :  { %v6492_v59 = vpop.eup %6491 }
 0xcae   :  { %1313 = vrot.lane.b32.xlu1 %v6492_v59, %s6697_s19 }
 0xd1c   :  { %v1192_v60 = vpop.permute.xlu0 %1191 }
 0xd1d   :  { %v1194_v61 = vmul.f32 %v6486_v44, %v1192_v60 }
 0xd1f   :  { %1205 = vrot.lane.b32.xlu0 %v1194_v61, %s6698_s20  ;;  %v7262_v61 = vld [vmem:[%s8209_s1] sm:$0xff] }
 0xd20   :  { %v1314_v62 = vpop.permute.xlu1 %1313 }
 0xd21   :  { %v1316_v63 = vmul.f32 %v6488_v47, %v1314_v62 }
 0xd23   :  { %1210 = vrot.lane.b32.xlu0 %v1188_v53, %s6699_s9  ;;  %1391 = vrot.lane.b32.xlu1 %v1316_v63, %s6698_s20  ;;  %v7273_v63 = vld [vmem:[%s8209_s1 + $0x50] sm:$0xff] }
 0xd27   :  { %1499 = vrot.lane.b32.xlu0 %v1310_v57, %s6699_s9  ;;  %v7243_v57 = vld [vmem:[%s8209_s1 + $0x8] sm:$0xff] }
 0xd91   :  { %v1206_v5 = vpop.permute.xlu0 %1205 }
 0xd92   :  { %v7127_v6 = vsel %vm1196_vm5, %v1206_v5, %v7048_v9  ;;  %v7285_v5 = vld [vmem:[%s8209_s1 + $0x48] sm:$0xff] }
 0xd93   :  { %5943 = vmatmul.mubr.msk.f32.vlgmr.msra.gmra.mxu1 %vm25_vm2, %v7127_v6 }
 0xd94   :  { %5957 = vmatpush3.msra.mxu1 %v6723_v1  ;;  %5964 = vmatprep.mubr.msk.f32.mxu1 %vm6696_vm0, %v6695_v0 }
 0xd95   :  { %5958 = vmatprep.subr.mxu1 %v6695_v0  ;;  %v1211_v8 = vpop.permute.xlu0 %1210  ;;  %v1392_v11 = vpop.permute.xlu1 %1391 }
 0xd96   :  { %5959 = vmatpush3.msra.mxu1 %v6728_v2  ;;  %5954 = vmatmul.mubr.msk.f32.vlgmr.msra.gmra.mxu0 %vm25_vm2, %v1392_v11  ;;  %v7145_v1 = vsel %vm1196_vm5, %v1211_v8, %v7066_v12  ;;  %v7158_v9 = vsel %vm1495_vm6, %v1392_v11, %v7079_v13  ;;  %v7305_v8 = vld [vmem:[%s8209_s1 + $0x30] sm:$0xff]  ;;  %v7315_v11 = vld [vmem:[%s8209_s1 + $0x28] sm:$0xff] }
 0xd97   :  { %5960 = vmatprep.subr.mxu1 %v6695_v0  ;;  %1474 = vrot.lane.b32.xlu0 %v7145_v1, %s6698_s20 }
 0xd98   :  { %5961 = vmatpush3.msra.mxu1 %v6738_v3  ;;  %5968 = vmatpush3.msra.mxu0 %v6764_v19 }
 0xd99   :  { %5962 = vmatprep.subr.mxu1 %v6695_v0  ;;  %v1500_v2 = vpop.permute.xlu0 %1499  ;;  %5969 = vmatprep.subr.mxu0 %v6695_v0 }
 0xd9a   :  { %5963 = vmatpush3.msra.mxu1 %v6747_v4  ;;  %v7164_v10 = vsel %vm1495_vm6, %v1500_v2, %v7085_v15  ;;  %5970 = vmatpush3.msra.mxu0 %v6769_v20 }
 0xd9b   :  { %5965 = vmatmul.mubr.msk.f32.vlgmr.msra.gmra.mxu1 %vm25_vm2, %v7158_v9  ;;  %1596 = vrot.lane.b32.xlu0 %v7164_v10, %s6698_s20 }
 0xd9c   :  { %5971 = vmatprep.subr.mxu0 %v6695_v0  ;;  %5978 = vmatprep.subr.mxu1 %v6695_v0 }
 0xd9d   :  { %5972 = vmatpush3.msra.mxu0 %v6786_v23  ;;  %5979 = vmatpush3.msra.mxu1 %v6775_v21  ;;  %v1513_v23 = vld [vmem:[%s8210_s0 + $0x1a] sm:$0x3] }
 0xd9e   :  { %5973 = vmatprep.subr.mxu0 %v6695_v0  ;;  %5980 = vmatprep.subr.mxu1 %v6695_v0 }
 0xd9f   :  { %5974 = vmatpush3.msra.mxu0 %v6800_v25  ;;  %5981 = vmatpush3.msra.mxu1 %v6780_v22 }
 0xda0   :  { %5975 = vmatprep.mubr.msk.f32.mxu0 %vm6696_vm0, %v6695_v0  ;;  %5982 = vmatprep.subr.mxu1 %v6695_v0 }
 0xda1   :  { %5989 = vmatprep.subr.mxu0 %v6695_v0  ;;  %5983 = vmatpush3.msra.mxu1 %v6794_v24 }
 0xda2   :  { %5984 = vmatprep.subr.mxu1 %v6695_v0  ;;  %5986 = vmatprep.mubr.msk.f32.mxu1 %vm6696_vm0, %v6695_v0 }
 0xda3   :  { %5985 = vmatpush3.msra.mxu1 %v6812_v27 }
 0xda4   :  { %6000 = vmatprep.subr.mxu1 %v6695_v0 }
 0xe09   :  { %v1475_v34 = vpop.permute.xlu0 %1474 }
 0xe0d   :  { %v1597_v39 = vpop.permute.xlu0 %1596 }
 0xe53   :  { %v1386_v3 = vpop.f32.mrf.mxu1 }
 0xe55   :  { %v5944_v4 = vpop.f32.mrf.mxu1 }
 0xe56   :  { %v1461_v19 = vpop.f32.mrf.mxu0 }
 0xe57   :  { %v1462_v20 = vadd.f32 %v1461_v19, %v1386_v3 }
 0xe58   :  { %v5955_v21 = vpop.f32.mrf.mxu0 }
 0xe59   :  { %v1465_v22 = vadd.f32 %v6867_v35, %v1462_v20  ;;  %v1812_v20 = vld [vmem:[%s8210_s0 + $0x1c] sm:$0x3] }
 0xe5b   :  { %6493 = vtanh.f32 %v1465_v22  ;;  %v1583_v24 = vpop.f32.mrf.mxu1  ;;  %v5436_v17 = vmul.f32 -1.442695, %v1465_v22 }
 0xe5c   :  { %v1587_v25 = vadd.f32 %v1583_v24, %v1513_v23 }
 0xe5d   :  { %v5966_v14 = vpop.f32.mrf.mxu1 }
 0xe5e   :  { %6495 = vtanh.f32 %v1587_v25  ;;  %v5438_v13 = vmul.f32 -1.442695, %v1587_v25 }
 0xe5f   :  { %6497 = vpow2.f32 %v5436_v17 }
 0xe60   :  { %6499 = vpow2.f32 %v5438_v13 }
 0xe68   :  { %v6494_v12 = vpop.eup %6493 }
 0xe69   :  { %1479 = vrot.lane.b32.xlu1 %v6494_v12, %s6697_s19 }
 0xe6b   :  { %v6496_v27 = vpop.eup %6495 }
 0xe6c   :  { %v6498_v15 = vpop.eup %6497 }
 0xe6d   :  { %1601 = vrot.lane.b32.xlu1 %v6496_v27, %s6697_s19  ;;  %v1469_v18 = vadd.f32 1.0, %v6498_v15  ;;  %v6500_v16 = vpop.eup %6499 }
 0xe6e   :  { %v1591_v26 = vadd.f32 1.0, %v6500_v16 }
 0xe6f   :  { %6501 = vrcp.f32 %v1469_v18 }
 0xe70   :  { %6503 = vrcp.f32 %v1591_v26 }
 0xe7c   :  { %v6502_v28 = vpop.eup %6501 }
 0xe7d   :  { %v6504_v31 = vpop.eup %6503  ;;  %v1477_v36 = vmul.f32 %v6502_v28, %v1475_v34 }
 0xe7e   :  { %v1599_v40 = vmul.f32 %v6504_v31, %v1597_v39 }
 0xedb   :  { %v1480_v29 = vpop.permute.xlu1 %1479 }
 0xedc   :  { %v1482_v30 = vmul.f32 %v6502_v28, %v1480_v29 }
 0xede   :  { %1484 = vrot.lane.b32.xlu1 %v1482_v30, %s6698_s20 }
 0xedf   :  { %v1602_v32 = vpop.permute.xlu1 %1601 }
 0xee0   :  { %v1604_v33 = vmul.f32 %v6504_v31, %v1602_v32 }
 0xee2   :  { %1606 = vrot.lane.b32.xlu1 %v1604_v33, %s6698_s20 }
 0xf50   :  { %v1485_v37 = vpop.permute.xlu1 %1484 }
 0xf51   :  { %v1487_v38 = vadd.f32 %v1485_v37, %v1477_v36 }
 0xf53   :  { %6505 = vtanh.f32 %v1487_v38 }
 0xf54   :  { %v1607_v41 = vpop.permute.xlu1 %1606 }
 0xf55   :  { %v1609_v42 = vadd.f32 %v1607_v41, %v1599_v40 }
 0xf57   :  { %6507 = vtanh.f32 %v1609_v42 }
 0xf60   :  { %v6506_v43 = vpop.eup %6505 }
 0xf61   :  { %1490 = vrot.lane.b32.xlu0 %v6506_v43, %s6697_s19 }
 0xf64   :  { %v6508_v44 = vpop.eup %6507 }
 0xf65   :  { %1612 = vrot.lane.b32.xlu1 %v6508_v44, %s6697_s19 }
 0xfd3   :  { %v1491_v45 = vpop.permute.xlu0 %1490 }
 0xfd4   :  { %v1493_v46 = vmul.f32 %v6502_v28, %v1491_v45 }
 0xfd6   :  { %1504 = vrot.lane.b32.xlu0 %v1493_v46, %s6698_s20 }
 0xfd7   :  { %v1613_v47 = vpop.permute.xlu1 %1612 }
 0xfd8   :  { %v1615_v48 = vmul.f32 %v6504_v31, %v1613_v47  ;;  %v7353_v47 = vld [vmem:[%s8210_s0 + $0xc] sm:$0x3] }
 0xfd9   :  { %vm2093_vm8 = vcmp.gt.f32.partialorder %v7353_v47, 0.5 }
 0xfda   :  { %1690 = vrot.lane.b32.xlu1 %v1615_v48, %s6698_s20  ;;  %1509 = vrot.lane.b32.xlu0 %v1487_v38, %s6699_s9 }
 0xfde   :  { %1798 = vrot.lane.b32.xlu0 %v1609_v42, %s6699_s9 }
0x1048   :  { %v1505_v49 = vpop.permute.xlu0 %1504 }
0x1049   :  { %v7206_v50 = vsel %vm1495_vm6, %v1505_v49, %v7127_v6  ;;  %v7291_v6 = vld [vmem:[%s8209_s1 + $0x38] sm:$0xff] }
0x104a   :  { %5976 = vmatmul.mubr.msk.f32.vlgmr.msra.gmra.mxu0 %vm25_vm2, %v7206_v50 }
0x104b   :  { %5990 = vmatpush3.msra.mxu0 %v7213_v51  ;;  %5997 = vmatprep.mubr.msk.f32.mxu0 %vm6696_vm0, %v6695_v0 }
0x104c   :  { %5991 = vmatprep.subr.mxu0 %v6695_v0  ;;  %v1691_v53 = vpop.permute.xlu1 %1690  ;;  %v1510_v54 = vpop.permute.xlu0 %1509 }
0x104d   :  { %5992 = vmatpush3.msra.mxu0 %v7227_v55  ;;  %5987 = vmatmul.mubr.msk.f32.vlgmr.msra.gmra.mxu1 %vm25_vm2, %v1691_v53  ;;  %v7234_v56 = vsel %vm1495_vm6, %v1510_v54, %v7145_v1  ;;  %v7257_v60 = vsel %vm1794_vm7, %v1691_v53, %v7158_v9  ;;  %v7324_v1 = vld [vmem:[%s8209_s1 + $0x20] sm:$0xff] }
0x104e   :  { %5993 = vmatprep.subr.mxu0 %v6695_v0  ;;  %1773 = vrot.lane.b32.xlu0 %v7234_v56, %s6698_s20 }
0x104f   :  { %5994 = vmatpush3.msra.mxu0 %v7243_v57  ;;  %6001 = vmatpush3.msra.mxu1 %v7249_v58 }
0x1050   :  { %5995 = vmatprep.subr.mxu0 %v6695_v0  ;;  %v1799_v59 = vpop.permute.xlu0 %1798  ;;  %6002 = vmatprep.subr.mxu1 %v6695_v0 }
0x1051   :  { %5996 = vmatpush3.msra.mxu0 %v7262_v61  ;;  %v7268_v62 = vsel %vm1794_vm7, %v1799_v59, %v7164_v10  ;;  %6003 = vmatpush3.msra.mxu1 %v7273_v63  ;;  %v7410_v59 = vld [vmem:[%s8209_s1 + $0x60] ss:$0 sm:$0xff] }
0x1052   :  { %5998 = vmatmul.mubr.msk.f32.vlgmr.msra.gmra.mxu0 %vm25_vm2, %v7257_v60  ;;  %1895 = vrot.lane.b32.xlu0 %v7268_v62, %s6698_s20 }
0x1053   :  { %6004 = vmatprep.subr.mxu1 %v6695_v0  ;;  %6011 = vmatprep.subr.mxu0 %v6695_v0 }
0x1054   :  { %6005 = vmatpush3.msra.mxu1 %v7285_v5  ;;  %6012 = vmatpush3.msra.mxu0 %v7291_v6 }
0x1055   :  { %6006 = vmatprep.subr.mxu1 %v6695_v0  ;;  %6013 = vmatprep.subr.mxu0 %v6695_v0 }
0x1056   :  { %6007 = vmatpush3.msra.mxu1 %v7299_v7  ;;  %6014 = vmatpush3.msra.mxu0 %v7305_v8 }
0x1057   :  { %6008 = vmatprep.mubr.msk.f32.mxu1 %vm6696_vm0, %v6695_v0  ;;  %6015 = vmatprep.subr.mxu0 %v6695_v0 }
0x1058   :  { %6022 = vmatprep.subr.mxu1 %v6695_v0  ;;  %6016 = vmatpush3.msra.mxu0 %v7315_v11 }
0x1059   :  { %6017 = vmatprep.subr.mxu0 %v6695_v0  ;;  %6019 = vmatprep.mubr.msk.f32.mxu0 %vm6696_vm0, %v6695_v0 }
0x105a   :  { %6018 = vmatpush3.msra.mxu0 %v7324_v1 }
0x105b   :  { %6033 = vmatprep.subr.mxu0 %v6695_v0 }
0x10c0   :  { %v1774_v30 = vpop.permute.xlu0 %1773 }
0x10c4   :  { %v1896_v34 = vpop.permute.xlu0 %1895 }
0x110a   :  { %v1685_v2 = vpop.f32.mrf.mxu0 }
0x110c   :  { %v5977_v9 = vpop.f32.mrf.mxu0 }
0x110d   :  { %v1760_v10 = vpop.f32.mrf.mxu1 }
0x110e   :  { %v1761_v3 = vadd.f32 %v1760_v10, %v1685_v2 }
0x110f   :  { %v5988_v4 = vpop.f32.mrf.mxu1 }
0x1110   :  { %v1764_v19 = vadd.f32 %v6867_v35, %v1761_v3 }
0x1112   :  { %6509 = vtanh.f32 %v1764_v19  ;;  %v1882_v21 = vpop.f32.mrf.mxu0  ;;  %v5441_v14 = vmul.f32 -1.442695, %v1764_v19 }
0x1113   :  { %v1886_v22 = vadd.f32 %v1882_v21, %v1812_v20 }
0x1114   :  { %v5999_v23 = vpop.f32.mrf.mxu0 }
0x1115   :  { %6511 = vtanh.f32 %v1886_v22  ;;  %v5443_v12 = vmul.f32 -1.442695, %v1886_v22 }
0x1116   :  { %6513 = vpow2.f32 %v5441_v14 }
0x1117   :  { %6515 = vpow2.f32 %v5443_v12 }
0x111f   :  { %v6510_v24 = vpop.eup %6509 }
0x1120   :  { %1778 = vrot.lane.b32.xlu1 %v6510_v24, %s6697_s19 }
0x1122   :  { %v6512_v25 = vpop.eup %6511 }
0x1123   :  { %v6514_v35 = vpop.eup %6513 }
0x1124   :  { %1900 = vrot.lane.b32.xlu1 %v6512_v25, %s6697_s19  ;;  %v1768_v27 = vadd.f32 1.0, %v6514_v35  ;;  %v6516_v17 = vpop.eup %6515 }
0x1125   :  { %v1890_v13 = vadd.f32 1.0, %v6516_v17 }
0x1126   :  { %6517 = vrcp.f32 %v1768_v27 }
0x1127   :  { %6519 = vrcp.f32 %v1890_v13 }
0x1133   :  { %v6518_v15 = vpop.eup %6517 }
0x1134   :  { %v6520_v26 = vpop.eup %6519  ;;  %v1776_v31 = vmul.f32 %v6518_v15, %v1774_v30  ;;  %v7429_v30 = vld [vmem:[%s8209_s1 + $0x90] sm:$0xff] }
0x1135   :  { %v1898_v36 = vmul.f32 %v6520_v26, %v1896_v34  ;;  %v7452_v34 = vld [vmem:[%s8209_s1 + $0x70] sm:$0xff] }
0x1192   :  { %v1779_v18 = vpop.permute.xlu1 %1778 }
0x1193   :  { %v1781_v16 = vmul.f32 %v6518_v15, %v1779_v18 }
0x1195   :  { %1783 = vrot.lane.b32.xlu1 %v1781_v16, %s6698_s20 }
0x1196   :  { %v1901_v28 = vpop.permute.xlu1 %1900 }
0x1197   :  { %v1903_v29 = vmul.f32 %v6520_v26, %v1901_v28 }
0x1199   :  { %1905 = vrot.lane.b32.xlu1 %v1903_v29, %s6698_s20 }
0x1207   :  { %v1784_v32 = vpop.permute.xlu1 %1783 }
0x1208   :  { %v1786_v33 = vadd.f32 %v1784_v32, %v1776_v31  ;;  %v7441_v32 = vld [vmem:[%s8209_s1 + $0x88] sm:$0xff] }
0x120a   :  { %6521 = vtanh.f32 %v1786_v33 }
0x120b   :  { %v1906_v37 = vpop.permute.xlu1 %1905 }
0x120c   :  { %v1908_v38 = vadd.f32 %v1906_v37, %v1898_v36 }
0x120e   :  { %6523 = vtanh.f32 %v1908_v38 }
0x1217   :  { %v6522_v39 = vpop.eup %6521 }
0x1218   :  { %1789 = vrot.lane.b32.xlu0 %v6522_v39, %s6697_s19 }
0x121b   :  { %v6524_v40 = vpop.eup %6523 }
0x121c   :  { %1911 = vrot.lane.b32.xlu1 %v6524_v40, %s6697_s19  ;;  %v7475_v40 = vld [vmem:[%s8209_s1 + $0x68] sm:$0xff] }
0x128a   :  { %v1790_v41 = vpop.permute.xlu0 %1789 }
0x128b   :  { %v1792_v42 = vmul.f32 %v6518_v15, %v1790_v41  ;;  %v7480_v41 = vld [vmem:[%s8209_s1 + $0x78] sm:$0xff] }
0x128d   :  { %1803 = vrot.lane.b32.xlu0 %v1792_v42, %s6698_s20  ;;  %v2431_v42 = vld [vmem:[%s8210_s0 + $0x20] sm:$0x3] }
0x128e   :  { %v1912_v43 = vpop.permute.xlu1 %1911 }
0x128f   :  { %v1914_v44 = vmul.f32 %v6520_v26, %v1912_v43 }
0x1291   :  { %1808 = vrot.lane.b32.xlu0 %v1786_v33, %s6699_s9  ;;  %1989 = vrot.lane.b32.xlu1 %v1914_v44, %s6698_s20  ;;  %v7447_v33 = vld [vmem:[%s8210_s0 + $0xe] sm:$0x3] }
0x1292   :  { %vm2392_vm9 = vcmp.gt.f32.partialorder %v7447_v33, 0.5 }
0x1295   :  { %2097 = vrot.lane.b32.xlu0 %v1908_v38, %s6699_s9  ;;  %v7460_v38 = vld [vmem:[%s8209_s1 + $0x80] sm:$0xff] }
0x12ff   :  { %v1804_v45 = vpop.permute.xlu0 %1803 }
0x1300   :  { %v7345_v46 = vsel %vm1794_vm7, %v1804_v45, %v7206_v50 }
0x1301   :  { %6009 = vmatmul.mubr.msk.f32.vlgmr.msra.gmra.mxu1 %vm25_vm2, %v7345_v46 }
0x1302   :  { %6023 = vmatpush3.msra.mxu1 %v7213_v51  ;;  %6030 = vmatprep.mubr.msk.f32.mxu1 %vm6696_vm0, %v6695_v0 }
0x1303   :  { %6024 = vmatprep.subr.mxu1 %v6695_v0  ;;  %v1809_v48 = vpop.permute.xlu0 %1808  ;;  %v1990_v49 = vpop.permute.xlu1 %1989 }
0x1304   :  { %6025 = vmatpush3.msra.mxu1 %v7227_v55  ;;  %6020 = vmatmul.mubr.msk.f32.vlgmr.msra.gmra.mxu0 %vm25_vm2, %v1990_v49  ;;  %v7363_v50 = vsel %vm1794_vm7, %v1809_v48, %v7234_v56  ;;  %v7376_v52 = vsel %vm2093_vm8, %v1990_v49, %v7257_v60 }
0x1305   :  { %6026 = vmatprep.subr.mxu1 %v6695_v0  ;;  %2072 = vrot.lane.b32.xlu0 %v7363_v50, %s6698_s20 }
0x1306   :  { %6027 = vmatpush3.msra.mxu1 %v7243_v57  ;;  %6034 = vmatpush3.msra.mxu0 %v7249_v58 }
0x1307   :  { %6028 = vmatprep.subr.mxu1 %v6695_v0  ;;  %v2098_v51 = vpop.permute.xlu0 %2097  ;;  %6035 = vmatprep.subr.mxu0 %v6695_v0 }
0x1308   :  { %6029 = vmatpush3.msra.mxu1 %v7262_v61  ;;  %v7382_v53 = vsel %vm2093_vm8, %v2098_v51, %v7268_v62  ;;  %6036 = vmatpush3.msra.mxu0 %v7273_v63  ;;  %v2111_v61 = vld [vmem:[%s8210_s0 + $0x1e] sm:$0x3]  ;;  %v7509_v51 = vld [vmem:[%s8209_s1 + $0x98] ss:$0 sm:$0xff] }
0x1309   :  { %6031 = vmatmul.mubr.msk.f32.vlgmr.msra.gmra.mxu1 %vm25_vm2, %v7376_v52  ;;  %2194 = vrot.lane.b32.xlu0 %v7382_v53, %s6698_s20 }
0x130a   :  { %6044 = vmatprep.subr.mxu1 %v6695_v0  ;;  %6037 = vmatprep.subr.mxu0 %v6695_v0 }
0x130b   :  { %6045 = vmatpush3.msra.mxu1 %v7291_v6  ;;  %6038 = vmatpush3.msra.mxu0 %v7285_v5 }
0x130c   :  { %6046 = vmatprep.subr.mxu1 %v6695_v0  ;;  %6039 = vmatprep.subr.mxu0 %v6695_v0 }
0x130d   :  { %6047 = vmatpush3.msra.mxu1 %v7305_v8  ;;  %6040 = vmatpush3.msra.mxu0 %v7299_v7 }
0x130e   :  { %6048 = vmatprep.subr.mxu1 %v6695_v0  ;;  %6041 = vmatprep.mubr.msk.f32.mxu0 %vm6696_vm0, %v6695_v0 }
0x130f   :  { %6049 = vmatpush3.msra.mxu1 %v7315_v11  ;;  %6055 = vmatprep.subr.mxu0 %v6695_v0 }
0x1310   :  { %6050 = vmatprep.subr.mxu1 %v6695_v0  ;;  %6052 = vmatprep.mubr.msk.f32.mxu1 %vm6696_vm0, %v6695_v0 }
0x1311   :  { %6051 = vmatpush3.msra.mxu1 %v7324_v1 }
0x1312   :  { %6066 = vmatprep.subr.mxu1 %v6695_v0 }
0x1377   :  { %v2073_v23 = vpop.permute.xlu0 %2072 }
0x137b   :  { %v2195_v12 = vpop.permute.xlu0 %2194 }
0x13c1   :  { %v1984_v54 = vpop.f32.mrf.mxu1 }
0x13c3   :  { %v6010_v55 = vpop.f32.mrf.mxu1 }
0x13c4   :  { %v2059_v56 = vpop.f32.mrf.mxu0 }
0x13c5   :  { %v2060_v57 = vadd.f32 %v2059_v56, %v1984_v54 }
0x13c6   :  { %v6021_v58 = vpop.f32.mrf.mxu0 }
0x13c7   :  { %v2063_v60 = vadd.f32 %v7410_v59, %v2060_v57 }
0x13c9   :  { %6525 = vtanh.f32 %v2063_v60  ;;  %v2181_v62 = vpop.f32.mrf.mxu1  ;;  %v5446_v8 = vmul.f32 -1.442695, %v2063_v60 }
0x13ca   :  { %v2185_v63 = vadd.f32 %v2181_v62, %v2111_v61 }
0x13cb   :  { %v6032_v5 = vpop.f32.mrf.mxu1 }
0x13cc   :  { %6527 = vtanh.f32 %v2185_v63  ;;  %v5448_v11 = vmul.f32 -1.442695, %v2185_v63 }
0x13cd   :  { %6529 = vpow2.f32 %v5446_v8 }
0x13ce   :  { %6531 = vpow2.f32 %v5448_v11 }
0x13d6   :  { %v6526_v6 = vpop.eup %6525 }
0x13d7   :  { %2077 = vrot.lane.b32.xlu1 %v6526_v6, %s6697_s19 }
0x13d9   :  { %v6528_v7 = vpop.eup %6527 }
0x13da   :  { %v6530_v1 = vpop.eup %6529 }
0x13db   :  { %2199 = vrot.lane.b32.xlu1 %v6528_v7, %s6697_s19  ;;  %v2067_v2 = vadd.f32 1.0, %v6530_v1  ;;  %v6532_v9 = vpop.eup %6531 }
0x13dc   :  { %v2189_v10 = vadd.f32 1.0, %v6532_v9 }
0x13dd   :  { %6533 = vrcp.f32 %v2067_v2 }
0x13de   :  { %6535 = vrcp.f32 %v2189_v10 }
0x13ea   :  { %v6534_v3 = vpop.eup %6533 }
0x13eb   :  { %v6536_v20 = vpop.eup %6535  ;;  %v2075_v24 = vmul.f32 %v6534_v3, %v2073_v23 }
0x13ec   :  { %v2197_v35 = vmul.f32 %v6536_v20, %v2195_v12  ;;  %v7536_v12 = vld [vmem:[%s8209_s1 + $0xb8] sm:$0xff] }
0x1449   :  { %v2078_v4 = vpop.permute.xlu1 %2077 }
0x144a   :  { %v2080_v19 = vmul.f32 %v6534_v3, %v2078_v4 }
0x144c   :  { %2082 = vrot.lane.b32.xlu1 %v2080_v19, %s6698_s20 }
0x144d   :  { %v2200_v21 = vpop.permute.xlu1 %2199 }
0x144e   :  { %v2202_v22 = vmul.f32 %v6536_v20, %v2200_v21 }
0x1450   :  { %2204 = vrot.lane.b32.xlu1 %v2202_v22, %s6698_s20 }
0x14be   :  { %v2083_v25 = vpop.permute.xlu1 %2082 }
0x14bf   :  { %v2085_v14 = vadd.f32 %v2083_v25, %v2075_v24  ;;  %v7526_v25 = vld [vmem:[%s8209_s1 + $0xd8] sm:$0xff] }
0x14c1   :  { %6537 = vtanh.f32 %v2085_v14 }
0x14c2   :  { %v2205_v27 = vpop.permute.xlu1 %2204 }
0x14c3   :  { %v2207_v17 = vadd.f32 %v2205_v27, %v2197_v35  ;;  %v7543_v35 = vld [vmem:[%s8209_s1 + $0xb0] sm:$0xff]  ;;  %v7550_v27 = vld [vmem:[%s8209_s1 + $0xc8] sm:$0xff] }
0x14c5   :  { %6539 = vtanh.f32 %v2207_v17 }
0x14ce   :  { %v6538_v13 = vpop.eup %6537 }
0x14cf   :  { %2088 = vrot.lane.b32.xlu0 %v6538_v13, %s6697_s19 }
0x14d2   :  { %v6540_v15 = vpop.eup %6539 }
0x14d3   :  { %2210 = vrot.lane.b32.xlu1 %v6540_v15, %s6697_s19  ;;  %v7563_v15 = vld [vmem:[%s8209_s1 + $0xc0] sm:$0xff] }
0x1541   :  { %v2089_v18 = vpop.permute.xlu0 %2088 }
0x1542   :  { %v2091_v16 = vmul.f32 %v6534_v3, %v2089_v18  ;;  %v7568_v18 = vld [vmem:[%s8209_s1 + $0xa8] sm:$0xff] }
0x1544   :  { %2102 = vrot.lane.b32.xlu0 %v2091_v16, %s6698_s20  ;;  %v7575_v16 = vld [vmem:[%s8209_s1 + $0xa0] sm:$0xff] }
0x1545   :  { %v2211_v26 = vpop.permute.xlu1 %2210 }
0x1546   :  { %v2213_v28 = vmul.f32 %v6536_v20, %v2211_v26 }
0x1548   :  { %2288 = vrot.lane.b32.xlu1 %v2213_v28, %s6698_s20  ;;  %2107 = vrot.lane.b32.xlu0 %v2085_v14, %s6699_s9  ;;  %v7531_v14 = vld [vmem:[%s8209_s1 + $0xd0] sm:$0xff] }
0x154c   :  { %2396 = vrot.lane.b32.xlu0 %v2207_v17, %s6699_s9 }
0x15b6   :  { %v2103_v29 = vpop.permute.xlu0 %2102 }
0x15b7   :  { %v7434_v31 = vsel %vm2093_vm8, %v2103_v29, %v7345_v46 }
0x15b8   :  { %6042 = vmatmul.mubr.msk.f32.vlgmr.msra.gmra.mxu0 %vm25_vm2, %v7434_v31 }
0x15b9   :  { %6056 = vmatpush3.msra.mxu0 %v7429_v30  ;;  %6063 = vmatprep.mubr.msk.f32.mxu0 %vm6696_vm0, %v6695_v0 }
0x15ba   :  { %6057 = vmatprep.subr.mxu0 %v6695_v0  ;;  %v2289_v36 = vpop.permute.xlu1 %2288  ;;  %v2108_v37 = vpop.permute.xlu0 %2107 }
0x15bb   :  { %6058 = vmatpush3.msra.mxu0 %v7441_v32  ;;  %6053 = vmatmul.mubr.msk.f32.vlgmr.msra.gmra.mxu1 %vm25_vm2, %v2289_v36  ;;  %v7467_v39 = vsel %vm2093_vm8, %v2108_v37, %v7363_v50  ;;  %v2394_v43 = vsel %vm2392_vm9, %v2289_v36, %v7376_v52 }
0x15bc   :  { %6059 = vmatprep.subr.mxu0 %v6695_v0  ;;  %6067 = vmatpush3.msra.mxu1 %v7452_v34 }
0x15bd   :  { %6060 = vmatpush3.msra.mxu0 %v7460_v38  ;;  %6068 = vmatprep.subr.mxu1 %v6695_v0 }
0x15be   :  { %2371 = vrot.lane.b32.xlu0 %v7467_v39, %s6698_s20  ;;  %6061 = vmatprep.subr.mxu0 %v6695_v0  ;;  %v2397_v61 = vpop.permute.xlu0 %2396 }
0x15bf   :  { %6069 = vmatpush3.msra.mxu1 %v7475_v40  ;;  %6062 = vmatpush3.msra.mxu0 %v7480_v41 }
0x15c0   :  { %6070 = vmatprep.mubr.msk.f32.mxu1 %vm6696_vm0, %v6695_v0  ;;  %6064 = vmatmul.mubr.msk.f32.vlgmr.msra.gmra.mxu0 %vm25_vm2, %v2394_v43 }
0x15c1   :  { %6071 = vmatmul.mubr.msk.f32.vlgmr.msra.gmra.mxu1 %vm2505_vm10, %v2431_v42  ;;  %6073 = vmatprep.subr.mxu1 %v6695_v0 }
0x15c2   :  { %6084 = vmatprep.subr.mxu0 %v6695_v0  ;;  %6081 = vmatprep.mubr.msk.f32.mxu1 %vm6696_vm0, %v6695_v0 }
0x15c3   :  { %6092 = vmatprep.mubr.msk.f32.mxu0 %vm6696_vm0, %v6695_v0  ;;  %6074 = vmatpush3.msra.mxu1 %v7526_v25 }
0x15c4   :  { %6085 = vmatpush3.msra.mxu0 %v7536_v12  ;;  %6075 = vmatprep.subr.mxu1 %v6695_v0 }
0x15c5   :  { %6086 = vmatprep.subr.mxu0 %v6695_v0  ;;  %6076 = vmatpush3.msra.mxu1 %v7531_v14 }
0x15c6   :  { %6087 = vmatpush3.msra.mxu0 %v7543_v35  ;;  %6077 = vmatprep.subr.mxu1 %v6695_v0 }
0x15c7   :  { %6088 = vmatprep.subr.mxu0 %v6695_v0  ;;  %6078 = vmatpush3.msra.mxu1 %v7550_v27 }
0x15c8   :  { %6079 = vmatprep.subr.mxu1 %v6695_v0  ;;  %6089 = vmatpush3.msra.mxu0 %v7568_v18 }
0x15c9   :  { %6080 = vmatpush3.msra.mxu1 %v7563_v15  ;;  %6090 = vmatprep.subr.mxu0 %v6695_v0 }
0x15ca   :  { %6095 = vmatprep.subr.mxu1 %v6695_v0  ;;  %6091 = vmatpush3.msra.mxu0 %v7575_v16 }
0x15cb   :  { %6106 = vmatprep.subr.mxu0 %v6695_v0 }
0x1630   :  { %v2372_v3 = vpop.permute.xlu0 %2371 }
0x1678   :  { %v2283_v44 = vpop.f32.mrf.mxu0 }
0x167a   :  { %v6043_v45 = vpop.f32.mrf.mxu0 }
0x167b   :  { %v2358_v46 = vpop.f32.mrf.mxu1 }
0x167c   :  { %v2359_v47 = vadd.f32 %v2358_v46, %v2283_v44 }
0x167d   :  { %v6054_v48 = vpop.f32.mrf.mxu1 }
0x167e   :  { %v2362_v49 = vadd.f32 %v7410_v59, %v2359_v47  ;;  %v2399_v59 = vsel %vm2392_vm9, %v2397_v61, %v7382_v53 }
0x1680   :  { %6541 = vtanh.f32 %v2362_v49  ;;  %v2501_v50 = vpop.f32.mrf.mxu0  ;;  %v5451_v62 = vmul.f32 -1.442695, %v2362_v49 }
0x1681   :  { %v2575_v52 = vpop.f32.mrf.mxu1 }
0x1682   :  { %v2576_v54 = vadd.f32 %v2575_v52, %v2501_v50  ;;  %v6065_v55 = vpop.f32.mrf.mxu0 }
0x1683   :  { %v6072_v56 = vpop.f32.mrf.mxu1 }
0x1684   :  { %v2583_v57 = vadd.f32 %v7509_v51, %v2576_v54 }
0x1686   :  { %6543 = vtanh.f32 %v2583_v57  ;;  %v5455_v63 = vmul.f32 -1.442695, %v2583_v57 }
0x1687   :  { %6545 = vpow2.f32 %v5451_v62 }
0x1688   :  { %6547 = vpow2.f32 %v5455_v63 }
0x168d   :  { %v6542_v58 = vpop.eup %6541 }
0x168e   :  { %2376 = vrot.lane.b32.xlu1 %v6542_v58, %s6697_s19 }
0x1693   :  { %v6544_v60 = vpop.eup %6543 }
0x1694   :  { %2597 = vrot.lane.b32.xlu1 %v6544_v60, %s6697_s19  ;;  %v6546_v5 = vpop.eup %6545 }
0x1695   :  { %v2366_v6 = vadd.f32 1.0, %v6546_v5  ;;  %v6548_v7 = vpop.eup %6547 }
0x1696   :  { %v2587_v8 = vadd.f32 1.0, %v6548_v7  ;;  %v7637_v7 = vld [vmem:[%s8209_s1 + $0xf8] sm:$0xff] }
0x1697   :  { %6549 = vrcp.f32 %v2366_v6  ;;  %v7632_v6 = vld [vmem:[%s8209_s1 + $0x100] sm:$0xff] }
0x1698   :  { %2592 = vrot.lane.b32.xlu1 %v2399_v59, %s6698_s20  ;;  %6551 = vrcp.f32 %v2587_v8  ;;  %v7644_v8 = vld [vmem:[%s8209_s1 + $0xf0] sm:$0xff] }
0x16a4   :  { %v6550_v11 = vpop.eup %6549 }
0x16a5   :  { %v6552_v9 = vpop.eup %6551  ;;  %v2374_v4 = vmul.f32 %v6550_v11, %v2372_v3 }
0x1700   :  { %v2377_v1 = vpop.permute.xlu1 %2376 }
0x1701   :  { %v2379_v2 = vmul.f32 %v6550_v11, %v2377_v1 }
0x1703   :  { %2381 = vrot.lane.b32.xlu0 %v2379_v2, %s6698_s20 }
0x1706   :  { %v2598_v10 = vpop.permute.xlu1 %2597 }
0x1707   :  { %v2600_v53 = vmul.f32 %v6552_v9, %v2598_v10 }
0x1709   :  { %2602 = vrot.lane.b32.xlu1 %v2600_v53, %s6698_s20  ;;  %v7680_v53 = vld [vmem:[%s8209_s1 + $0x108] ss:$0 sm:$0xff] }
0x170a   :  { %v2593_v21 = vpop.permute.xlu1 %2592 }
0x170b   :  { %v2595_v22 = vmul.f32 %v6552_v9, %v2593_v21 }
0x1775   :  { %v2382_v19 = vpop.permute.xlu0 %2381 }
0x1776   :  { %v2384_v20 = vadd.f32 %v2382_v19, %v2374_v4 }
0x1778   :  { %6553 = vtanh.f32 %v2384_v20 }
0x177b   :  { %v2603_v23 = vpop.permute.xlu1 %2602 }
0x177c   :  { %v7520_v24 = vadd.f32 %v2603_v23, %v2595_v22 }
0x177e   :  { %6555 = vtanh.f32 %v7520_v24 }
0x1785   :  { %v6554_v17 = vpop.eup %6553 }
0x1786   :  { %2387 = vrot.lane.b32.xlu0 %v6554_v17, %s6697_s19 }
0x178b   :  { %v6556_v13 = vpop.eup %6555 }
0x178c   :  { %2608 = vrot.lane.b32.xlu1 %v6556_v13, %s6697_s19 }
0x17f8   :  { %v2388_v26 = vpop.permute.xlu0 %2387 }
0x17f9   :  { %v2390_v28 = vmul.f32 %v6550_v11, %v2388_v26  ;;  %v7651_v11 = vld [vmem:[%s8209_s1 + $0xe8] sm:$0xff] }
0x17fb   :  { %2401 = vrot.lane.b32.xlu0 %v2390_v28, %s6698_s20 }
0x17fe   :  { %v2609_v29 = vpop.permute.xlu1 %2608 }
0x17ff   :  { %v2611_v36 = vmul.f32 %v6552_v9, %v2609_v29  ;;  %2406 = vrot.lane.b32.xlu0 %v2384_v20, %s6699_s9 }
0x1801   :  { %2686 = vrot.lane.b32.xlu1 %v2611_v36, %s6698_s20 }
0x186d   :  { %v2402_v37 = vpop.permute.xlu0 %2401 }
0x186e   :  { %v2404_v42 = vsel %vm2392_vm9, %v2402_v37, %v7434_v31 }
0x186f   :  { %6082 = vmatmul.mubr.msk.f32.vlgmr.msra.gmra.mxu1 %vm25_vm2, %v2404_v42 }
0x1870   :  { %6103 = vmatprep.mubr.msk.f32.mxu1 %vm6696_vm0, %v6695_v0  ;;  %6096 = vmatpush3.msra.mxu1 %v7632_v6 }
0x1871   :  { %v2407_v43 = vpop.permute.xlu0 %2406  ;;  %6097 = vmatprep.subr.mxu1 %v6695_v0 }
0x1872   :  { %v2409_v44 = vsel %vm2392_vm9, %v2407_v43, %v7467_v39  ;;  %v7619_v39 = vld [vmem:[%s8209_s1 + $0xe0] ss:$0 sm:$0xff]  ;;  %6098 = vmatpush3.msra.mxu1 %v7637_v7 }
0x1873   :  { %v2687_v45 = vpop.permute.xlu1 %2686  ;;  %2773 = vrot.lane.b32.xlu0 %v2409_v44, %s6698_s20  ;;  %6099 = vmatprep.subr.mxu1 %v6695_v0 }
0x1874   :  { %6093 = vmatmul.mubr.msk.f32.vlgmr.msra.gmra.mxu0 %vm25_vm2, %v2687_v45  ;;  %6100 = vmatpush3.msra.mxu1 %v7644_v8 }
0x1875   :  { %6107 = vmatpush3.msra.mxu0 %v7429_v30  ;;  %6114 = vmatprep.mubr.msk.f32.mxu0 %vm6696_vm0, %v6695_v0 }
0x1876   :  { %6108 = vmatprep.subr.mxu0 %v6695_v0  ;;  %6101 = vmatprep.subr.mxu1 %v6695_v0 }
0x1877   :  { %6109 = vmatpush3.msra.mxu0 %v7441_v32  ;;  %6102 = vmatpush3.msra.mxu1 %v7651_v11 }
0x1878   :  { %6110 = vmatprep.subr.mxu0 %v6695_v0  ;;  %6117 = vmatprep.subr.mxu1 %v6695_v0 }
0x1879   :  { %6111 = vmatpush3.msra.mxu0 %v7460_v38 }
0x187a   :  { %6112 = vmatprep.subr.mxu0 %v6695_v0 }
0x187b   :  { %6113 = vmatpush3.msra.mxu0 %v7480_v41 }
0x187c   :  { %6115 = vmatmul.mubr.msk.f32.vlgmr.msra.gmra.mxu0 %vm25_vm2, %v2687_v45  ;;  %6124 = vmatprep.subr.mxu0 %v6695_v0 }
0x187d   :  { %6125 = vmatpush3.msra.mxu0 %v7526_v25  ;;  %6132 = vmatprep.mubr.msk.f32.mxu0 %vm6696_vm0, %v6695_v0 }
0x187e   :  { %6126 = vmatprep.subr.mxu0 %v6695_v0 }
0x187f   :  { %6127 = vmatpush3.msra.mxu0 %v7531_v14 }
0x1880   :  { %6128 = vmatprep.subr.mxu0 %v6695_v0 }
0x1881   :  { %6129 = vmatpush3.msra.mxu0 %v7550_v27 }
0x1882   :  { %6130 = vmatprep.subr.mxu0 %v6695_v0 }
0x1883   :  { %6131 = vmatpush3.msra.mxu0 %v7563_v15 }
0x1884   :  { %6146 = vmatprep.subr.mxu0 %v6695_v0 }
0x18e5   :  { %v2774_v59 = vpop.permute.xlu0 %2773 }
0x192f   :  { %v2681_v31 = vpop.f32.mrf.mxu1 }
0x1931   :  { %v6083_v33 = vpop.f32.mrf.mxu1 }
0x1934   :  { %v2756_v46 = vpop.f32.mrf.mxu0 }
0x1935   :  { %v2757_v47 = vadd.f32 %v2756_v46, %v2681_v31 }
0x1936   :  { %v6094_v48 = vpop.f32.mrf.mxu0 }
0x1937   :  { %v2764_v49 = vadd.f32 %v7619_v39, %v2757_v47 }
0x1939   :  { %6557 = vtanh.f32 %v2764_v49  ;;  %v5459_v55 = vmul.f32 -1.442695, %v2764_v49 }
0x193b   :  { %6559 = vpow2.f32 %v5459_v55 }
0x193c   :  { %v7622_v50 = vpop.f32.mrf.mxu0 }
0x193e   :  { %v6116_v52 = vpop.f32.mrf.mxu0 }
0x1946   :  { %v6558_v54 = vpop.eup %6557 }
0x1947   :  { %2778 = vrot.lane.b32.xlu1 %v6558_v54, %s6697_s19 }
0x1948   :  { %v6560_v56 = vpop.eup %6559 }
0x1949   :  { %v2768_v57 = vadd.f32 1.0, %v6560_v56 }
0x194b   :  { %6561 = vrcp.f32 %v2768_v57 }
0x1958   :  { %v6562_v58 = vpop.eup %6561 }
0x1959   :  { %v2776_v62 = vmul.f32 %v6562_v58, %v2774_v59 }
0x19b9   :  { %v2779_v60 = vpop.permute.xlu1 %2778 }
0x19ba   :  { %v2781_v61 = vmul.f32 %v6562_v58, %v2779_v60 }
0x19bc   :  { %2783 = vrot.lane.b32.xlu1 %v2781_v61, %s6698_s20 }
0x1a2e   :  { %v2784_v63 = vpop.permute.xlu1 %2783 }
0x1a2f   :  { %v7626_v5 = vadd.f32 %v2784_v63, %v2776_v62 }
0x1a31   :  { %6563 = vtanh.f32 %v7626_v5 }
0x1a3e   :  { %v6564_v1 = vpop.eup %6563 }
0x1a3f   :  { %2789 = vrot.lane.b32.xlu0 %v6564_v1, %s6697_s19 }
0x1ab1   :  { %v2790_v2 = vpop.permute.xlu0 %2789 }
0x1ab2   :  { %v2792_v9 = vmul.f32 %v6562_v58, %v2790_v2 }
0x1ab4   :  { %2798 = vrot.lane.b32.xlu1 %v2792_v9, %s6698_s20 }
0x1b26   :  { %v2799_v10 = vpop.permute.xlu1 %2798 }
0x1b27   :  { %6104 = vmatmul.mubr.msk.f32.vlgmr.msra.gmra.mxu1 %vm25_vm2, %v2799_v10  ;;  %6133 = vmatmul.mubr.msk.f32.vlgmr.msra.gmra.mxu0 %vm25_vm2, %v2799_v10 }
0x1b28   :  { %6118 = vmatpush3.msra.mxu1 %v7452_v34  ;;  %6121 = vmatprep.mubr.msk.f32.mxu1 %vm6696_vm0, %v6695_v0 }
0x1b29   :  { %6119 = vmatprep.subr.mxu1 %v6695_v0  ;;  %6147 = vmatpush3.msra.mxu0 %v7632_v6 }
0x1b2a   :  { %6120 = vmatpush3.msra.mxu1 %v7475_v40  ;;  %6148 = vmatprep.subr.mxu0 %v6695_v0 }
0x1b2b   :  { %6135 = vmatprep.subr.mxu1 %v6695_v0  ;;  %6149 = vmatpush3.msra.mxu0 %v7637_v7 }
0x1b2c   :  { %6150 = vmatprep.subr.mxu0 %v6695_v0  ;;  %6154 = vmatprep.mubr.msk.f32.mxu0 %vm6696_vm0, %v6695_v0 }
0x1b2d   :  { %6151 = vmatpush3.msra.mxu0 %v7644_v8 }
0x1b2e   :  { %6152 = vmatprep.subr.mxu0 %v6695_v0 }
0x1b2f   :  { %6153 = vmatpush3.msra.mxu0 %v7651_v11 }
0x1b30   :  { %6168 = vmatprep.subr.mxu0 %v6695_v0 }
0x1be7   :  { %v2868_v3 = vpop.f32.mrf.mxu1  ;;  %v7682_v4 = vpop.f32.mrf.mxu0 }
0x1be8   :  { %v7685_v19 = vadd.f32 %v7680_v53, %v2868_v3 }
0x1be9   :  { %v6105_v20 = vpop.f32.mrf.mxu1  ;;  %v6134_v21 = vpop.f32.mrf.mxu0 }
0x1bea   :  { %v2876_v22 = vsel %vm2875_vm11, %v7685_v19, -inf }
0x1beb   :  { %2877 = vmax.xlane.f32.xlu0 %v2876_v22 }
0x1c74   :  { %v2878_v23 = vpop.xlane.xlu0 %2877 }
0x1c75   :  { %vm2879_vm12 = vcmp.eq.f32.partialorder %v7685_v19, %v2878_v23 }
0x1c76   :  { %v5462_v17 = vsel %vm2879_vm12, 1.0, %v6695_v0 }
0x1c77   :  { %6122 = vmatmul.mubr.msk.f32.vlgmr.msra.gmra.mxu1 %vm2505_vm10, %v5462_v17 }
0x1c78   :  { %6136 = vmatpush3.msra.mxu1 %v7536_v12  ;;  %6143 = vmatprep.mubr.msk.f32.mxu1 %vm6696_vm0, %v6695_v0 }
0x1c79   :  { %6137 = vmatprep.subr.mxu1 %v6695_v0 }
0x1c7a   :  { %6138 = vmatpush3.msra.mxu1 %v7543_v35 }
0x1c7b   :  { %6139 = vmatprep.subr.mxu1 %v6695_v0 }
0x1c7c   :  { %6140 = vmatpush3.msra.mxu1 %v7568_v18 }
0x1c7d   :  { %6141 = vmatprep.subr.mxu1 %v6695_v0 }
0x1c7e   :  { %6142 = vmatpush3.msra.mxu1 %v7575_v16 }
0x1c7f   :  { %6157 = vmatprep.subr.mxu1 %v6695_v0 }
0x1d37   :  { %v3021_v13 = vpop.f32.mrf.mxu1 }
0x1d38   :  { %v3022_v26 = vadd.f32 %v3021_v13, %v7622_v50 }
0x1d39   :  { %v6123_v28 = vpop.f32.mrf.mxu1 }
0x1d3a   :  { %v3025_v29 = vadd.f32 %v7509_v51, %v3022_v26 }
0x1d3c   :  { %6565 = vtanh.f32 %v3025_v29  ;;  %v5465_v37 = vmul.f32 -1.442695, %v3025_v29 }
0x1d3e   :  { %6567 = vpow2.f32 %v5465_v37 }
0x1d49   :  { %v6566_v36 = vpop.eup %6565 }
0x1d4a   :  { %3035 = vrot.lane.b32.xlu1 %v6566_v36, %s6697_s19 }
0x1d4b   :  { %v6568_v42 = vpop.eup %6567 }
0x1d4c   :  { %v3029_v43 = vadd.f32 1.0, %v6568_v42 }
0x1d4e   :  { %6569 = vrcp.f32 %v3029_v43 }
0x1d5b   :  { %v6570_v44 = vpop.eup %6569 }
0x1d5c   :  { %v3033_v33 = vmul.f32 %v6570_v44, %v7520_v24 }
0x1dbc   :  { %v3036_v45 = vpop.permute.xlu1 %3035 }
0x1dbd   :  { %v3038_v31 = vmul.f32 %v6570_v44, %v3036_v45 }
0x1dbf   :  { %3040 = vrot.lane.b32.xlu1 %v3038_v31, %s6698_s20 }
0x1e31   :  { %v3041_v46 = vpop.permute.xlu1 %3040 }
0x1e32   :  { %v7707_v47 = vadd.f32 %v3041_v46, %v3033_v33 }
0x1e34   :  { %6571 = vtanh.f32 %v7707_v47 }
0x1e41   :  { %v6572_v48 = vpop.eup %6571 }
0x1e42   :  { %3046 = vrot.lane.b32.xlu1 %v6572_v48, %s6697_s19 }
0x1eb4   :  { %v3047_v49 = vpop.permute.xlu1 %3046 }
0x1eb5   :  { %v3049_v50 = vmul.f32 %v6570_v44, %v3047_v49 }
0x1eb7   :  { %3121 = vrot.lane.b32.xlu1 %v3049_v50, %s6698_s20 }
0x1f29   :  { %v3122_v52 = vpop.permute.xlu1 %3121 }
0x1f2a   :  { %6144 = vmatmul.mubr.msk.f32.vlgmr.msra.gmra.mxu1 %vm25_vm2, %v3122_v52 }
0x1f2b   :  { %6158 = vmatpush3.msra.mxu1 %v7429_v30  ;;  %6165 = vmatprep.mubr.msk.f32.mxu1 %vm6696_vm0, %v6695_v0 }
0x1f2c   :  { %6159 = vmatprep.subr.mxu1 %v6695_v0 }
0x1f2d   :  { %6160 = vmatpush3.msra.mxu1 %v7441_v32 }
0x1f2e   :  { %6161 = vmatprep.subr.mxu1 %v6695_v0 }
0x1f2f   :  { %6162 = vmatpush3.msra.mxu1 %v7460_v38 }
0x1f30   :  { %6163 = vmatprep.subr.mxu1 %v6695_v0 }
0x1f31   :  { %6164 = vmatpush3.msra.mxu1 %v7480_v41 }
0x1f32   :  { %6166 = vmatmul.mubr.msk.f32.vlgmr.msra.gmra.mxu1 %vm25_vm2, %v3122_v52  ;;  %6175 = vmatprep.subr.mxu1 %v6695_v0 }
0x1f33   :  { %6176 = vmatpush3.msra.mxu1 %v7526_v25  ;;  %6183 = vmatprep.mubr.msk.f32.mxu1 %vm6696_vm0, %v6695_v0 }
0x1f34   :  { %6177 = vmatprep.subr.mxu1 %v6695_v0 }
0x1f35   :  { %6178 = vmatpush3.msra.mxu1 %v7531_v14 }
0x1f36   :  { %6179 = vmatprep.subr.mxu1 %v6695_v0 }
0x1f37   :  { %6180 = vmatpush3.msra.mxu1 %v7550_v27 }
0x1f38   :  { %6181 = vmatprep.subr.mxu1 %v6695_v0 }
0x1f39   :  { %6182 = vmatpush3.msra.mxu1 %v7563_v15 }
0x1f3a   :  { %6197 = vmatprep.subr.mxu1 %v6695_v0 }
0x1fea   :  { %v3191_v24 = vpop.f32.mrf.mxu1 }
0x1feb   :  { %v3192_v54 = vadd.f32 %v3191_v24, %v7682_v4 }
0x1fec   :  { %v6145_v55 = vpop.f32.mrf.mxu1 }
0x1fed   :  { %v3195_v56 = vadd.f32 %v7619_v39, %v3192_v54 }
0x1fef   :  { %6573 = vtanh.f32 %v3195_v56  ;;  %v5468_v61 = vmul.f32 -1.442695, %v3195_v56 }
0x1ff1   :  { %6575 = vpow2.f32 %v5468_v61 }
0x1ff2   :  { %v3370_v57 = vpop.f32.mrf.mxu1 }
0x1ff4   :  { %v6167_v58 = vpop.f32.mrf.mxu1 }
0x1ffc   :  { %v6574_v60 = vpop.eup %6573 }
0x1ffd   :  { %3205 = vrot.lane.b32.xlu1 %v6574_v60, %s6697_s19 }
0x1ffe   :  { %v6576_v59 = vpop.eup %6575 }
0x1fff   :  { %v3199_v62 = vadd.f32 1.0, %v6576_v59 }
0x2001   :  { %6577 = vrcp.f32 %v3199_v62 }
0x200e   :  { %v6578_v63 = vpop.eup %6577 }
0x200f   :  { %v3203_v9 = vmul.f32 %v6578_v63, %v7626_v5 }
0x206f   :  { %v3206_v1 = vpop.permute.xlu1 %3205 }
0x2070   :  { %v3208_v2 = vmul.f32 %v6578_v63, %v3206_v1 }
0x2072   :  { %3210 = vrot.lane.b32.xlu1 %v3208_v2, %s6698_s20 }
0x20e4   :  { %v3211_v10 = vpop.permute.xlu1 %3210 }
0x20e5   :  { %v7739_v3 = vadd.f32 %v3211_v10, %v3203_v9 }
0x20e7   :  { %6579 = vtanh.f32 %v7739_v3 }
0x20f4   :  { %v6580_v4 = vpop.eup %6579 }
0x20f5   :  { %3216 = vrot.lane.b32.xlu1 %v6580_v4, %s6697_s19 }
0x2167   :  { %v3217_v20 = vpop.permute.xlu1 %3216 }
0x2168   :  { %v3219_v21 = vmul.f32 %v6578_v63, %v3217_v20 }
0x216a   :  { %3221 = vrot.lane.b32.xlu1 %v3219_v21, %s6698_s20 }
0x21dc   :  { %v3222_v22 = vpop.permute.xlu1 %3221 }
0x21dd   :  { %6155 = vmatmul.mubr.msk.f32.vlgmr.msra.gmra.mxu0 %vm25_vm2, %v3222_v22  ;;  %6184 = vmatmul.mubr.msk.f32.vlgmr.msra.gmra.mxu1 %vm25_vm2, %v3222_v22 }
0x21de   :  { %6169 = vmatpush3.msra.mxu0 %v7452_v34  ;;  %6172 = vmatprep.mubr.msk.f32.mxu0 %vm6696_vm0, %v6695_v0 }
0x21df   :  { %6170 = vmatprep.subr.mxu0 %v6695_v0  ;;  %6198 = vmatpush3.msra.mxu1 %v7632_v6 }
0x21e0   :  { %6171 = vmatpush3.msra.mxu0 %v7475_v40  ;;  %6199 = vmatprep.subr.mxu1 %v6695_v0 }
0x21e1   :  { %6186 = vmatprep.subr.mxu0 %v6695_v0  ;;  %6200 = vmatpush3.msra.mxu1 %v7637_v7 }
0x21e2   :  { %6201 = vmatprep.subr.mxu1 %v6695_v0  ;;  %6205 = vmatprep.mubr.msk.f32.mxu1 %vm6696_vm0, %v6695_v0 }
0x21e3   :  { %6202 = vmatpush3.msra.mxu1 %v7644_v8 }
0x21e4   :  { %6203 = vmatprep.subr.mxu1 %v6695_v0 }
0x21e5   :  { %6204 = vmatpush3.msra.mxu1 %v7651_v11 }
0x21e6   :  { %6219 = vmatprep.subr.mxu1 %v6695_v0 }
0x229d   :  { %v3291_v5 = vpop.f32.mrf.mxu0  ;;  %v7762_v23 = vpop.f32.mrf.mxu1 }
0x229e   :  { %v7765_v17 = vadd.f32 %v7680_v53, %v3291_v5 }
0x229f   :  { %v6156_v13 = vpop.f32.mrf.mxu0  ;;  %v6185_v26 = vpop.f32.mrf.mxu1 }
0x22a0   :  { %v3298_v28 = vsel %vm2875_vm11, %v7765_v17, -inf }
0x22a1   :  { %3299 = vmax.xlane.f32.xlu0 %v3298_v28 }
0x232a   :  { %v3300_v29 = vpop.xlane.xlu0 %3299 }
0x232b   :  { %vm3301_vm13 = vcmp.eq.f32.partialorder %v7765_v17, %v3300_v29 }
0x232c   :  { %v5470_v36 = vsel %vm3301_vm13, 1.0, %v6695_v0 }
0x232d   :  { %6173 = vmatmul.mubr.msk.f32.vlgmr.msra.gmra.mxu0 %vm2505_vm10, %v5470_v36 }
0x232e   :  { %6187 = vmatpush3.msra.mxu0 %v7536_v12  ;;  %6194 = vmatprep.mubr.msk.f32.mxu0 %vm6696_vm0, %v6695_v0 }
0x232f   :  { %6188 = vmatprep.subr.mxu0 %v6695_v0 }
0x2330   :  { %6189 = vmatpush3.msra.mxu0 %v7543_v35 }
0x2331   :  { %6190 = vmatprep.subr.mxu0 %v6695_v0 }
0x2332   :  { %6191 = vmatpush3.msra.mxu0 %v7568_v18 }
0x2333   :  { %6192 = vmatprep.subr.mxu0 %v6695_v0 }
0x2334   :  { %6193 = vmatpush3.msra.mxu0 %v7575_v16 }
0x2335   :  { %6208 = vmatprep.subr.mxu0 %v6695_v0 }
0x23ed   :  { %v3443_v37 = vpop.f32.mrf.mxu0 }
0x23ee   :  { %v3444_v42 = vadd.f32 %v3443_v37, %v3370_v57 }
0x23ef   :  { %v6174_v43 = vpop.f32.mrf.mxu0 }
0x23f0   :  { %v3447_v44 = vadd.f32 %v7509_v51, %v3444_v42 }
0x23f2   :  { %6581 = vtanh.f32 %v3447_v44  ;;  %v5473_v31 = vmul.f32 -1.442695, %v3447_v44 }
0x23f4   :  { %6583 = vpow2.f32 %v5473_v31 }
0x23ff   :  { %v6582_v45 = vpop.eup %6581 }
0x2400   :  { %3457 = vrot.lane.b32.xlu1 %v6582_v45, %s6697_s19 }
0x2401   :  { %v6584_v33 = vpop.eup %6583 }
0x2402   :  { %v3451_v46 = vadd.f32 1.0, %v6584_v33 }
0x2404   :  { %6585 = vrcp.f32 %v3451_v46 }
0x2411   :  { %v6586_v48 = vpop.eup %6585 }
0x2412   :  { %v3455_v52 = vmul.f32 %v6586_v48, %v7707_v47 }
0x2472   :  { %v3458_v49 = vpop.permute.xlu1 %3457 }
0x2473   :  { %v3460_v50 = vmul.f32 %v6586_v48, %v3458_v49 }
0x2475   :  { %3462 = vrot.lane.b32.xlu0 %v3460_v50, %s6698_s20 }
0x24e7   :  { %v3463_v24 = vpop.permute.xlu0 %3462 }
0x24e8   :  { %v7786_v54 = vadd.f32 %v3463_v24, %v3455_v52 }
0x24ea   :  { %6587 = vtanh.f32 %v7786_v54 }
0x24f7   :  { %v6588_v55 = vpop.eup %6587 }
0x24f8   :  { %3468 = vrot.lane.b32.xlu1 %v6588_v55, %s6697_s19 }
0x256a   :  { %v3469_v56 = vpop.permute.xlu1 %3468 }
0x256b   :  { %v3471_v57 = vmul.f32 %v6586_v48, %v3469_v56 }
0x256d   :  { %3543 = vrot.lane.b32.xlu1 %v3471_v57, %s6698_s20 }
0x25df   :  { %v3544_v58 = vpop.permute.xlu1 %3543 }
0x25e0   :  { %6195 = vmatmul.mubr.msk.f32.vlgmr.msra.gmra.mxu0 %vm25_vm2, %v3544_v58 }
0x25e1   :  { %6209 = vmatpush3.msra.mxu0 %v7429_v30  ;;  %6216 = vmatprep.mubr.msk.f32.mxu0 %vm6696_vm0, %v6695_v0 }
0x25e2   :  { %6210 = vmatprep.subr.mxu0 %v6695_v0 }
0x25e3   :  { %6211 = vmatpush3.msra.mxu0 %v7441_v32 }
0x25e4   :  { %6212 = vmatprep.subr.mxu0 %v6695_v0 }
0x25e5   :  { %6213 = vmatpush3.msra.mxu0 %v7460_v38 }
0x25e6   :  { %6214 = vmatprep.subr.mxu0 %v6695_v0 }
0x25e7   :  { %6215 = vmatpush3.msra.mxu0 %v7480_v41 }
0x25e8   :  { %6217 = vmatmul.mubr.msk.f32.vlgmr.msra.gmra.mxu0 %vm25_vm2, %v3544_v58  ;;  %6226 = vmatprep.subr.mxu0 %v6695_v0 }
0x25e9   :  { %6227 = vmatpush3.msra.mxu0 %v7526_v25  ;;  %6234 = vmatprep.mubr.msk.f32.mxu0 %vm6696_vm0, %v6695_v0 }
0x25ea   :  { %6228 = vmatprep.subr.mxu0 %v6695_v0 }
0x25eb   :  { %6229 = vmatpush3.msra.mxu0 %v7531_v14 }
0x25ec   :  { %6230 = vmatprep.subr.mxu0 %v6695_v0 }
0x25ed   :  { %6231 = vmatpush3.msra.mxu0 %v7550_v27 }
0x25ee   :  { %6232 = vmatprep.subr.mxu0 %v6695_v0 }
0x25ef   :  { %6233 = vmatpush3.msra.mxu0 %v7563_v15 }
0x25f0   :  { %6248 = vmatprep.subr.mxu0 %v6695_v0 }
0x26a0   :  { %v3613_v47 = vpop.f32.mrf.mxu0 }
0x26a1   :  { %v3614_v60 = vadd.f32 %v3613_v47, %v7762_v23 }
0x26a2   :  { %v6196_v61 = vpop.f32.mrf.mxu0 }
0x26a3   :  { %v3617_v59 = vadd.f32 %v7619_v39, %v3614_v60 }
0x26a5   :  { %6589 = vtanh.f32 %v3617_v59  ;;  %v5476_v2 = vmul.f32 -1.442695, %v3617_v59 }
0x26a7   :  { %6591 = vpow2.f32 %v5476_v2 }
0x26a8   :  { %v3792_v62 = vpop.f32.mrf.mxu0 }
0x26aa   :  { %v6218_v63 = vpop.f32.mrf.mxu0 }
0x26b2   :  { %v6590_v1 = vpop.eup %6589 }
0x26b3   :  { %3627 = vrot.lane.b32.xlu1 %v6590_v1, %s6697_s19 }
0x26b4   :  { %v6592_v9 = vpop.eup %6591 }
0x26b5   :  { %v3621_v10 = vadd.f32 1.0, %v6592_v9 }
0x26b7   :  { %6593 = vrcp.f32 %v3621_v10 }
0x26c4   :  { %v6594_v4 = vpop.eup %6593 }
0x26c5   :  { %v3625_v22 = vmul.f32 %v6594_v4, %v7739_v3 }
0x2725   :  { %v3628_v20 = vpop.permute.xlu1 %3627 }
0x2726   :  { %v3630_v21 = vmul.f32 %v6594_v4, %v3628_v20 }
0x2728   :  { %3632 = vrot.lane.b32.xlu1 %v3630_v21, %s6698_s20 }
0x279a   :  { %v3633_v5 = vpop.permute.xlu1 %3632 }
0x279b   :  { %v7818_v23 = vadd.f32 %v3633_v5, %v3625_v22 }
0x279d   :  { %6595 = vtanh.f32 %v7818_v23 }
0x27aa   :  { %v6596_v13 = vpop.eup %6595 }
0x27ab   :  { %3638 = vrot.lane.b32.xlu1 %v6596_v13, %s6697_s19 }
0x281d   :  { %v3639_v26 = vpop.permute.xlu1 %3638 }
0x281e   :  { %v3641_v28 = vmul.f32 %v6594_v4, %v3639_v26 }
0x2820   :  { %3643 = vrot.lane.b32.xlu1 %v3641_v28, %s6698_s20  ;;  %v7917_v28 = vld [vmem:[%s8209_s1 + $0x68] sm:$0xff] }
0x2892   :  { %v3644_v29 = vpop.permute.xlu1 %3643 }
0x2893   :  { %6206 = vmatmul.mubr.msk.f32.vlgmr.msra.gmra.mxu1 %vm25_vm2, %v3644_v29  ;;  %6235 = vmatmul.mubr.msk.f32.vlgmr.msra.gmra.mxu0 %vm25_vm2, %v3644_v29 }
0x2894   :  { %6220 = vmatpush3.msra.mxu1 %v7452_v34  ;;  %6223 = vmatprep.mubr.msk.f32.mxu1 %vm6696_vm0, %v6695_v0 }
0x2895   :  { %6221 = vmatprep.subr.mxu1 %v6695_v0  ;;  %6249 = vmatpush3.msra.mxu0 %v7632_v6 }
0x2896   :  { %6222 = vmatpush3.msra.mxu1 %v7475_v40  ;;  %6250 = vmatprep.subr.mxu0 %v6695_v0 }
0x2897   :  { %6237 = vmatprep.subr.mxu1 %v6695_v0  ;;  %6251 = vmatpush3.msra.mxu0 %v7637_v7 }
0x2898   :  { %6252 = vmatprep.subr.mxu0 %v6695_v0  ;;  %6256 = vmatprep.mubr.msk.f32.mxu0 %vm6696_vm0, %v6695_v0 }
0x2899   :  { %6253 = vmatpush3.msra.mxu0 %v7644_v8 }
0x289a   :  { %6254 = vmatprep.subr.mxu0 %v6695_v0 }
0x289b   :  { %6255 = vmatpush3.msra.mxu0 %v7651_v11 }
0x289c   :  { %6270 = vmatprep.subr.mxu0 %v6695_v0 }
0x2953   :  { %v3713_v34 = vpop.f32.mrf.mxu1  ;;  %v7841_v40 = vpop.f32.mrf.mxu0 }
0x2954   :  { %v7844_v3 = vadd.f32 %v7680_v53, %v3713_v34 }
0x2955   :  { %v6207_v36 = vpop.f32.mrf.mxu1  ;;  %v6236_v37 = vpop.f32.mrf.mxu0 }
0x2956   :  { %v3720_v42 = vsel %vm2875_vm11, %v7844_v3, -inf }
0x2957   :  { %3721 = vmax.xlane.f32.xlu0 %v3720_v42 }
0x29e0   :  { %v3722_v43 = vpop.xlane.xlu0 %3721 }
0x29e1   :  { %vm3723_vm14 = vcmp.eq.f32.partialorder %v7844_v3, %v3722_v43 }
0x29e2   :  { %v5478_v44 = vsel %vm3723_vm14, 1.0, %v6695_v0 }
0x29e3   :  { %6224 = vmatmul.mubr.msk.f32.vlgmr.msra.gmra.mxu1 %vm2505_vm10, %v5478_v44 }
0x29e4   :  { %6238 = vmatpush3.msra.mxu1 %v7536_v12  ;;  %6245 = vmatprep.mubr.msk.f32.mxu1 %vm6696_vm0, %v6695_v0 }
0x29e5   :  { %6239 = vmatprep.subr.mxu1 %v6695_v0 }
0x29e6   :  { %6240 = vmatpush3.msra.mxu1 %v7543_v35 }
0x29e7   :  { %6241 = vmatprep.subr.mxu1 %v6695_v0 }
0x29e8   :  { %6242 = vmatpush3.msra.mxu1 %v7568_v18 }
0x29e9   :  { %6243 = vmatprep.subr.mxu1 %v6695_v0 }
0x29ea   :  { %6244 = vmatpush3.msra.mxu1 %v7575_v16 }
0x29eb   :  { %6259 = vmatprep.subr.mxu1 %v6695_v0 }
0x2aa3   :  { %v3865_v45 = vpop.f32.mrf.mxu1 }
0x2aa4   :  { %v3866_v31 = vadd.f32 %v3865_v45, %v3792_v62 }
0x2aa5   :  { %v6225_v33 = vpop.f32.mrf.mxu1 }
0x2aa6   :  { %v3869_v46 = vadd.f32 %v7509_v51, %v3866_v31  ;;  %v7953_v33 = vld [vmem:[%s8209_s1 + $0x98] ss:$0 sm:$0xff] }
0x2aa8   :  { %6597 = vtanh.f32 %v3869_v46  ;;  %v5481_v49 = vmul.f32 -1.442695, %v3869_v46 }
0x2aaa   :  { %6599 = vpow2.f32 %v5481_v49 }
0x2ab5   :  { %v6598_v48 = vpop.eup %6597 }
0x2ab6   :  { %3879 = vrot.lane.b32.xlu1 %v6598_v48, %s6697_s19 }
0x2ab7   :  { %v6600_v50 = vpop.eup %6599 }
0x2ab8   :  { %v3873_v52 = vadd.f32 1.0, %v6600_v50 }
0x2aba   :  { %6601 = vrcp.f32 %v3873_v52 }
0x2ac7   :  { %v6602_v24 = vpop.eup %6601 }
0x2ac8   :  { %v3877_v57 = vmul.f32 %v6602_v24, %v7786_v54 }
0x2b28   :  { %v3880_v55 = vpop.permute.xlu1 %3879 }
0x2b29   :  { %v3882_v56 = vmul.f32 %v6602_v24, %v3880_v55 }
0x2b2b   :  { %3884 = vrot.lane.b32.xlu1 %v3882_v56, %s6698_s20 }
0x2b9d   :  { %v3885_v58 = vpop.permute.xlu1 %3884 }
0x2b9e   :  { %v7865_v47 = vadd.f32 %v3885_v58, %v3877_v57 }
0x2ba0   :  { %6603 = vtanh.f32 %v7865_v47 }
0x2bad   :  { %v6604_v51 = vpop.eup %6603 }
0x2bae   :  { %3890 = vrot.lane.b32.xlu1 %v6604_v51, %s6697_s19 }
0x2c20   :  { %v3891_v60 = vpop.permute.xlu1 %3890 }
0x2c21   :  { %v3893_v61 = vmul.f32 %v6602_v24, %v3891_v60 }
0x2c23   :  { %3965 = vrot.lane.b32.xlu1 %v3893_v61, %s6698_s20  ;;  %v7968_v61 = vld [vmem:[%s8209_s1 + $0x90] sm:$0xff] }
0x2c95   :  { %v3966_v59 = vpop.permute.xlu1 %3965 }
0x2c96   :  { %6246 = vmatmul.mubr.msk.f32.vlgmr.msra.gmra.mxu1 %vm25_vm2, %v3966_v59 }
0x2c97   :  { %6260 = vmatpush3.msra.mxu1 %v7429_v30  ;;  %6267 = vmatprep.mubr.msk.f32.mxu1 %vm6696_vm0, %v6695_v0 }
0x2c98   :  { %6261 = vmatprep.subr.mxu1 %v6695_v0 }
0x2c99   :  { %6262 = vmatpush3.msra.mxu1 %v7441_v32 }
0x2c9a   :  { %6263 = vmatprep.subr.mxu1 %v6695_v0 }
0x2c9b   :  { %6264 = vmatpush3.msra.mxu1 %v7460_v38 }
0x2c9c   :  { %6265 = vmatprep.subr.mxu1 %v6695_v0 }
0x2c9d   :  { %6266 = vmatpush3.msra.mxu1 %v7480_v41 }
0x2c9e   :  { %6268 = vmatmul.mubr.msk.f32.vlgmr.msra.gmra.mxu1 %vm25_vm2, %v3966_v59  ;;  %6277 = vmatprep.subr.mxu1 %v6695_v0  ;;  %v7984_v59 = vld [vmem:[%s8209_s1 + $0x80] sm:$0xff] }
0x2c9f   :  { %6278 = vmatpush3.msra.mxu1 %v7526_v25  ;;  %6285 = vmatprep.mubr.msk.f32.mxu1 %vm6696_vm0, %v6695_v0 }
0x2ca0   :  { %6279 = vmatprep.subr.mxu1 %v6695_v0 }
0x2ca1   :  { %6280 = vmatpush3.msra.mxu1 %v7531_v14 }
0x2ca2   :  { %6281 = vmatprep.subr.mxu1 %v6695_v0 }
0x2ca3   :  { %6282 = vmatpush3.msra.mxu1 %v7550_v27 }
0x2ca4   :  { %6283 = vmatprep.subr.mxu1 %v6695_v0 }
0x2ca5   :  { %6284 = vmatpush3.msra.mxu1 %v7563_v15 }
0x2ca6   :  { %6299 = vmatprep.subr.mxu1 %v6695_v0 }
0x2d56   :  { %v4035_v30 = vpop.f32.mrf.mxu1 }
0x2d57   :  { %v4036_v32 = vadd.f32 %v4035_v30, %v7841_v40  ;;  %v7991_v30 = vld [vmem:[%s8209_s1 + $0x78] sm:$0xff] }
0x2d58   :  { %v6247_v38 = vpop.f32.mrf.mxu1 }
0x2d59   :  { %v4039_v41 = vadd.f32 %v7619_v39, %v4036_v32  ;;  %v7999_v32 = vld [vmem:[%s8209_s1 + $0xd8] sm:$0xff]  ;;  %v8008_v38 = vld [vmem:[%s8209_s1 + $0xd0] sm:$0xff] }
0x2d5b   :  { %6605 = vtanh.f32 %v4039_v41  ;;  %v5484_v62 = vmul.f32 -1.442695, %v4039_v41 }
0x2d5d   :  { %6607 = vpow2.f32 %v5484_v62 }
0x2d5e   :  { %v4214_v25 = vpop.f32.mrf.mxu1 }
0x2d60   :  { %v6269_v54 = vpop.f32.mrf.mxu1 }
0x2d68   :  { %v6606_v14 = vpop.eup %6605 }
0x2d69   :  { %4049 = vrot.lane.b32.xlu1 %v6606_v14, %s6697_s19 }
0x2d6a   :  { %v6608_v63 = vpop.eup %6607 }
0x2d6b   :  { %v4043_v1 = vadd.f32 1.0, %v6608_v63 }
0x2d6d   :  { %6609 = vrcp.f32 %v4043_v1 }
0x2d7a   :  { %v6610_v2 = vpop.eup %6609 }
0x2d7b   :  { %v4047_v4 = vmul.f32 %v6610_v2, %v7818_v23  ;;  %v7907_v23 = vld [vmem:[%s8209_s1 + $0x70] sm:$0xff] }
0x2ddb   :  { %v4050_v9 = vpop.permute.xlu1 %4049 }
0x2ddc   :  { %v4052_v10 = vmul.f32 %v6610_v2, %v4050_v9 }
0x2dde   :  { %4054 = vrot.lane.b32.xlu1 %v4052_v10, %s6698_s20 }
0x2e50   :  { %v4055_v20 = vpop.permute.xlu1 %4054 }
0x2e51   :  { %v7897_v21 = vadd.f32 %v4055_v20, %v4047_v4 }
0x2e53   :  { %6611 = vtanh.f32 %v7897_v21 }
0x2e60   :  { %v6612_v22 = vpop.eup %6611 }
0x2e61   :  { %4060 = vrot.lane.b32.xlu1 %v6612_v22, %s6697_s19 }
0x2ed3   :  { %v4061_v5 = vpop.permute.xlu1 %4060 }
0x2ed4   :  { %v4063_v13 = vmul.f32 %v6610_v2, %v4061_v5 }
0x2ed6   :  { %4065 = vrot.lane.b32.xlu0 %v4063_v13, %s6698_s20 }
0x2f48   :  { %v4066_v26 = vpop.permute.xlu0 %4065 }
0x2f49   :  { %6257 = vmatmul.mubr.msk.f32.vlgmr.msra.gmra.mxu0 %vm25_vm2, %v4066_v26  ;;  %6286 = vmatmul.mubr.msk.f32.vlgmr.msra.gmra.mxu1 %vm25_vm2, %v4066_v26 }
0x2f4a   :  { %6271 = vmatpush3.msra.mxu0 %v7907_v23  ;;  %6274 = vmatprep.mubr.msk.f32.mxu0 %vm6696_vm0, %v6695_v0 }
0x2f4b   :  { %6272 = vmatprep.subr.mxu0 %v6695_v0  ;;  %6300 = vmatpush3.msra.mxu1 %v7632_v6 }
0x2f4c   :  { %6273 = vmatpush3.msra.mxu0 %v7917_v28  ;;  %6301 = vmatprep.subr.mxu1 %v6695_v0 }
0x2f4d   :  { %6288 = vmatprep.subr.mxu0 %v6695_v0  ;;  %6302 = vmatpush3.msra.mxu1 %v7637_v7 }
0x2f4e   :  { %6303 = vmatprep.subr.mxu1 %v6695_v0  ;;  %6307 = vmatprep.mubr.msk.f32.mxu1 %vm6696_vm0, %v6695_v0 }
0x2f4f   :  { %6304 = vmatpush3.msra.mxu1 %v7644_v8 }
0x2f50   :  { %6305 = vmatprep.subr.mxu1 %v6695_v0 }
0x2f51   :  { %6306 = vmatpush3.msra.mxu1 %v7651_v11 }
0x2f52   :  { %6321 = vmatprep.subr.mxu1 %v6695_v0 }
0x3009   :  { %v4135_v29 = vpop.f32.mrf.mxu0  ;;  %v7930_v34 = vpop.f32.mrf.mxu1 }
0x300a   :  { %v7933_v40 = vadd.f32 %v7680_v53, %v4135_v29 }
0x300b   :  { %v6258_v36 = vpop.f32.mrf.mxu0  ;;  %v6287_v37 = vpop.f32.mrf.mxu1 }
0x300c   :  { %v4142_v42 = vsel %vm2875_vm11, %v7933_v40, -inf }
0x300d   :  { %4143 = vmax.xlane.f32.xlu1 %v4142_v42 }
0x3096   :  { %v4144_v43 = vpop.xlane.xlu1 %4143 }
0x3097   :  { %vm4145_vm15 = vcmp.eq.f32.partialorder %v7933_v40, %v4144_v43  ;;  %v8075_v43 = vld [vmem:[%s8209_s1 + $0xa8] sm:$0xff] }
0x3098   :  { %v5486_v44 = vsel %vm4145_vm15, 1.0, %v6695_v0 }
0x3099   :  { %6275 = vmatmul.mubr.msk.f32.vlgmr.msra.gmra.mxu0 %vm2505_vm10, %v5486_v44  ;;  %v8082_v44 = vld [vmem:[%s8209_s1 + $0xa0] sm:$0xff] }
0x309a   :  { %6289 = vmatpush3.msra.mxu0 %v7536_v12  ;;  %6296 = vmatprep.mubr.msk.f32.mxu0 %vm6696_vm0, %v6695_v0 }
0x309b   :  { %6290 = vmatprep.subr.mxu0 %v6695_v0 }
0x309c   :  { %6291 = vmatpush3.msra.mxu0 %v7543_v35 }
0x309d   :  { %6292 = vmatprep.subr.mxu0 %v6695_v0 }
0x309e   :  { %6293 = vmatpush3.msra.mxu0 %v7568_v18 }
0x309f   :  { %6294 = vmatprep.subr.mxu0 %v6695_v0 }
0x30a0   :  { %6295 = vmatpush3.msra.mxu0 %v7575_v16 }
0x30a1   :  { %6310 = vmatprep.subr.mxu0 %v6695_v0 }
0x3159   :  { %v4287_v45 = vpop.f32.mrf.mxu0 }
0x315a   :  { %v4288_v31 = vadd.f32 %v4287_v45, %v4214_v25 }
0x315b   :  { %v6276_v12 = vpop.f32.mrf.mxu0 }
0x315c   :  { %v4291_v35 = vadd.f32 %v7953_v33, %v4288_v31 }
0x315e   :  { %6613 = vtanh.f32 %v4291_v35  ;;  %v5489_v18 = vmul.f32 -1.442695, %v4291_v35 }
0x3160   :  { %6615 = vpow2.f32 %v5489_v18 }
0x316b   :  { %v6614_v46 = vpop.eup %6613 }
0x316c   :  { %4301 = vrot.lane.b32.xlu0 %v6614_v46, %s6697_s19 }
0x316d   :  { %v6616_v48 = vpop.eup %6615 }
0x316e   :  { %v4295_v16 = vadd.f32 1.0, %v6616_v48 }
0x3170   :  { %6617 = vrcp.f32 %v4295_v16 }
0x317d   :  { %v6618_v49 = vpop.eup %6617 }
0x317e   :  { %v4299_v24 = vmul.f32 %v6618_v49, %v7865_v47  ;;  %v7977_v47 = vld [vmem:[%s8209_s1 + $0x88] sm:$0xff] }
0x31de   :  { %v4302_v50 = vpop.permute.xlu0 %4301 }
0x31df   :  { %v4304_v52 = vmul.f32 %v6618_v49, %v4302_v50 }
0x31e1   :  { %4306 = vrot.lane.b32.xlu0 %v4304_v52, %s6698_s20 }
0x3253   :  { %v4307_v55 = vpop.permute.xlu0 %4306 }
0x3254   :  { %v7959_v56 = vadd.f32 %v4307_v55, %v4299_v24 }
0x3256   :  { %6619 = vtanh.f32 %v7959_v56 }
0x3263   :  { %v6620_v57 = vpop.eup %6619 }
0x3264   :  { %4312 = vrot.lane.b32.xlu0 %v6620_v57, %s6697_s19 }
0x32d6   :  { %v4313_v58 = vpop.permute.xlu0 %4312 }
0x32d7   :  { %v4315_v51 = vmul.f32 %v6618_v49, %v4313_v58 }
0x32d9   :  { %4387 = vrot.lane.b32.xlu0 %v4315_v51, %s6698_s20 }
0x334b   :  { %v4388_v60 = vpop.permute.xlu0 %4387 }
0x334c   :  { %6297 = vmatmul.mubr.msk.f32.vlgmr.msra.gmra.mxu0 %vm25_vm2, %v4388_v60 }
0x334d   :  { %6311 = vmatpush3.msra.mxu0 %v7968_v61  ;;  %6318 = vmatprep.mubr.msk.f32.mxu0 %vm6696_vm0, %v6695_v0 }
0x334e   :  { %6312 = vmatprep.subr.mxu0 %v6695_v0 }
0x334f   :  { %6313 = vmatpush3.msra.mxu0 %v7977_v47 }
0x3350   :  { %6314 = vmatprep.subr.mxu0 %v6695_v0 }
0x3351   :  { %6315 = vmatpush3.msra.mxu0 %v7984_v59 }
0x3352   :  { %6316 = vmatprep.subr.mxu0 %v6695_v0 }
0x3353   :  { %6317 = vmatpush3.msra.mxu0 %v7991_v30 }
0x3354   :  { %6319 = vmatmul.mubr.msk.f32.vlgmr.msra.gmra.mxu0 %vm25_vm2, %v4388_v60  ;;  %6328 = vmatprep.subr.mxu0 %v6695_v0 }
0x3355   :  { %6329 = vmatpush3.msra.mxu0 %v7999_v32  ;;  %6336 = vmatprep.mubr.msk.f32.mxu0 %vm6696_vm0, %v6695_v0 }
0x3356   :  { %6330 = vmatprep.subr.mxu0 %v6695_v0 }
0x3357   :  { %6331 = vmatpush3.msra.mxu0 %v8008_v38 }
0x3358   :  { %6332 = vmatprep.subr.mxu0 %v6695_v0 }
0x3359   :  { %6333 = vmatpush3.msra.mxu0 %v7550_v27 }
0x335a   :  { %6334 = vmatprep.subr.mxu0 %v6695_v0 }
0x335b   :  { %6335 = vmatpush3.msra.mxu0 %v7563_v15 }
0x335c   :  { %6350 = vmatprep.subr.mxu0 %v6695_v0 }
0x340c   :  { %v4457_v41 = vpop.f32.mrf.mxu0 }
0x340d   :  { %v4458_v25 = vadd.f32 %v4457_v41, %v7930_v34 }
0x340e   :  { %v6298_v54 = vpop.f32.mrf.mxu0 }
0x340f   :  { %v4461_v14 = vadd.f32 %v7619_v39, %v4458_v25 }
0x3411   :  { %6621 = vtanh.f32 %v4461_v14  ;;  %v5492_v27 = vmul.f32 -1.442695, %v4461_v14 }
0x3413   :  { %6623 = vpow2.f32 %v5492_v27 }
0x3414   :  { %v8018_v62 = vpop.f32.mrf.mxu0 }
0x3416   :  { %v6320_v63 = vpop.f32.mrf.mxu0 }
0x341e   :  { %v6622_v1 = vpop.eup %6621 }
0x341f   :  { %4471 = vrot.lane.b32.xlu1 %v6622_v1, %s6697_s19 }
0x3420   :  { %v6624_v2 = vpop.eup %6623 }
0x3421   :  { %v4465_v9 = vadd.f32 1.0, %v6624_v2 }
0x3423   :  { %6625 = vrcp.f32 %v4465_v9 }
0x3430   :  { %v6626_v15 = vpop.eup %6625 }
0x3431   :  { %v4469_v20 = vmul.f32 %v6626_v15, %v7897_v21 }
0x3491   :  { %v4472_v10 = vpop.permute.xlu1 %4471 }
0x3492   :  { %v4474_v4 = vmul.f32 %v6626_v15, %v4472_v10 }
0x3494   :  { %4476 = vrot.lane.b32.xlu0 %v4474_v4, %s6698_s20 }
0x3506   :  { %v4477_v39 = vpop.permute.xlu0 %4476 }
0x3507   :  { %v8023_v22 = vadd.f32 %v4477_v39, %v4469_v20 }
0x3509   :  { %6627 = vtanh.f32 %v8023_v22 }
0x3516   :  { %v6628_v5 = vpop.eup %6627 }
0x3517   :  { %4482 = vrot.lane.b32.xlu0 %v6628_v5, %s6697_s19 }
0x3589   :  { %v4483_v13 = vpop.permute.xlu0 %4482 }
0x358a   :  { %v4485_v26 = vmul.f32 %v6626_v15, %v4483_v13 }
0x358c   :  { %4487 = vrot.lane.b32.xlu0 %v4485_v26, %s6698_s20  ;;  %v6692_v26 = vld [vmem:[%s8209_s1 + $0xf0] sm:$0xff] }
0x35fe   :  { %v4488_v29 = vpop.permute.xlu0 %4487 }
0x35ff   :  { %6308 = vmatmul.mubr.msk.f32.vlgmr.msra.gmra.mxu1 %vm25_vm2, %v4488_v29  ;;  %6337 = vmatmul.mubr.msk.f32.vlgmr.msra.gmra.mxu0 %vm25_vm2, %v4488_v29 }
0x3600   :  { %6322 = vmatpush3.msra.mxu1 %v7907_v23  ;;  %6325 = vmatprep.mubr.msk.f32.mxu1 %vm6696_vm0, %v6695_v0 }
0x3601   :  { %6323 = vmatprep.subr.mxu1 %v6695_v0  ;;  %6351 = vmatpush3.msra.mxu0 %v7632_v6 }
0x3602   :  { %6324 = vmatpush3.msra.mxu1 %v7917_v28  ;;  %6352 = vmatprep.subr.mxu0 %v6695_v0 }
0x3603   :  { %6339 = vmatprep.subr.mxu1 %v6695_v0  ;;  %6353 = vmatpush3.msra.mxu0 %v7637_v7 }
0x3604   :  { %6354 = vmatprep.subr.mxu0 %v6695_v0  ;;  %6358 = vmatprep.mubr.msk.f32.mxu0 %vm6696_vm0, %v6695_v0 }
0x3605   :  { %6355 = vmatpush3.msra.mxu0 %v7644_v8 }
0x3606   :  { %6356 = vmatprep.subr.mxu0 %v6695_v0 }
0x3607   :  { %6357 = vmatpush3.msra.mxu0 %v7651_v11  ;;  %v8059_v11 = vld [vmem:[%s8209_s1 + $0xb8] sm:$0xff] }
0x3608   :  { %6372 = vmatprep.subr.mxu0 %v6695_v0 }
0x36bf   :  { %v4557_v6 = vpop.f32.mrf.mxu1  ;;  %v8046_v21 = vpop.f32.mrf.mxu0 }
0x36c0   :  { %v8049_v34 = vadd.f32 %v7680_v53, %v4557_v6  ;;  %v8068_v53 = vld [vmem:[%s8209_s1 + $0xb0] sm:$0xff] }
0x36c1   :  { %v6309_v7 = vpop.f32.mrf.mxu1  ;;  %v6338_v36 = vpop.f32.mrf.mxu0 }
0x36c2   :  { %v4564_v37 = vsel %vm2875_vm11, %v8049_v34, -inf }
0x36c3   :  { %4565 = vmax.xlane.f32.xlu0 %v4564_v37 }
0x374c   :  { %v4566_v42 = vpop.xlane.xlu0 %4565 }
0x374d   :  { %vm4567_vm1 = vcmp.eq.f32.partialorder %v8049_v34, %v4566_v42 }
0x374e   :  { %v5494_v8 = vsel %vm4567_vm1, 1.0, %v6695_v0 }
0x374f   :  { %6326 = vmatmul.mubr.msk.f32.vlgmr.msra.gmra.mxu1 %vm2505_vm10, %v5494_v8 }
0x3750   :  { %6340 = vmatpush3.msra.mxu1 %v8059_v11  ;;  %6347 = vmatprep.mubr.msk.f32.mxu1 %vm6696_vm0, %v6695_v0 }
0x3751   :  { %6341 = vmatprep.subr.mxu1 %v6695_v0 }
0x3752   :  { %6342 = vmatpush3.msra.mxu1 %v8068_v53 }
0x3753   :  { %6343 = vmatprep.subr.mxu1 %v6695_v0 }
0x3754   :  { %6344 = vmatpush3.msra.mxu1 %v8075_v43 }
0x3755   :  { %6345 = vmatprep.subr.mxu1 %v6695_v0 }
0x3756   :  { %6346 = vmatpush3.msra.mxu1 %v8082_v44 }
0x3757   :  { %6361 = vmatprep.subr.mxu1 %v6695_v0 }
0x380f   :  { %v4709_v45 = vpop.f32.mrf.mxu1 }
0x3810   :  { %v4710_v31 = vadd.f32 %v4709_v45, %v8018_v62 }
0x3811   :  { %v6327_v12 = vpop.f32.mrf.mxu1 }
0x3812   :  { %v4713_v35 = vadd.f32 %v7953_v33, %v4710_v31 }
0x3814   :  { %6629 = vtanh.f32 %v4713_v35  ;;  %v5497_v18 = vmul.f32 -1.442695, %v4713_v35 }
0x3816   :  { %6631 = vpow2.f32 %v5497_v18 }
0x3821   :  { %v6630_v46 = vpop.eup %6629 }
0x3822   :  { %4723 = vrot.lane.b32.xlu1 %v6630_v46, %s6697_s19 }
0x3823   :  { %v6632_v48 = vpop.eup %6631 }
0x3824   :  { %v4717_v16 = vadd.f32 1.0, %v6632_v48 }
0x3826   :  { %6633 = vrcp.f32 %v4717_v16 }
0x3833   :  { %v6634_v49 = vpop.eup %6633 }
0x3834   :  { %v4721_v24 = vmul.f32 %v6634_v49, %v7959_v56  ;;  %v6687_v56 = vld [vmem:[%s8209_s1 + $0xc8] sm:$0xff] }
0x3894   :  { %v4724_v50 = vpop.permute.xlu1 %4723 }
0x3895   :  { %v4726_v52 = vmul.f32 %v6634_v49, %v4724_v50 }
0x3897   :  { %4728 = vrot.lane.b32.xlu1 %v4726_v52, %s6698_s20 }
0x3909   :  { %v4729_v55 = vpop.permute.xlu1 %4728 }
0x390a   :  { %v8091_v57 = vadd.f32 %v4729_v55, %v4721_v24 }
0x390c   :  { %6635 = vtanh.f32 %v8091_v57 }
0x3919   :  { %v6636_v58 = vpop.eup %6635 }
0x391a   :  { %4734 = vrot.lane.b32.xlu1 %v6636_v58, %s6697_s19 }
0x398c   :  { %v4735_v51 = vpop.permute.xlu1 %4734 }
0x398d   :  { %v4737_v60 = vmul.f32 %v6634_v49, %v4735_v51 }
0x398f   :  { %4809 = vrot.lane.b32.xlu1 %v4737_v60, %s6698_s20 }
0x3a01   :  { %v4810_v41 = vpop.permute.xlu1 %4809 }
0x3a02   :  { %6348 = vmatmul.mubr.msk.f32.vlgmr.msra.gmra.mxu1 %vm25_vm2, %v4810_v41 }
0x3a03   :  { %6362 = vmatpush3.msra.mxu1 %v7968_v61  ;;  %6369 = vmatprep.mubr.msk.f32.mxu1 %vm6696_vm0, %v6695_v0  ;;  %v6688_v61 = vld [vmem:[%s8209_s1 + $0xc0] sm:$0xff] }
0x3a04   :  { %6363 = vmatprep.subr.mxu1 %v6695_v0 }
0x3a05   :  { %6364 = vmatpush3.msra.mxu1 %v7977_v47 }
0x3a06   :  { %6365 = vmatprep.subr.mxu1 %v6695_v0 }
0x3a07   :  { %6366 = vmatpush3.msra.mxu1 %v7984_v59 }
0x3a08   :  { %6367 = vmatprep.subr.mxu1 %v6695_v0 }
0x3a09   :  { %6368 = vmatpush3.msra.mxu1 %v7991_v30 }
0x3a0a   :  { %6370 = vmatmul.mubr.msk.f32.vlgmr.msra.gmra.mxu1 %vm25_vm2, %v4810_v41  ;;  %6379 = vmatprep.subr.mxu1 %v6695_v0 }
0x3a0b   :  { %6380 = vmatpush3.msra.mxu1 %v7999_v32  ;;  %6387 = vmatprep.mubr.msk.f32.mxu1 %vm6696_vm0, %v6695_v0  ;;  %v8126_v32 = vld [vmem:[%s8209_s1 + $0xe0] ss:$0 sm:$0xff] }
0x3a0c   :  { %6381 = vmatprep.subr.mxu1 %v6695_v0 }
0x3a0d   :  { %6382 = vmatpush3.msra.mxu1 %v8008_v38 }
0x3a0e   :  { %6383 = vmatprep.subr.mxu1 %v6695_v0 }
0x3a0f   :  { %6384 = vmatpush3.msra.mxu1 %v6687_v56 }
0x3a10   :  { %6385 = vmatprep.subr.mxu1 %v6695_v0 }
0x3a11   :  { %6386 = vmatpush3.msra.mxu1 %v6688_v61 }
0x3a12   :  { %6401 = vmatprep.subr.mxu1 %v6695_v0 }
0x3ac2   :  { %v4879_v47 = vpop.f32.mrf.mxu1 }
0x3ac3   :  { %v4880_v59 = vadd.f32 %v4879_v47, %v8046_v21  ;;  %v8167_v21 = vld [vmem:[%s8209_s1 + $0x108] ss:$0 sm:$0xff] }
0x3ac4   :  { %v6349_v30 = vpop.f32.mrf.mxu1 }
0x3ac5   :  { %v4883_v38 = vadd.f32 %v8126_v32, %v4880_v59 }
0x3ac7   :  { %6637 = vtanh.f32 %v4883_v38  ;;  %v5500_v62 = vmul.f32 -1.442695, %v4883_v38 }
0x3ac9   :  { %6639 = vpow2.f32 %v5500_v62 }
0x3aca   :  { %v8129_v25 = vpop.f32.mrf.mxu1 }
0x3acc   :  { %v6371_v54 = vpop.f32.mrf.mxu1 }
0x3ad4   :  { %v6638_v14 = vpop.eup %6637 }
0x3ad5   :  { %4893 = vrot.lane.b32.xlu1 %v6638_v14, %s6697_s19 }
0x3ad6   :  { %v6640_v63 = vpop.eup %6639 }
0x3ad7   :  { %v4887_v1 = vadd.f32 1.0, %v6640_v63 }
0x3ad9   :  { %6641 = vrcp.f32 %v4887_v1 }
0x3ae6   :  { %v6642_v27 = vpop.eup %6641 }
0x3ae7   :  { %v4891_v15 = vmul.f32 %v6642_v27, %v8023_v22  ;;  %v6690_v22 = vld [vmem:[%s8209_s1 + $0x100] sm:$0xff] }
0x3b47   :  { %v4894_v2 = vpop.permute.xlu1 %4893 }
0x3b48   :  { %v4896_v9 = vmul.f32 %v6642_v27, %v4894_v2 }
0x3b4a   :  { %4898 = vrot.lane.b32.xlu1 %v4896_v9, %s6698_s20 }
0x3bbc   :  { %v4899_v10 = vpop.permute.xlu1 %4898 }
0x3bbd   :  { %v8134_v4 = vadd.f32 %v4899_v10, %v4891_v15 }
0x3bbf   :  { %6643 = vtanh.f32 %v8134_v4 }
0x3bcc   :  { %v6644_v20 = vpop.eup %6643 }
0x3bcd   :  { %4904 = vrot.lane.b32.xlu1 %v6644_v20, %s6697_s19 }
0x3c3f   :  { %v4905_v39 = vpop.permute.xlu1 %4904 }
0x3c40   :  { %v4907_v5 = vmul.f32 %v6642_v27, %v4905_v39 }
0x3c42   :  { %4909 = vrot.lane.b32.xlu0 %v4907_v5, %s6698_s20 }
0x3cb4   :  { %v4910_v13 = vpop.permute.xlu0 %4909 }
0x3cb5   :  { %6359 = vmatmul.mubr.msk.f32.vlgmr.msra.gmra.mxu0 %vm25_vm2, %v4910_v13  ;;  %6388 = vmatmul.mubr.msk.f32.vlgmr.msra.gmra.mxu1 %vm25_vm2, %v4910_v13 }
0x3cb6   :  { %6373 = vmatpush3.msra.mxu0 %v7907_v23  ;;  %6376 = vmatprep.mubr.msk.f32.mxu0 %vm6696_vm0, %v6695_v0  ;;  %v6691_v23 = vld [vmem:[%s8209_s1 + $0xf8] sm:$0xff] }
0x3cb7   :  { %6374 = vmatprep.subr.mxu0 %v6695_v0  ;;  %6402 = vmatpush3.msra.mxu1 %v6690_v22 }
0x3cb8   :  { %6375 = vmatpush3.msra.mxu0 %v7917_v28  ;;  %6403 = vmatprep.subr.mxu1 %v6695_v0  ;;  %v6693_v28 = vld [vmem:[%s8209_s1 + $0xe8] sm:$0xff]  ;;  %s6700_s1 = smov 16  }
0x3cb9   :  { %6390 = vmatprep.subr.mxu0 %v6695_v0  ;;  %6404 = vmatpush3.msra.mxu1 %v6691_v23 }
0x3cba   :  { %6405 = vmatprep.subr.mxu1 %v6695_v0  ;;  %6409 = vmatprep.mubr.msk.f32.mxu1 %vm6696_vm0, %v6695_v0 }
0x3cbb   :  { %6406 = vmatpush3.msra.mxu1 %v6692_v26 }
0x3cbc   :  { %6407 = vmatprep.subr.mxu1 %v6695_v0 }
0x3cbd   :  { %6408 = vmatpush3.msra.mxu1 %v6693_v28 }
0x3d75   :  { %v4979_v29 = vpop.f32.mrf.mxu0  ;;  %v5226_v6 = vpop.f32.mrf.mxu1 }
0x3d76   :  { %v4980_v7 = vadd.f32 %v8167_v21, %v4979_v29 }
0x3d77   :  { %v6360_v36 = vpop.f32.mrf.mxu0  ;;  %v6389_v37 = vpop.f32.mrf.mxu1 }
0x3d78   :  { %v4986_v42 = vsel %vm2875_vm11, %v4980_v7, -inf }
0x3d79   :  { %4987 = vmax.xlane.f32.xlu1 %v4986_v42 }
0x3e02   :  { %v4988_v8 = vpop.xlane.xlu1 %4987 }
0x3e03   :  { %vm4989_vm3 = vcmp.eq.f32.partialorder %v4980_v7, %v4988_v8 }
0x3e04   :  { %v5502_v45 = vsel %vm4989_vm3, 1.0, %v6695_v0 }
0x3e05   :  { %6377 = vmatmul.mubr.msk.f32.vlgmr.msra.gmra.mxu0 %vm2505_vm10, %v5502_v45 }
0x3e06   :  { %6391 = vmatpush3.msra.mxu0 %v8059_v11  ;;  %6398 = vmatprep.mubr.msk.f32.mxu0 %vm6696_vm0, %v6695_v0 }
0x3e07   :  { %6392 = vmatprep.subr.mxu0 %v6695_v0 }
0x3e08   :  { %6393 = vmatpush3.msra.mxu0 %v8068_v53 }
0x3e09   :  { %6394 = vmatprep.subr.mxu0 %v6695_v0 }
0x3e0a   :  { %6395 = vmatpush3.msra.mxu0 %v8075_v43 }
0x3e0b   :  { %6396 = vmatprep.subr.mxu0 %v6695_v0 }
0x3e0c   :  { %6397 = vmatpush3.msra.mxu0 %v8082_v44 }
0x3ec5   :  { %v5131_v31 = vpop.f32.mrf.mxu0 }
0x3ec6   :  { %v5132_v12 = vadd.f32 %v5131_v31, %v8129_v25 }
0x3ec7   :  { %v6378_v35 = vpop.f32.mrf.mxu0 }
0x3ec8   :  { %v5135_v11 = vadd.f32 %v7953_v33, %v5132_v12 }
0x3eca   :  { %6645 = vtanh.f32 %v5135_v11  ;;  %v5505_v18 = vmul.f32 -1.442695, %v5135_v11 }
0x3ecc   :  { %6647 = vpow2.f32 %v5505_v18 }
0x3ed7   :  { %v6646_v46 = vpop.eup %6645 }
0x3ed8   :  { %5145 = vrot.lane.b32.xlu0 %v6646_v46, %s6697_s19 }
0x3ed9   :  { %v6648_v53 = vpop.eup %6647 }
0x3eda   :  { %v5139_v48 = vadd.f32 1.0, %v6648_v53 }
0x3edc   :  { %6649 = vrcp.f32 %v5139_v48 }
0x3ee9   :  { %v6650_v43 = vpop.eup %6649 }
0x3eea   :  { %v5143_v44 = vmul.f32 %v6650_v43, %v8091_v57 }
0x3f4a   :  { %v5146_v16 = vpop.permute.xlu0 %5145 }
0x3f4b   :  { %v5148_v0 = vmul.f32 %v6650_v43, %v5146_v16 }
0x3f4d   :  { %5150 = vrot.lane.b32.xlu0 %v5148_v0, %s6698_s20 }
0x3fbf   :  { %v5151_v49 = vpop.permute.xlu0 %5150 }
0x3fc0   :  { %v5153_v50 = vadd.f32 %v5151_v49, %v5143_v44 }
0x3fc2   :  { %6651 = vtanh.f32 %v5153_v50 }
0x3fcf   :  { %v6652_v33 = vpop.eup %6651 }
0x3fd0   :  { %5156 = vrot.lane.b32.xlu0 %v6652_v33, %s6697_s19 }
0x4042   :  { %v5157_v52 = vpop.permute.xlu0 %5156 }
0x4043   :  { %v5159_v24 = vmul.f32 %v6650_v43, %v5157_v52 }
0x4045   :  { %5231 = vrot.lane.b32.xlu0 %v5159_v24, %s6698_s20 }
0x40b7   :  { %v5232_v55 = vpop.permute.xlu0 %5231 }
0x40b8   :  { %6399 = vmatmul.mubr.msk.f32.vlgmr.msra.gmra.mxu0 %vm25_vm2, %v5232_v55 }
0x4178   :  { %v5301_v58 = vpop.f32.mrf.mxu0 }
0x4179   :  { %v5302_v51 = vadd.f32 %v5301_v58, %v5226_v6 }
0x417a   :  { %v6400_v60 = vpop.f32.mrf.mxu0 }
0x417b   :  { %v5305_v41 = vadd.f32 %v8126_v32, %v5302_v51 }
0x417d   :  { %6653 = vtanh.f32 %v5305_v41  ;;  %v5508_v56 = vmul.f32 -1.442695, %v5305_v41 }
0x417f   :  { %6655 = vpow2.f32 %v5508_v56 }
0x418a   :  { %v6654_v57 = vpop.eup %6653 }
0x418b   :  { %5315 = vrot.lane.b32.xlu1 %v6654_v57, %s6697_s19 }
0x418c   :  { %v6656_v61 = vpop.eup %6655 }
0x418d   :  { %v5309_v47 = vadd.f32 1.0, %v6656_v61 }
0x418f   :  { %3295 = vrot.lane.b32.xlu1 %v7765_v17, %s6698_s20  ;;  %6657 = vrcp.f32 %v5309_v47 }
0x4193   :  { %4139 = vrot.lane.b32.xlu1 %v7933_v40, %s6697_s19 }
0x4197   :  { %4983 = vrot.lane.b32.xlu1 %v4980_v7, %s6699_s9  ;;  %s6701_s9 = smov 48  }
0x419c   :  { %v6658_v59 = vpop.eup %6657 }
0x419d   :  { %v5313_v38 = vmul.f32 %v6658_v59, %v8134_v4 }
0x41fd   :  { %v5316_v30 = vpop.permute.xlu1 %5315 }
0x41fe   :  { %v5318_v32 = vmul.f32 %v6658_v59, %v5316_v30 }
0x4200   :  { %5320 = vrot.lane.b32.xlu0 %v5318_v32, %s6698_s20 }
0x4201   :  { %v3296_v9 = vpop.permute.xlu1 %3295 }
0x4205   :  { %v4140_v4 = vpop.permute.xlu1 %4139 }
0x4209   :  { %v4984_v5 = vpop.permute.xlu1 %4983 }
0x4272   :  { %v5321_v25 = vpop.permute.xlu0 %5320 }
0x4273   :  { %v5323_v54 = vadd.f32 %v5321_v25, %v5313_v38 }
0x4275   :  { %6659 = vtanh.f32 %v5323_v54 }
0x4282   :  { %v6660_v17 = vpop.eup %6659 }
0x4283   :  { %5326 = vrot.lane.b32.xlu0 %v6660_v17, %s6697_s19  ;;  %s6703_s19 = smov 112  }
0x42f5   :  { %v5327_v40 = vpop.permute.xlu0 %5326 }
0x42f6   :  { %v5329_v14 = vmul.f32 %v6658_v59, %v5327_v40 }
0x42f8   :  { %5331 = vrot.lane.b32.xlu0 %v5329_v14, %s6698_s20 }
0x42fc   :  { %2872 = vrot.lane.b32.xlu0 %v7685_v19, %s6700_s1 }
0x4300   :  { %3717 = vrot.lane.b32.xlu0 %v7844_v3, %s6701_s9 }
0x4304   :  { %4561 = vrot.lane.b32.xlu0 %v8049_v34, %s6702_s28 }
0x436a   :  { %v5332_v62 = vpop.permute.xlu0 %5331 }
0x436b   :  { %6410 = vmatmul.mubr.msk.f32.vlgmr.msra.gmra.mxu1 %vm25_vm2, %v5332_v62 }
0x436e   :  { %v2873_v2 = vpop.permute.xlu0 %2872 }
0x436f   :  { %v3297_v10 = vadd.f32 %v3296_v9, %v2873_v2 }
0x4372   :  { %v3718_v15 = vpop.permute.xlu0 %3717 }
0x4373   :  { %v3719_v19 = vadd.f32 %v3718_v15, %v3297_v10 }
0x4375   :  { %v4141_v20 = vadd.f32 %v4140_v4, %v3719_v19 }
0x4376   :  { %v4562_v3 = vpop.permute.xlu0 %4561 }
0x4377   :  { %v4563_v39 = vadd.f32 %v4562_v3, %v4141_v20 }
0x4379   :  { %v4985_v34 = vadd.f32 %v4984_v5, %v4563_v39 }
0x442b   :  { %v5401_v63 = vpop.f32.mrf.mxu1 }
0x442c   :  { %v5402_v1 = vadd.f32 %v8167_v21, %v5401_v63 }
0x442d   :  { %v6411_v27 = vpop.f32.mrf.mxu1 }
0x442e   :  { %5405 = vrot.lane.b32.xlu0 %v5402_v1, %s6703_s19 }
0x44a0   :  { %v5406_v13 = vpop.permute.xlu0 %5405 }
0x44a1   :  { %v5407_v22 = vadd.f32 %v5406_v13, %v4985_v34 }
0x44a3   :  { %5408 = vst [vmem:[%s8211_s2] sm:$0x3] %v5407_v22 }

</bundles_post_ra>
